<compile_context>
chip_gen: v7x
topology: tpu7x:2x2x1
jax: 0.10.0
libtpu: 0.0.40
codegen_flags: <defaults>
</compile_context>

<pallas_src>
import functools

import jax
import jax.numpy as jnp
from jax.experimental import pallas as pl
from jax.experimental.pallas import tpu as pltpu

# Full f32 matmul precision for the XLA-side table build and the reference,
# so the f32 correctness check is tight.
jax.config.update("jax_default_matmul_precision", "highest")


def _round_up(x, m):
    return ((x + m - 1) // m) * m


# ----------------------------- Pallas GRU kernel -----------------------------
def gru_block_kernel(xp_ref, whh_ref, bhn_ref, len_ref, out_ref, hN_ref):
    """One grid step == T timesteps of the GRU over one batch block.

    xp_ref  : (T, Bb, 3Hc)  x_t @ W_ih + b_ih (+ folded b_hh_{r,z}), time-major,
                            gate order (r, z, n); may be bf16 (upcast on load)
    whh_ref : (Hc, 3Hc)     fused hidden->hidden weights (resident, f32)
    bhn_ref : (1, Hc)       n-gate hidden bias (resident, f32)
    len_ref : (Bb, 1)       int32 sequence lengths (resident)
    out_ref : (T, Bb, Hc)   per-timestep outputs h_t (zeros past length), time-major
    hN_ref  : (Bb, Hc)      final hidden state; carry across the (inner) time grid axis
    """
    i = pl.program_id(1)          # time-block index (inner, "arbitrary")
    T = xp_ref.shape[0]
    Hc = hN_ref.shape[1]

    @pl.when(i == 0)
    def _():
        hN_ref[...] = jnp.zeros_like(hN_ref)

    w_hh = whh_ref[...]           # (Hc, 3Hc), read once per grid step
    b_hn = bhn_ref[...]           # (1, Hc)
    lens = len_ref[...]           # (Bb, 1) int32
    t0 = i * T

    h = hN_ref[...]               # (Bb, Hc) f32 carry
    # TODO(synk): at larger Bb (>=32), bound vreg live ranges with per-gate loads or
    # lax.fori_loop; a static unroll is fine at the small Bb used here.
    # TODO(synk): stage W_hh on the MXU across the unroll (matmul_push_rhs/acc_lhs/pop).
    for tt in range(T):           # static unroll (T bounded by T_max)
        xg = xp_ref[tt].astype(jnp.float32)                 # (Bb, 3Hc)
        hg = jnp.dot(h, w_hh, preferred_element_type=jnp.float32)   # (Bb, 3Hc)
        r = jax.nn.sigmoid(xg[:, 0 * Hc:1 * Hc] + hg[:, 0 * Hc:1 * Hc])
        z = jax.nn.sigmoid(xg[:, 1 * Hc:2 * Hc] + hg[:, 1 * Hc:2 * Hc])
        n = jnp.tanh(xg[:, 2 * Hc:3 * Hc] + r * (hg[:, 2 * Hc:3 * Hc] + b_hn))
        h_new = (1.0 - z) * n + z * h
        # Packed-sequence semantics: only update state while t < lengths[b].
        m = (t0 + tt) < lens                                 # (Bb, 1) bool
        h = jnp.where(m, h_new, h)
        out_ref[tt] = jnp.where(m, h_new, 0.0).astype(out_ref.dtype)

    hN_ref[...] = h


def gru_pallas(x_proj, w_hh, b_hn, lens_col, *, T, batch_blocks=1):
    """x_proj: (Sp, Bp, 3Hc) time-major precomputed input projection (f32 or bf16)."""
    Sp, Bp, H3 = x_proj.shape
    Hc = w_hh.shape[0]
    Bb = Bp // batch_blocks
    nT = Sp // T
    grid = (batch_blocks, nT)     # (parallel batch blocks, sequential time blocks)

    # Explicit VMEM budget: double-buffered streams + residents (per review).
    stream_bytes = x_proj.dtype.itemsize
    need = (2 * T * Bb * H3 * stream_bytes          # x_proj blocks (double-buffered)
            + 2 * T * Bb * Hc * 4                   # output blocks (double-buffered)
            + Hc * H3 * 4 + Hc * 4                  # resident W_hh, b_hn
            + Bb * 4 + Bb * Hc * 4)                 # resident lens, hN carry
    vmem_limit = int(min(64 << 20, max(2 * need + (2 << 20), 16 << 20)))

    grid_spec = pltpu.PrefetchScalarGridSpec(
        num_scalar_prefetch=0,
        grid=grid,
        in_specs=[
            pl.BlockSpec((T, Bb, H3), lambda b, i: (i, b, 0)),   # x_proj (streamed)
            pl.BlockSpec((Hc, H3), lambda b, i: (0, 0)),         # W_hh (resident)
            pl.BlockSpec((1, Hc), lambda b, i: (0, 0)),          # b_hh_n (resident)
            pl.BlockSpec((Bb, 1), lambda b, i: (b, 0)),          # lengths (resident)
        ],
        out_specs=[
            pl.BlockSpec((T, Bb, Hc), lambda b, i: (i, b, 0)),   # per-step outputs
            pl.BlockSpec((Bb, Hc), lambda b, i: (b, 0)),         # final hidden / carry
        ],
    )

    outs, h_n = pl.pallas_call(
        gru_block_kernel,
        out_shape=(
            jax.ShapeDtypeStruct((Sp, Bp, Hc), jnp.float32),
            jax.ShapeDtypeStruct((Bp, Hc), jnp.float32),
        ),
        grid_spec=grid_spec,
        compiler_params=pltpu.CompilerParams(
            dimension_semantics=("parallel", "arbitrary"),  # batch parallel, time serial
            vmem_limit_bytes=vmem_limit,
        ),
    )(x_proj, w_hh, b_hn, lens_col)
    return outs, h_n


# --------------------------- weight padding helpers ---------------------------
def _pad_gates(w, H, Hc):
    """Pad each of the 3 gate chunks along the last axis from H to Hc with zeros."""
    if Hc == H:
        return w
    pads = [(0, 0)] * (w.ndim - 1) + [(0, Hc - H)]
    parts = [jnp.pad(w[..., g * H:(g + 1) * H], pads) for g in range(3)]
    return jnp.concatenate(parts, axis=-1)


# ------------------------------- Encoder wrapper -------------------------------
def encoder_forward(tokens, lengths, params, *, T_max=32, batch_blocks=1,
                    stream_dtype=jnp.bfloat16):
    """tokens: (B, S) int32; lengths: (B,) int32.

    Returns (outputs, hidden):
      outputs: (B, S, H) padded GRU outputs (zeros past lengths)
      hidden : (1, B, H) final hidden state per sequence (num_layers = 1)

    batch_blocks=2 splits the batch across a leading 'parallel' grid axis
    (use on v7x's 2 TensorCores when Bp >= 16); default 1 keeps single-TC chips optimal.
    stream_dtype=jnp.float32 gives bit-tight f32 numerics; bf16 halves the dominant
    streamed bytes (h carry / gate math / matmul stay f32 either way).
    """
    B, S = tokens.shape
    H = params["w_hh"].shape[0]

    # Gate channel width: pack r,z,n tightly when 3H fits in one 128-lane tile
    # (H <= 42); otherwise pad each gate to a lane-dense 128 multiple.
    Hc = H if 3 * H <= 128 else _round_up(H, 128)

    Bp = _round_up(B, 8 * batch_blocks)          # sublane-dense per batch block
    T = min(T_max, _round_up(S, 8))              # amortize grid overhead w/o over-padding
    Sp = _round_up(S, T)

    # Pad tokens/lengths; padded rows get length 0 (state stays 0, sliced off at the end).
    tok_p = jnp.pad(tokens, ((0, Bp - B), (0, Sp - S)))
    len_p = jnp.pad(lengths.astype(jnp.int32), (0, Bp - B))

    # Gate-padded fused weights (zero padding keeps padded hidden channels exactly 0).
    w_ih_g = _pad_gates(params["w_ih"], H, Hc)                                   # (E, 3Hc)
    b_ih_g = _pad_gates(params["b_ih"][None, :], H, Hc)                          # (1, 3Hc)
    b_hh_g = _pad_gates(params["b_hh"][None, :], H, Hc)                          # (1, 3Hc)
    w_hh_g = _pad_gates(jnp.pad(params["w_hh"], ((0, Hc - H), (0, 0))), H, Hc)   # (Hc, 3Hc)

    # Fold r/z hidden biases into the input projection; keep only the n-gate hidden
    # bias in the kernel (it must remain inside r*(...)).
    b_hh_rz = b_hh_g.at[:, 2 * Hc:].set(0.0)
    b_hn = b_hh_g[:, 2 * Hc:3 * Hc]                                              # (1, Hc)

    # Fused embedding + input-projection lookup table: one tiny (vocab,E)x(E,3Hc) matmul,
    # then a lane-dense 3Hc-wide gather for all timesteps (time-major, no big transpose).
    emb_fused = (params["embedding"].astype(jnp.float32) @ w_ih_g
                 + b_ih_g + b_hh_rz).astype(stream_dtype)                        # (vocab, 3Hc)
    x_proj = jnp.take(emb_fused, tok_p.T, axis=0)                                # (Sp, Bp, 3Hc)

    outs_tb, h_n = gru_pallas(x_proj, w_hh_g, b_hn, len_p[:, None],
                              T=T, batch_blocks=batch_blocks)

    # Slice BEFORE the relayout so the transpose only moves the real (S,B,H) bytes.
    outputs = jnp.transpose(outs_tb[:S, :B, :H], (1, 0, 2))                      # (B, S, H)
    hidden = h_n[None, :B, :H]                                                   # (1, B, H)
    return outputs, hidden


# ----------------------------- pure-JAX reference -----------------------------
def gru_ref(embedded, lengths, params):
    """Reference GRU over batch-first embedded inputs with packed-sequence masking."""
    B, S, _ = embedded.shape
    H = params["w_hh"].shape[0]
    w_ih, w_hh = params["w_ih"], params["w_hh"]
    b_ih, b_hh = params["b_ih"], params["b_hh"]

    def wg(w, g):
        return w[:, g * H:(g + 1) * H]

    def bg(b, g):
        return b[g * H:(g + 1) * H]

    def step(h, inp):
        x_t, t = inp
        m = (t < lengths)[:, None].astype(jnp.float32)
        r = jax.nn.sigmoid(x_t @ wg(w_ih, 0) + bg(b_ih, 0) + h @ wg(w_hh, 0) + bg(b_hh, 0))
        z = jax.nn.sigmoid(x_t @ wg(w_ih, 1) + bg(b_ih, 1) + h @ wg(w_hh, 1) + bg(b_hh, 1))
        n = jnp.tanh(x_t @ wg(w_ih, 2) + bg(b_ih, 2) + r * (h @ wg(w_hh, 2) + bg(b_hh, 2)))
        h_new = (1.0 - z) * n + z * h
        h_next = m * h_new + (1.0 - m) * h
        return h_next, m * h_new

    emb_tb = jnp.transpose(embedded, (1, 0, 2)).astype(jnp.float32)
    h0 = jnp.zeros((B, H), jnp.float32)
    h_n, outs = jax.lax.scan(step, h0, (emb_tb, jnp.arange(S, dtype=jnp.int32)))
    return jnp.transpose(outs, (1, 0, 2)), h_n


# ---------------------------------- params ------------------------------------
def init_params(key, input_size, embed_size, hidden_size):
    k_emb, k_wi, k_wh, k_bi, k_bh = jax.random.split(key, 5)
    bound = 1.0 / jnp.sqrt(hidden_size)
    emb = jax.random.normal(k_emb, (input_size, embed_size), jnp.float32)
    emb = emb.at[0].set(0.0)  # padding_idx=0
    # Fused (in, 3H) gate layout, gate order (r, z, n) along the last axis.
    # NOTE: real PyTorch weight_ih/hh are stored (3H, in) and must be transposed into this layout.
    w_ih = jax.random.uniform(k_wi, (embed_size, 3 * hidden_size), jnp.float32, -bound, bound)
    w_hh = jax.random.uniform(k_wh, (hidden_size, 3 * hidden_size), jnp.float32, -bound, bound)
    b_ih = jax.random.uniform(k_bi, (3 * hidden_size,), jnp.float32, -bound, bound)
    b_hh = jax.random.uniform(k_bh, (3 * hidden_size,), jnp.float32, -bound, bound)
    return {"embedding": emb, "w_ih": w_ih, "w_hh": w_hh, "b_ih": b_ih, "b_hh": b_hh}


if __name__ == "__main__":
    # Small, deterministic example: vocab=50, embed=16, hidden=32, num_layers=1, GRU.
    input_size, embed_size, hidden_size = 50, 16, 32
    B, S = 4, 13   # S not a multiple of T -> exercises the time padding path

    key = jax.random.PRNGKey(0)
    k_p, k_x = jax.random.split(key)
    params = init_params(k_p, input_size, embed_size, hidden_size)

    lengths = jnp.array([13, 9, 4, 7], dtype=jnp.int32)
    tokens = jax.random.randint(k_x, (B, S), 1, input_size, dtype=jnp.int32)
    # Zero out padding positions (typical padded-batch input).
    pad_mask = jnp.arange(S, dtype=jnp.int32)[None, :] < lengths[:, None]
    tokens = jnp.where(pad_mask, tokens, 0)

    # Pure-JAX reference (nn.GRU eval semantics with packed-sequence masking).
    embedded = jnp.take(params["embedding"], tokens, axis=0)
    ref_outputs, ref_hn = gru_ref(embedded, lengths, params)

    # 1) f32-streamed run: tight check of the kernel math / packed-gate layout.
    fwd_f32 = jax.jit(functools.partial(encoder_forward, stream_dtype=jnp.float32))
    out_f32, hid_f32 = jax.block_until_ready(fwd_f32(tokens, lengths, params))
    assert out_f32.shape == (B, S, hidden_size)
    assert hid_f32.shape == (1, B, hidden_size)
    assert jnp.allclose(out_f32, ref_outputs, atol=1e-4, rtol=1e-4)
    assert jnp.allclose(hid_f32[0], ref_hn, atol=1e-4, rtol=1e-4)

    # 2) Default bf16-streamed run (v6e/v7x-friendly): looser tolerance for the
    #    bf16 rounding of the streamed input projection.
    fwd = jax.jit(encoder_forward)
    outputs, hidden = jax.block_until_ready(fwd(tokens, lengths, params))
    assert outputs.shape == (B, S, hidden_size)
    assert hidden.shape == (1, B, hidden_size)
    assert jnp.allclose(outputs, ref_outputs, atol=3e-2, rtol=3e-2)
    assert jnp.allclose(hidden[0], ref_hn, atol=3e-2, rtol=3e-2)

    print("KERNEL_OK")
</pallas_src>

<mosaic_0001>
module attributes {stable_mosaic.version = 11 : i64} {
  func.func @gru_block_kernel(%arg0: i32, %arg1: i32, %arg2: memref<16x8x96xf32, #tpu.memory_space<vmem>>, %arg3: memref<32x96xf32, #tpu.memory_space<vmem>>, %arg4: memref<1x32xf32, #tpu.memory_space<vmem>>, %arg5: memref<8x1xi32, #tpu.memory_space<vmem>>, %arg6: memref<16x8x32xf32, #tpu.memory_space<vmem>>, %arg7: memref<8x32xf32, #tpu.memory_space<vmem>>) attributes {dimension_semantics = [#tpu.dimension_semantics<parallel>, #tpu.dimension_semantics<arbitrary>], iteration_bounds = array<i64: 1, 1>, scalar_prefetch = 0 : i64, scratch_operands = 0 : i64, tpu.core_type = #tpu.core_type<tc>, window_params = [{transform_indices = @transform_0, window_bounds = array<i64: 16, 8, 96>}, {pipeline_mode = #tpu.pipeline_mode<synchronous>, transform_indices = @transform_1, window_bounds = array<i64: 32, 96>}, {pipeline_mode = #tpu.pipeline_mode<synchronous>, transform_indices = @transform_2, window_bounds = array<i64: 1, 32>}, {transform_indices = @transform_3, window_bounds = array<i64: 8, 1>}, {transform_indices = @transform_4, window_bounds = array<i64: 16, 8, 32>}, {transform_indices = @transform_5, window_bounds = array<i64: 8, 32>}]} {
    %c0_i32 = arith.constant 0 : i32
    %0 = arith.cmpi eq, %arg1, %c0_i32 : i32
    %1 = arith.extui %0 : i1 to i32
    %c0_i32_0 = arith.constant 0 : i32
    %2 = arith.cmpi ne, %1, %c0_i32_0 : i32
    scf.if %2 {
      %cst_171 = arith.constant 0.000000e+00 : f32
      %713 = vector.broadcast %cst_171 : f32 to vector<8x32xf32>
      %c0_172 = arith.constant 0 : index
      %c0_173 = arith.constant 0 : index
      %714 = vector.load %arg7[%c0_172, %c0_173] : memref<8x32xf32, #tpu.memory_space<vmem>>, vector<8x32xf32>
      tpu.vector_store %arg7[%c0_172, %c0_173], %713 {strides = array<i32>} : memref<8x32xf32, #tpu.memory_space<vmem>>, vector<8x32xf32>,
    } else {
    }
    %c0 = arith.constant 0 : index
    %c0_1 = arith.constant 0 : index
    %3 = vector.load %arg3[%c0, %c0_1] : memref<32x96xf32, #tpu.memory_space<vmem>>, vector<32x96xf32>
    %c0_2 = arith.constant 0 : index
    %c0_3 = arith.constant 0 : index
    %4 = vector.load %arg4[%c0_2, %c0_3] : memref<1x32xf32, #tpu.memory_space<vmem>>, vector<1x32xf32>
    %c0_4 = arith.constant 0 : index
    %c0_5 = arith.constant 0 : index
    %5 = vector.load %arg5[%c0_4, %c0_5] : memref<8x1xi32, #tpu.memory_space<vmem>>, vector<8x1xi32>
    %c16_i32 = arith.constant 16 : i32
    %6 = arith.muli %arg1, %c16_i32 : i32
    %c0_6 = arith.constant 0 : index
    %c0_7 = arith.constant 0 : index
    %7 = vector.load %arg7[%c0_6, %c0_7] : memref<8x32xf32, #tpu.memory_space<vmem>>, vector<8x32xf32>
    %c0_8 = arith.constant 0 : index
    %c0_9 = arith.constant 0 : index
    %c0_10 = arith.constant 0 : index
    %8 = vector.load %arg2[%c0_8, %c0_9, %c0_10] : memref<16x8x96xf32, #tpu.memory_space<vmem>>, vector<1x8x96xf32>
    %9 = vector.shape_cast %8 : vector<1x8x96xf32> to vector<8x96xf32>
    %cst = arith.constant dense<0.000000e+00> : vector<8x96xf32>
    %10 = tpu.matmul %7, %3, %cst {dimension_numbers = #tpu.dot_dimension_numbers<[1], [0], [0], [1], [0, 0, 1, 1], [], []>, precision = #tpu.contract_precision<fp32>} : vector<8x32xf32>, vector<32x96xf32>, vector<8x96xf32> -> vector<8x96xf32>
    %11 = vector.extract_strided_slice %9 {offsets = [0, 0], sizes = [8, 32], strides = [1, 1]} : vector<8x96xf32> to vector<8x32xf32>
    %12 = vector.extract_strided_slice %10 {offsets = [0, 0], sizes = [8, 32], strides = [1, 1]} : vector<8x96xf32> to vector<8x32xf32>
    %13 = arith.addf %11, %12 : vector<8x32xf32>
    %14 = arith.negf %13 : vector<8x32xf32>
    %15 = math.exp %14 : vector<8x32xf32>
    %cst_11 = arith.constant 1.000000e+00 : f32
    %16 = vector.broadcast %cst_11 : f32 to vector<8x32xf32>
    %17 = arith.addf %16, %15 : vector<8x32xf32>
    %18 = arith.divf %16, %17 : vector<8x32xf32>
    %19 = vector.extract_strided_slice %9 {offsets = [0, 32], sizes = [8, 32], strides = [1, 1]} : vector<8x96xf32> to vector<8x32xf32>
    %20 = vector.extract_strided_slice %10 {offsets = [0, 32], sizes = [8, 32], strides = [1, 1]} : vector<8x96xf32> to vector<8x32xf32>
    %21 = arith.addf %19, %20 : vector<8x32xf32>
    %22 = arith.negf %21 : vector<8x32xf32>
    %23 = math.exp %22 : vector<8x32xf32>
    %cst_12 = arith.constant 1.000000e+00 : f32
    %24 = vector.broadcast %cst_12 : f32 to vector<8x32xf32>
    %25 = arith.addf %24, %23 : vector<8x32xf32>
    %26 = arith.divf %24, %25 : vector<8x32xf32>
    %27 = vector.extract_strided_slice %9 {offsets = [0, 64], sizes = [8, 32], strides = [1, 1]} : vector<8x96xf32> to vector<8x32xf32>
    %28 = vector.extract_strided_slice %10 {offsets = [0, 64], sizes = [8, 32], strides = [1, 1]} : vector<8x96xf32> to vector<8x32xf32>
    %29 = vector.broadcast %4 : vector<1x32xf32> to vector<8x32xf32>
    %30 = arith.addf %28, %29 : vector<8x32xf32>
    %31 = arith.mulf %18, %30 : vector<8x32xf32>
    %32 = arith.addf %27, %31 : vector<8x32xf32>
    %33 = math.tanh %32 : vector<8x32xf32>
    %cst_13 = arith.constant 1.000000e+00 : f32
    %34 = vector.broadcast %cst_13 : f32 to vector<8x32xf32>
    %35 = arith.subf %34, %26 : vector<8x32xf32>
    %36 = arith.mulf %35, %33 : vector<8x32xf32>
    %37 = arith.mulf %26, %7 : vector<8x32xf32>
    %38 = arith.addf %36, %37 : vector<8x32xf32>
    %c0_i32_14 = arith.constant 0 : i32
    %39 = arith.addi %6, %c0_i32_14 : i32
    %40 = vector.broadcast %39 : i32 to vector<8x1xi32>
    %41 = arith.cmpi slt, %40, %5 : vector<8x1xi32>
    %42 = vector.shape_cast %41 : vector<8x1xi1> to vector<8x1xi1>
    %43 = vector.broadcast %42 : vector<8x1xi1> to vector<8x32xi1>
    %44 = arith.select %43, %38, %7 : vector<8x32xi1>, vector<8x32xf32>
    %cst_15 = arith.constant 0.000000e+00 : f32
    %45 = vector.shape_cast %41 : vector<8x1xi1> to vector<8x1xi1>
    %46 = vector.broadcast %45 : vector<8x1xi1> to vector<8x32xi1>
    %47 = vector.broadcast %cst_15 : f32 to vector<8x32xf32>
    %48 = arith.select %46, %38, %47 : vector<8x32xi1>, vector<8x32xf32>
    %c0_16 = arith.constant 0 : index
    %c0_17 = arith.constant 0 : index
    %c0_18 = arith.constant 0 : index
    %49 = vector.load %arg6[%c0_16, %c0_17, %c0_18] : memref<16x8x32xf32, #tpu.memory_space<vmem>>, vector<1x8x32xf32>
    %50 = vector.shape_cast %49 : vector<1x8x32xf32> to vector<8x32xf32>
    %51 = vector.shape_cast %48 : vector<8x32xf32> to vector<1x8x32xf32>
    tpu.vector_store %arg6[%c0_16, %c0_17, %c0_18], %51 {strides = array<i32>} : memref<16x8x32xf32, #tpu.memory_space<vmem>>, vector<1x8x32xf32>,
    %c1 = arith.constant 1 : index
    %c0_19 = arith.constant 0 : index
    %c0_20 = arith.constant 0 : index
    %52 = vector.load %arg2[%c1, %c0_19, %c0_20] : memref<16x8x96xf32, #tpu.memory_space<vmem>>, vector<1x8x96xf32>
    %53 = vector.shape_cast %52 : vector<1x8x96xf32> to vector<8x96xf32>
    %cst_21 = arith.constant dense<0.000000e+00> : vector<8x96xf32>
    %54 = tpu.matmul %44, %3, %cst_21 {dimension_numbers = #tpu.dot_dimension_numbers<[1], [0], [0], [1], [0, 0, 1, 1], [], []>, precision = #tpu.contract_precision<fp32>} : vector<8x32xf32>, vector<32x96xf32>, vector<8x96xf32> -> vector<8x96xf32>
    %55 = vector.extract_strided_slice %53 {offsets = [0, 0], sizes = [8, 32], strides = [1, 1]} : vector<8x96xf32> to vector<8x32xf32>
    %56 = vector.extract_strided_slice %54 {offsets = [0, 0], sizes = [8, 32], strides = [1, 1]} : vector<8x96xf32> to vector<8x32xf32>
    %57 = arith.addf %55, %56 : vector<8x32xf32>
    %58 = arith.negf %57 : vector<8x32xf32>
    %59 = math.exp %58 : vector<8x32xf32>
    %cst_22 = arith.constant 1.000000e+00 : f32
    %60 = vector.broadcast %cst_22 : f32 to vector<8x32xf32>
    %61 = arith.addf %60, %59 : vector<8x32xf32>
    %62 = arith.divf %60, %61 : vector<8x32xf32>
    %63 = vector.extract_strided_slice %53 {offsets = [0, 32], sizes = [8, 32], strides = [1, 1]} : vector<8x96xf32> to vector<8x32xf32>
    %64 = vector.extract_strided_slice %54 {offsets = [0, 32], sizes = [8, 32], strides = [1, 1]} : vector<8x96xf32> to vector<8x32xf32>
    %65 = arith.addf %63, %64 : vector<8x32xf32>
    %66 = arith.negf %65 : vector<8x32xf32>
    %67 = math.exp %66 : vector<8x32xf32>
    %cst_23 = arith.constant 1.000000e+00 : f32
    %68 = vector.broadcast %cst_23 : f32 to vector<8x32xf32>
    %69 = arith.addf %68, %67 : vector<8x32xf32>
    %70 = arith.divf %68, %69 : vector<8x32xf32>
    %71 = vector.extract_strided_slice %53 {offsets = [0, 64], sizes = [8, 32], strides = [1, 1]} : vector<8x96xf32> to vector<8x32xf32>
    %72 = vector.extract_strided_slice %54 {offsets = [0, 64], sizes = [8, 32], strides = [1, 1]} : vector<8x96xf32> to vector<8x32xf32>
    %73 = vector.broadcast %4 : vector<1x32xf32> to vector<8x32xf32>
    %74 = arith.addf %72, %73 : vector<8x32xf32>
    %75 = arith.mulf %62, %74 : vector<8x32xf32>
    %76 = arith.addf %71, %75 : vector<8x32xf32>
    %77 = math.tanh %76 : vector<8x32xf32>
    %cst_24 = arith.constant 1.000000e+00 : f32
    %78 = vector.broadcast %cst_24 : f32 to vector<8x32xf32>
    %79 = arith.subf %78, %70 : vector<8x32xf32>
    %80 = arith.mulf %79, %77 : vector<8x32xf32>
    %81 = arith.mulf %70, %44 : vector<8x32xf32>
    %82 = arith.addf %80, %81 : vector<8x32xf32>
    %c1_i32 = arith.constant 1 : i32
    %83 = arith.addi %6, %c1_i32 : i32
    %84 = vector.broadcast %83 : i32 to vector<8x1xi32>
    %85 = arith.cmpi slt, %84, %5 : vector<8x1xi32>
    %86 = vector.shape_cast %85 : vector<8x1xi1> to vector<8x1xi1>
    %87 = vector.broadcast %86 : vector<8x1xi1> to vector<8x32xi1>
    %88 = arith.select %87, %82, %44 : vector<8x32xi1>, vector<8x32xf32>
    %cst_25 = arith.constant 0.000000e+00 : f32
    %89 = vector.shape_cast %85 : vector<8x1xi1> to vector<8x1xi1>
    %90 = vector.broadcast %89 : vector<8x1xi1> to vector<8x32xi1>
    %91 = vector.broadcast %cst_25 : f32 to vector<8x32xf32>
    %92 = arith.select %90, %82, %91 : vector<8x32xi1>, vector<8x32xf32>
    %c1_26 = arith.constant 1 : index
    %c0_27 = arith.constant 0 : index
    %c0_28 = arith.constant 0 : index
    %93 = vector.load %arg6[%c1_26, %c0_27, %c0_28] : memref<16x8x32xf32, #tpu.memory_space<vmem>>, vector<1x8x32xf32>
    %94 = vector.shape_cast %93 : vector<1x8x32xf32> to vector<8x32xf32>
    %95 = vector.shape_cast %92 : vector<8x32xf32> to vector<1x8x32xf32>
    tpu.vector_store %arg6[%c1_26, %c0_27, %c0_28], %95 {strides = array<i32>} : memref<16x8x32xf32, #tpu.memory_space<vmem>>, vector<1x8x32xf32>,
    %c2 = arith.constant 2 : index
    %c0_29 = arith.constant 0 : index
    %c0_30 = arith.constant 0 : index
    %96 = vector.load %arg2[%c2, %c0_29, %c0_30] : memref<16x8x96xf32, #tpu.memory_space<vmem>>, vector<1x8x96xf32>
    %97 = vector.shape_cast %96 : vector<1x8x96xf32> to vector<8x96xf32>
    %cst_31 = arith.constant dense<0.000000e+00> : vector<8x96xf32>
    %98 = tpu.matmul %88, %3, %cst_31 {dimension_numbers = #tpu.dot_dimension_numbers<[1], [0], [0], [1], [0, 0, 1, 1], [], []>, precision = #tpu.contract_precision<fp32>} : vector<8x32xf32>, vector<32x96xf32>, vector<8x96xf32> -> vector<8x96xf32>
    %99 = vector.extract_strided_slice %97 {offsets = [0, 0], sizes = [8, 32], strides = [1, 1]} : vector<8x96xf32> to vector<8x32xf32>
    %100 = vector.extract_strided_slice %98 {offsets = [0, 0], sizes = [8, 32], strides = [1, 1]} : vector<8x96xf32> to vector<8x32xf32>
    %101 = arith.addf %99, %100 : vector<8x32xf32>
    %102 = arith.negf %101 : vector<8x32xf32>
    %103 = math.exp %102 : vector<8x32xf32>
    %cst_32 = arith.constant 1.000000e+00 : f32
    %104 = vector.broadcast %cst_32 : f32 to vector<8x32xf32>
    %105 = arith.addf %104, %103 : vector<8x32xf32>
    %106 = arith.divf %104, %105 : vector<8x32xf32>
    %107 = vector.extract_strided_slice %97 {offsets = [0, 32], sizes = [8, 32], strides = [1, 1]} : vector<8x96xf32> to vector<8x32xf32>
    %108 = vector.extract_strided_slice %98 {offsets = [0, 32], sizes = [8, 32], strides = [1, 1]} : vector<8x96xf32> to vector<8x32xf32>
    %109 = arith.addf %107, %108 : vector<8x32xf32>
    %110 = arith.negf %109 : vector<8x32xf32>
    %111 = math.exp %110 : vector<8x32xf32>
    %cst_33 = arith.constant 1.000000e+00 : f32
    %112 = vector.broadcast %cst_33 : f32 to vector<8x32xf32>
    %113 = arith.addf %112, %111 : vector<8x32xf32>
    %114 = arith.divf %112, %113 : vector<8x32xf32>
    %115 = vector.extract_strided_slice %97 {offsets = [0, 64], sizes = [8, 32], strides = [1, 1]} : vector<8x96xf32> to vector<8x32xf32>
    %116 = vector.extract_strided_slice %98 {offsets = [0, 64], sizes = [8, 32], strides = [1, 1]} : vector<8x96xf32> to vector<8x32xf32>
    %117 = vector.broadcast %4 : vector<1x32xf32> to vector<8x32xf32>
    %118 = arith.addf %116, %117 : vector<8x32xf32>
    %119 = arith.mulf %106, %118 : vector<8x32xf32>
    %120 = arith.addf %115, %119 : vector<8x32xf32>
    %121 = math.tanh %120 : vector<8x32xf32>
    %cst_34 = arith.constant 1.000000e+00 : f32
    %122 = vector.broadcast %cst_34 : f32 to vector<8x32xf32>
    %123 = arith.subf %122, %114 : vector<8x32xf32>
    %124 = arith.mulf %123, %121 : vector<8x32xf32>
    %125 = arith.mulf %114, %88 : vector<8x32xf32>
    %126 = arith.addf %124, %125 : vector<8x32xf32>
    %c2_i32 = arith.constant 2 : i32
    %127 = arith.addi %6, %c2_i32 : i32
    %128 = vector.broadcast %127 : i32 to vector<8x1xi32>
    %129 = arith.cmpi slt, %128, %5 : vector<8x1xi32>
    %130 = vector.shape_cast %129 : vector<8x1xi1> to vector<8x1xi1>
    %131 = vector.broadcast %130 : vector<8x1xi1> to vector<8x32xi1>
    %132 = arith.select %131, %126, %88 : vector<8x32xi1>, vector<8x32xf32>
    %cst_35 = arith.constant 0.000000e+00 : f32
    %133 = vector.shape_cast %129 : vector<8x1xi1> to vector<8x1xi1>
    %134 = vector.broadcast %133 : vector<8x1xi1> to vector<8x32xi1>
    %135 = vector.broadcast %cst_35 : f32 to vector<8x32xf32>
    %136 = arith.select %134, %126, %135 : vector<8x32xi1>, vector<8x32xf32>
    %c2_36 = arith.constant 2 : index
    %c0_37 = arith.constant 0 : index
    %c0_38 = arith.constant 0 : index
    %137 = vector.load %arg6[%c2_36, %c0_37, %c0_38] : memref<16x8x32xf32, #tpu.memory_space<vmem>>, vector<1x8x32xf32>
    %138 = vector.shape_cast %137 : vector<1x8x32xf32> to vector<8x32xf32>
    %139 = vector.shape_cast %136 : vector<8x32xf32> to vector<1x8x32xf32>
    tpu.vector_store %arg6[%c2_36, %c0_37, %c0_38], %139 {strides = array<i32>} : memref<16x8x32xf32, #tpu.memory_space<vmem>>, vector<1x8x32xf32>,
    %c3 = arith.constant 3 : index
    %c0_39 = arith.constant 0 : index
    %c0_40 = arith.constant 0 : index
    %140 = vector.load %arg2[%c3, %c0_39, %c0_40] : memref<16x8x96xf32, #tpu.memory_space<vmem>>, vector<1x8x96xf32>
    %141 = vector.shape_cast %140 : vector<1x8x96xf32> to vector<8x96xf32>
    %cst_41 = arith.constant dense<0.000000e+00> : vector<8x96xf32>
    %142 = tpu.matmul %132, %3, %cst_41 {dimension_numbers = #tpu.dot_dimension_numbers<[1], [0], [0], [1], [0, 0, 1, 1], [], []>, precision = #tpu.contract_precision<fp32>} : vector<8x32xf32>, vector<32x96xf32>, vector<8x96xf32> -> vector<8x96xf32>
    %143 = vector.extract_strided_slice %141 {offsets = [0, 0], sizes = [8, 32], strides = [1, 1]} : vector<8x96xf32> to vector<8x32xf32>
    %144 = vector.extract_strided_slice %142 {offsets = [0, 0], sizes = [8, 32], strides = [1, 1]} : vector<8x96xf32> to vector<8x32xf32>
    %145 = arith.addf %143, %144 : vector<8x32xf32>
    %146 = arith.negf %145 : vector<8x32xf32>
    %147 = math.exp %146 : vector<8x32xf32>
    %cst_42 = arith.constant 1.000000e+00 : f32
    %148 = vector.broadcast %cst_42 : f32 to vector<8x32xf32>
    %149 = arith.addf %148, %147 : vector<8x32xf32>
    %150 = arith.divf %148, %149 : vector<8x32xf32>
    %151 = vector.extract_strided_slice %141 {offsets = [0, 32], sizes = [8, 32], strides = [1, 1]} : vector<8x96xf32> to vector<8x32xf32>
    %152 = vector.extract_strided_slice %142 {offsets = [0, 32], sizes = [8, 32], strides = [1, 1]} : vector<8x96xf32> to vector<8x32xf32>
    %153 = arith.addf %151, %152 : vector<8x32xf32>
    %154 = arith.negf %153 : vector<8x32xf32>
    %155 = math.exp %154 : vector<8x32xf32>
    %cst_43 = arith.constant 1.000000e+00 : f32
    %156 = vector.broadcast %cst_43 : f32 to vector<8x32xf32>
    %157 = arith.addf %156, %155 : vector<8x32xf32>
    %158 = arith.divf %156, %157 : vector<8x32xf32>
    %159 = vector.extract_strided_slice %141 {offsets = [0, 64], sizes = [8, 32], strides = [1, 1]} : vector<8x96xf32> to vector<8x32xf32>
    %160 = vector.extract_strided_slice %142 {offsets = [0, 64], sizes = [8, 32], strides = [1, 1]} : vector<8x96xf32> to vector<8x32xf32>
    %161 = vector.broadcast %4 : vector<1x32xf32> to vector<8x32xf32>
    %162 = arith.addf %160, %161 : vector<8x32xf32>
    %163 = arith.mulf %150, %162 : vector<8x32xf32>
    %164 = arith.addf %159, %163 : vector<8x32xf32>
    %165 = math.tanh %164 : vector<8x32xf32>
    %cst_44 = arith.constant 1.000000e+00 : f32
    %166 = vector.broadcast %cst_44 : f32 to vector<8x32xf32>
    %167 = arith.subf %166, %158 : vector<8x32xf32>
    %168 = arith.mulf %167, %165 : vector<8x32xf32>
    %169 = arith.mulf %158, %132 : vector<8x32xf32>
    %170 = arith.addf %168, %169 : vector<8x32xf32>
    %c3_i32 = arith.constant 3 : i32
    %171 = arith.addi %6, %c3_i32 : i32
    %172 = vector.broadcast %171 : i32 to vector<8x1xi32>
    %173 = arith.cmpi slt, %172, %5 : vector<8x1xi32>
    %174 = vector.shape_cast %173 : vector<8x1xi1> to vector<8x1xi1>
    %175 = vector.broadcast %174 : vector<8x1xi1> to vector<8x32xi1>
    %176 = arith.select %175, %170, %132 : vector<8x32xi1>, vector<8x32xf32>
    %cst_45 = arith.constant 0.000000e+00 : f32
    %177 = vector.shape_cast %173 : vector<8x1xi1> to vector<8x1xi1>
    %178 = vector.broadcast %177 : vector<8x1xi1> to vector<8x32xi1>
    %179 = vector.broadcast %cst_45 : f32 to vector<8x32xf32>
    %180 = arith.select %178, %170, %179 : vector<8x32xi1>, vector<8x32xf32>
    %c3_46 = arith.constant 3 : index
    %c0_47 = arith.constant 0 : index
    %c0_48 = arith.constant 0 : index
    %181 = vector.load %arg6[%c3_46, %c0_47, %c0_48] : memref<16x8x32xf32, #tpu.memory_space<vmem>>, vector<1x8x32xf32>
    %182 = vector.shape_cast %181 : vector<1x8x32xf32> to vector<8x32xf32>
    %183 = vector.shape_cast %180 : vector<8x32xf32> to vector<1x8x32xf32>
    tpu.vector_store %arg6[%c3_46, %c0_47, %c0_48], %183 {strides = array<i32>} : memref<16x8x32xf32, #tpu.memory_space<vmem>>, vector<1x8x32xf32>,
    %c4 = arith.constant 4 : index
    %c0_49 = arith.constant 0 : index
    %c0_50 = arith.constant 0 : index
    %184 = vector.load %arg2[%c4, %c0_49, %c0_50] : memref<16x8x96xf32, #tpu.memory_space<vmem>>, vector<1x8x96xf32>
    %185 = vector.shape_cast %184 : vector<1x8x96xf32> to vector<8x96xf32>
    %cst_51 = arith.constant dense<0.000000e+00> : vector<8x96xf32>
    %186 = tpu.matmul %176, %3, %cst_51 {dimension_numbers = #tpu.dot_dimension_numbers<[1], [0], [0], [1], [0, 0, 1, 1], [], []>, precision = #tpu.contract_precision<fp32>} : vector<8x32xf32>, vector<32x96xf32>, vector<8x96xf32> -> vector<8x96xf32>
    %187 = vector.extract_strided_slice %185 {offsets = [0, 0], sizes = [8, 32], strides = [1, 1]} : vector<8x96xf32> to vector<8x32xf32>
    %188 = vector.extract_strided_slice %186 {offsets = [0, 0], sizes = [8, 32], strides = [1, 1]} : vector<8x96xf32> to vector<8x32xf32>
    %189 = arith.addf %187, %188 : vector<8x32xf32>
    %190 = arith.negf %189 : vector<8x32xf32>
    %191 = math.exp %190 : vector<8x32xf32>
    %cst_52 = arith.constant 1.000000e+00 : f32
    %192 = vector.broadcast %cst_52 : f32 to vector<8x32xf32>
    %193 = arith.addf %192, %191 : vector<8x32xf32>
    %194 = arith.divf %192, %193 : vector<8x32xf32>
    %195 = vector.extract_strided_slice %185 {offsets = [0, 32], sizes = [8, 32], strides = [1, 1]} : vector<8x96xf32> to vector<8x32xf32>
    %196 = vector.extract_strided_slice %186 {offsets = [0, 32], sizes = [8, 32], strides = [1, 1]} : vector<8x96xf32> to vector<8x32xf32>
    %197 = arith.addf %195, %196 : vector<8x32xf32>
    %198 = arith.negf %197 : vector<8x32xf32>
    %199 = math.exp %198 : vector<8x32xf32>
    %cst_53 = arith.constant 1.000000e+00 : f32
    %200 = vector.broadcast %cst_53 : f32 to vector<8x32xf32>
    %201 = arith.addf %200, %199 : vector<8x32xf32>
    %202 = arith.divf %200, %201 : vector<8x32xf32>
    %203 = vector.extract_strided_slice %185 {offsets = [0, 64], sizes = [8, 32], strides = [1, 1]} : vector<8x96xf32> to vector<8x32xf32>
    %204 = vector.extract_strided_slice %186 {offsets = [0, 64], sizes = [8, 32], strides = [1, 1]} : vector<8x96xf32> to vector<8x32xf32>
    %205 = vector.broadcast %4 : vector<1x32xf32> to vector<8x32xf32>
    %206 = arith.addf %204, %205 : vector<8x32xf32>
    %207 = arith.mulf %194, %206 : vector<8x32xf32>
    %208 = arith.addf %203, %207 : vector<8x32xf32>
    %209 = math.tanh %208 : vector<8x32xf32>
    %cst_54 = arith.constant 1.000000e+00 : f32
    %210 = vector.broadcast %cst_54 : f32 to vector<8x32xf32>
    %211 = arith.subf %210, %202 : vector<8x32xf32>
    %212 = arith.mulf %211, %209 : vector<8x32xf32>
    %213 = arith.mulf %202, %176 : vector<8x32xf32>
    %214 = arith.addf %212, %213 : vector<8x32xf32>
    %c4_i32 = arith.constant 4 : i32
    %215 = arith.addi %6, %c4_i32 : i32
    %216 = vector.broadcast %215 : i32 to vector<8x1xi32>
    %217 = arith.cmpi slt, %216, %5 : vector<8x1xi32>
    %218 = vector.shape_cast %217 : vector<8x1xi1> to vector<8x1xi1>
    %219 = vector.broadcast %218 : vector<8x1xi1> to vector<8x32xi1>
    %220 = arith.select %219, %214, %176 : vector<8x32xi1>, vector<8x32xf32>
    %cst_55 = arith.constant 0.000000e+00 : f32
    %221 = vector.shape_cast %217 : vector<8x1xi1> to vector<8x1xi1>
    %222 = vector.broadcast %221 : vector<8x1xi1> to vector<8x32xi1>
    %223 = vector.broadcast %cst_55 : f32 to vector<8x32xf32>
    %224 = arith.select %222, %214, %223 : vector<8x32xi1>, vector<8x32xf32>
    %c4_56 = arith.constant 4 : index
    %c0_57 = arith.constant 0 : index
    %c0_58 = arith.constant 0 : index
    %225 = vector.load %arg6[%c4_56, %c0_57, %c0_58] : memref<16x8x32xf32, #tpu.memory_space<vmem>>, vector<1x8x32xf32>
    %226 = vector.shape_cast %225 : vector<1x8x32xf32> to vector<8x32xf32>
    %227 = vector.shape_cast %224 : vector<8x32xf32> to vector<1x8x32xf32>
    tpu.vector_store %arg6[%c4_56, %c0_57, %c0_58], %227 {strides = array<i32>} : memref<16x8x32xf32, #tpu.memory_space<vmem>>, vector<1x8x32xf32>,
    %c5 = arith.constant 5 : index
    %c0_59 = arith.constant 0 : index
    %c0_60 = arith.constant 0 : index
    %228 = vector.load %arg2[%c5, %c0_59, %c0_60] : memref<16x8x96xf32, #tpu.memory_space<vmem>>, vector<1x8x96xf32>
    %229 = vector.shape_cast %228 : vector<1x8x96xf32> to vector<8x96xf32>
    %cst_61 = arith.constant dense<0.000000e+00> : vector<8x96xf32>
    %230 = tpu.matmul %220, %3, %cst_61 {dimension_numbers = #tpu.dot_dimension_numbers<[1], [0], [0], [1], [0, 0, 1, 1], [], []>, precision = #tpu.contract_precision<fp32>} : vector<8x32xf32>, vector<32x96xf32>, vector<8x96xf32> -> vector<8x96xf32>
    %231 = vector.extract_strided_slice %229 {offsets = [0, 0], sizes = [8, 32], strides = [1, 1]} : vector<8x96xf32> to vector<8x32xf32>
    %232 = vector.extract_strided_slice %230 {offsets = [0, 0], sizes = [8, 32], strides = [1, 1]} : vector<8x96xf32> to vector<8x32xf32>
    %233 = arith.addf %231, %232 : vector<8x32xf32>
    %234 = arith.negf %233 : vector<8x32xf32>
    %235 = math.exp %234 : vector<8x32xf32>
    %cst_62 = arith.constant 1.000000e+00 : f32
    %236 = vector.broadcast %cst_62 : f32 to vector<8x32xf32>
    %237 = arith.addf %236, %235 : vector<8x32xf32>
    %238 = arith.divf %236, %237 : vector<8x32xf32>
    %239 = vector.extract_strided_slice %229 {offsets = [0, 32], sizes = [8, 32], strides = [1, 1]} : vector<8x96xf32> to vector<8x32xf32>
    %240 = vector.extract_strided_slice %230 {offsets = [0, 32], sizes = [8, 32], strides = [1, 1]} : vector<8x96xf32> to vector<8x32xf32>
    %241 = arith.addf %239, %240 : vector<8x32xf32>
    %242 = arith.negf %241 : vector<8x32xf32>
    %243 = math.exp %242 : vector<8x32xf32>
    %cst_63 = arith.constant 1.000000e+00 : f32
    %244 = vector.broadcast %cst_63 : f32 to vector<8x32xf32>
    %245 = arith.addf %244, %243 : vector<8x32xf32>
    %246 = arith.divf %244, %245 : vector<8x32xf32>
    %247 = vector.extract_strided_slice %229 {offsets = [0, 64], sizes = [8, 32], strides = [1, 1]} : vector<8x96xf32> to vector<8x32xf32>
    %248 = vector.extract_strided_slice %230 {offsets = [0, 64], sizes = [8, 32], strides = [1, 1]} : vector<8x96xf32> to vector<8x32xf32>
    %249 = vector.broadcast %4 : vector<1x32xf32> to vector<8x32xf32>
    %250 = arith.addf %248, %249 : vector<8x32xf32>
    %251 = arith.mulf %238, %250 : vector<8x32xf32>
    %252 = arith.addf %247, %251 : vector<8x32xf32>
    %253 = math.tanh %252 : vector<8x32xf32>
    %cst_64 = arith.constant 1.000000e+00 : f32
    %254 = vector.broadcast %cst_64 : f32 to vector<8x32xf32>
    %255 = arith.subf %254, %246 : vector<8x32xf32>
    %256 = arith.mulf %255, %253 : vector<8x32xf32>
    %257 = arith.mulf %246, %220 : vector<8x32xf32>
    %258 = arith.addf %256, %257 : vector<8x32xf32>
    %c5_i32 = arith.constant 5 : i32
    %259 = arith.addi %6, %c5_i32 : i32
    %260 = vector.broadcast %259 : i32 to vector<8x1xi32>
    %261 = arith.cmpi slt, %260, %5 : vector<8x1xi32>
    %262 = vector.shape_cast %261 : vector<8x1xi1> to vector<8x1xi1>
    %263 = vector.broadcast %262 : vector<8x1xi1> to vector<8x32xi1>
    %264 = arith.select %263, %258, %220 : vector<8x32xi1>, vector<8x32xf32>
    %cst_65 = arith.constant 0.000000e+00 : f32
    %265 = vector.shape_cast %261 : vector<8x1xi1> to vector<8x1xi1>
    %266 = vector.broadcast %265 : vector<8x1xi1> to vector<8x32xi1>
    %267 = vector.broadcast %cst_65 : f32 to vector<8x32xf32>
    %268 = arith.select %266, %258, %267 : vector<8x32xi1>, vector<8x32xf32>
    %c5_66 = arith.constant 5 : index
    %c0_67 = arith.constant 0 : index
    %c0_68 = arith.constant 0 : index
    %269 = vector.load %arg6[%c5_66, %c0_67, %c0_68] : memref<16x8x32xf32, #tpu.memory_space<vmem>>, vector<1x8x32xf32>
    %270 = vector.shape_cast %269 : vector<1x8x32xf32> to vector<8x32xf32>
    %271 = vector.shape_cast %268 : vector<8x32xf32> to vector<1x8x32xf32>
    tpu.vector_store %arg6[%c5_66, %c0_67, %c0_68], %271 {strides = array<i32>} : memref<16x8x32xf32, #tpu.memory_space<vmem>>, vector<1x8x32xf32>,
    %c6 = arith.constant 6 : index
    %c0_69 = arith.constant 0 : index
    %c0_70 = arith.constant 0 : index
    %272 = vector.load %arg2[%c6, %c0_69, %c0_70] : memref<16x8x96xf32, #tpu.memory_space<vmem>>, vector<1x8x96xf32>
    %273 = vector.shape_cast %272 : vector<1x8x96xf32> to vector<8x96xf32>
    %cst_71 = arith.constant dense<0.000000e+00> : vector<8x96xf32>
    %274 = tpu.matmul %264, %3, %cst_71 {dimension_numbers = #tpu.dot_dimension_numbers<[1], [0], [0], [1], [0, 0, 1, 1], [], []>, precision = #tpu.contract_precision<fp32>} : vector<8x32xf32>, vector<32x96xf32>, vector<8x96xf32> -> vector<8x96xf32>
    %275 = vector.extract_strided_slice %273 {offsets = [0, 0], sizes = [8, 32], strides = [1, 1]} : vector<8x96xf32> to vector<8x32xf32>
    %276 = vector.extract_strided_slice %274 {offsets = [0, 0], sizes = [8, 32], strides = [1, 1]} : vector<8x96xf32> to vector<8x32xf32>
    %277 = arith.addf %275, %276 : vector<8x32xf32>
    %278 = arith.negf %277 : vector<8x32xf32>
    %279 = math.exp %278 : vector<8x32xf32>
    %cst_72 = arith.constant 1.000000e+00 : f32
    %280 = vector.broadcast %cst_72 : f32 to vector<8x32xf32>
    %281 = arith.addf %280, %279 : vector<8x32xf32>
    %282 = arith.divf %280, %281 : vector<8x32xf32>
    %283 = vector.extract_strided_slice %273 {offsets = [0, 32], sizes = [8, 32], strides = [1, 1]} : vector<8x96xf32> to vector<8x32xf32>
    %284 = vector.extract_strided_slice %274 {offsets = [0, 32], sizes = [8, 32], strides = [1, 1]} : vector<8x96xf32> to vector<8x32xf32>
    %285 = arith.addf %283, %284 : vector<8x32xf32>
    %286 = arith.negf %285 : vector<8x32xf32>
    %287 = math.exp %286 : vector<8x32xf32>
    %cst_73 = arith.constant 1.000000e+00 : f32
    %288 = vector.broadcast %cst_73 : f32 to vector<8x32xf32>
    %289 = arith.addf %288, %287 : vector<8x32xf32>
    %290 = arith.divf %288, %289 : vector<8x32xf32>
    %291 = vector.extract_strided_slice %273 {offsets = [0, 64], sizes = [8, 32], strides = [1, 1]} : vector<8x96xf32> to vector<8x32xf32>
    %292 = vector.extract_strided_slice %274 {offsets = [0, 64], sizes = [8, 32], strides = [1, 1]} : vector<8x96xf32> to vector<8x32xf32>
    %293 = vector.broadcast %4 : vector<1x32xf32> to vector<8x32xf32>
    %294 = arith.addf %292, %293 : vector<8x32xf32>
    %295 = arith.mulf %282, %294 : vector<8x32xf32>
    %296 = arith.addf %291, %295 : vector<8x32xf32>
    %297 = math.tanh %296 : vector<8x32xf32>
    %cst_74 = arith.constant 1.000000e+00 : f32
    %298 = vector.broadcast %cst_74 : f32 to vector<8x32xf32>
    %299 = arith.subf %298, %290 : vector<8x32xf32>
    %300 = arith.mulf %299, %297 : vector<8x32xf32>
    %301 = arith.mulf %290, %264 : vector<8x32xf32>
    %302 = arith.addf %300, %301 : vector<8x32xf32>
    %c6_i32 = arith.constant 6 : i32
    %303 = arith.addi %6, %c6_i32 : i32
    %304 = vector.broadcast %303 : i32 to vector<8x1xi32>
    %305 = arith.cmpi slt, %304, %5 : vector<8x1xi32>
    %306 = vector.shape_cast %305 : vector<8x1xi1> to vector<8x1xi1>
    %307 = vector.broadcast %306 : vector<8x1xi1> to vector<8x32xi1>
    %308 = arith.select %307, %302, %264 : vector<8x32xi1>, vector<8x32xf32>
    %cst_75 = arith.constant 0.000000e+00 : f32
    %309 = vector.shape_cast %305 : vector<8x1xi1> to vector<8x1xi1>
    %310 = vector.broadcast %309 : vector<8x1xi1> to vector<8x32xi1>
    %311 = vector.broadcast %cst_75 : f32 to vector<8x32xf32>
    %312 = arith.select %310, %302, %311 : vector<8x32xi1>, vector<8x32xf32>
    %c6_76 = arith.constant 6 : index
    %c0_77 = arith.constant 0 : index
    %c0_78 = arith.constant 0 : index
    %313 = vector.load %arg6[%c6_76, %c0_77, %c0_78] : memref<16x8x32xf32, #tpu.memory_space<vmem>>, vector<1x8x32xf32>
    %314 = vector.shape_cast %313 : vector<1x8x32xf32> to vector<8x32xf32>
    %315 = vector.shape_cast %312 : vector<8x32xf32> to vector<1x8x32xf32>
    tpu.vector_store %arg6[%c6_76, %c0_77, %c0_78], %315 {strides = array<i32>} : memref<16x8x32xf32, #tpu.memory_space<vmem>>, vector<1x8x32xf32>,
    %c7 = arith.constant 7 : index
    %c0_79 = arith.constant 0 : index
    %c0_80 = arith.constant 0 : index
    %316 = vector.load %arg2[%c7, %c0_79, %c0_80] : memref<16x8x96xf32, #tpu.memory_space<vmem>>, vector<1x8x96xf32>
    %317 = vector.shape_cast %316 : vector<1x8x96xf32> to vector<8x96xf32>
    %cst_81 = arith.constant dense<0.000000e+00> : vector<8x96xf32>
    %318 = tpu.matmul %308, %3, %cst_81 {dimension_numbers = #tpu.dot_dimension_numbers<[1], [0], [0], [1], [0, 0, 1, 1], [], []>, precision = #tpu.contract_precision<fp32>} : vector<8x32xf32>, vector<32x96xf32>, vector<8x96xf32> -> vector<8x96xf32>
    %319 = vector.extract_strided_slice %317 {offsets = [0, 0], sizes = [8, 32], strides = [1, 1]} : vector<8x96xf32> to vector<8x32xf32>
    %320 = vector.extract_strided_slice %318 {offsets = [0, 0], sizes = [8, 32], strides = [1, 1]} : vector<8x96xf32> to vector<8x32xf32>
    %321 = arith.addf %319, %320 : vector<8x32xf32>
    %322 = arith.negf %321 : vector<8x32xf32>
    %323 = math.exp %322 : vector<8x32xf32>
    %cst_82 = arith.constant 1.000000e+00 : f32
    %324 = vector.broadcast %cst_82 : f32 to vector<8x32xf32>
    %325 = arith.addf %324, %323 : vector<8x32xf32>
    %326 = arith.divf %324, %325 : vector<8x32xf32>
    %327 = vector.extract_strided_slice %317 {offsets = [0, 32], sizes = [8, 32], strides = [1, 1]} : vector<8x96xf32> to vector<8x32xf32>
    %328 = vector.extract_strided_slice %318 {offsets = [0, 32], sizes = [8, 32], strides = [1, 1]} : vector<8x96xf32> to vector<8x32xf32>
    %329 = arith.addf %327, %328 : vector<8x32xf32>
    %330 = arith.negf %329 : vector<8x32xf32>
    %331 = math.exp %330 : vector<8x32xf32>
    %cst_83 = arith.constant 1.000000e+00 : f32
    %332 = vector.broadcast %cst_83 : f32 to vector<8x32xf32>
    %333 = arith.addf %332, %331 : vector<8x32xf32>
    %334 = arith.divf %332, %333 : vector<8x32xf32>
    %335 = vector.extract_strided_slice %317 {offsets = [0, 64], sizes = [8, 32], strides = [1, 1]} : vector<8x96xf32> to vector<8x32xf32>
    %336 = vector.extract_strided_slice %318 {offsets = [0, 64], sizes = [8, 32], strides = [1, 1]} : vector<8x96xf32> to vector<8x32xf32>
    %337 = vector.broadcast %4 : vector<1x32xf32> to vector<8x32xf32>
    %338 = arith.addf %336, %337 : vector<8x32xf32>
    %339 = arith.mulf %326, %338 : vector<8x32xf32>
    %340 = arith.addf %335, %339 : vector<8x32xf32>
    %341 = math.tanh %340 : vector<8x32xf32>
    %cst_84 = arith.constant 1.000000e+00 : f32
    %342 = vector.broadcast %cst_84 : f32 to vector<8x32xf32>
    %343 = arith.subf %342, %334 : vector<8x32xf32>
    %344 = arith.mulf %343, %341 : vector<8x32xf32>
    %345 = arith.mulf %334, %308 : vector<8x32xf32>
    %346 = arith.addf %344, %345 : vector<8x32xf32>
    %c7_i32 = arith.constant 7 : i32
    %347 = arith.addi %6, %c7_i32 : i32
    %348 = vector.broadcast %347 : i32 to vector<8x1xi32>
    %349 = arith.cmpi slt, %348, %5 : vector<8x1xi32>
    %350 = vector.shape_cast %349 : vector<8x1xi1> to vector<8x1xi1>
    %351 = vector.broadcast %350 : vector<8x1xi1> to vector<8x32xi1>
    %352 = arith.select %351, %346, %308 : vector<8x32xi1>, vector<8x32xf32>
    %cst_85 = arith.constant 0.000000e+00 : f32
    %353 = vector.shape_cast %349 : vector<8x1xi1> to vector<8x1xi1>
    %354 = vector.broadcast %353 : vector<8x1xi1> to vector<8x32xi1>
    %355 = vector.broadcast %cst_85 : f32 to vector<8x32xf32>
    %356 = arith.select %354, %346, %355 : vector<8x32xi1>, vector<8x32xf32>
    %c7_86 = arith.constant 7 : index
    %c0_87 = arith.constant 0 : index
    %c0_88 = arith.constant 0 : index
    %357 = vector.load %arg6[%c7_86, %c0_87, %c0_88] : memref<16x8x32xf32, #tpu.memory_space<vmem>>, vector<1x8x32xf32>
    %358 = vector.shape_cast %357 : vector<1x8x32xf32> to vector<8x32xf32>
    %359 = vector.shape_cast %356 : vector<8x32xf32> to vector<1x8x32xf32>
    tpu.vector_store %arg6[%c7_86, %c0_87, %c0_88], %359 {strides = array<i32>} : memref<16x8x32xf32, #tpu.memory_space<vmem>>, vector<1x8x32xf32>,
    %c8 = arith.constant 8 : index
    %c0_89 = arith.constant 0 : index
    %c0_90 = arith.constant 0 : index
    %360 = vector.load %arg2[%c8, %c0_89, %c0_90] : memref<16x8x96xf32, #tpu.memory_space<vmem>>, vector<1x8x96xf32>
    %361 = vector.shape_cast %360 : vector<1x8x96xf32> to vector<8x96xf32>
    %cst_91 = arith.constant dense<0.000000e+00> : vector<8x96xf32>
    %362 = tpu.matmul %352, %3, %cst_91 {dimension_numbers = #tpu.dot_dimension_numbers<[1], [0], [0], [1], [0, 0, 1, 1], [], []>, precision = #tpu.contract_precision<fp32>} : vector<8x32xf32>, vector<32x96xf32>, vector<8x96xf32> -> vector<8x96xf32>
    %363 = vector.extract_strided_slice %361 {offsets = [0, 0], sizes = [8, 32], strides = [1, 1]} : vector<8x96xf32> to vector<8x32xf32>
    %364 = vector.extract_strided_slice %362 {offsets = [0, 0], sizes = [8, 32], strides = [1, 1]} : vector<8x96xf32> to vector<8x32xf32>
    %365 = arith.addf %363, %364 : vector<8x32xf32>
    %366 = arith.negf %365 : vector<8x32xf32>
    %367 = math.exp %366 : vector<8x32xf32>
    %cst_92 = arith.constant 1.000000e+00 : f32
    %368 = vector.broadcast %cst_92 : f32 to vector<8x32xf32>
    %369 = arith.addf %368, %367 : vector<8x32xf32>
    %370 = arith.divf %368, %369 : vector<8x32xf32>
    %371 = vector.extract_strided_slice %361 {offsets = [0, 32], sizes = [8, 32], strides = [1, 1]} : vector<8x96xf32> to vector<8x32xf32>
    %372 = vector.extract_strided_slice %362 {offsets = [0, 32], sizes = [8, 32], strides = [1, 1]} : vector<8x96xf32> to vector<8x32xf32>
    %373 = arith.addf %371, %372 : vector<8x32xf32>
    %374 = arith.negf %373 : vector<8x32xf32>
    %375 = math.exp %374 : vector<8x32xf32>
    %cst_93 = arith.constant 1.000000e+00 : f32
    %376 = vector.broadcast %cst_93 : f32 to vector<8x32xf32>
    %377 = arith.addf %376, %375 : vector<8x32xf32>
    %378 = arith.divf %376, %377 : vector<8x32xf32>
    %379 = vector.extract_strided_slice %361 {offsets = [0, 64], sizes = [8, 32], strides = [1, 1]} : vector<8x96xf32> to vector<8x32xf32>
    %380 = vector.extract_strided_slice %362 {offsets = [0, 64], sizes = [8, 32], strides = [1, 1]} : vector<8x96xf32> to vector<8x32xf32>
    %381 = vector.broadcast %4 : vector<1x32xf32> to vector<8x32xf32>
    %382 = arith.addf %380, %381 : vector<8x32xf32>
    %383 = arith.mulf %370, %382 : vector<8x32xf32>
    %384 = arith.addf %379, %383 : vector<8x32xf32>
    %385 = math.tanh %384 : vector<8x32xf32>
    %cst_94 = arith.constant 1.000000e+00 : f32
    %386 = vector.broadcast %cst_94 : f32 to vector<8x32xf32>
    %387 = arith.subf %386, %378 : vector<8x32xf32>
    %388 = arith.mulf %387, %385 : vector<8x32xf32>
    %389 = arith.mulf %378, %352 : vector<8x32xf32>
    %390 = arith.addf %388, %389 : vector<8x32xf32>
    %c8_i32 = arith.constant 8 : i32
    %391 = arith.addi %6, %c8_i32 : i32
    %392 = vector.broadcast %391 : i32 to vector<8x1xi32>
    %393 = arith.cmpi slt, %392, %5 : vector<8x1xi32>
    %394 = vector.shape_cast %393 : vector<8x1xi1> to vector<8x1xi1>
    %395 = vector.broadcast %394 : vector<8x1xi1> to vector<8x32xi1>
    %396 = arith.select %395, %390, %352 : vector<8x32xi1>, vector<8x32xf32>
    %cst_95 = arith.constant 0.000000e+00 : f32
    %397 = vector.shape_cast %393 : vector<8x1xi1> to vector<8x1xi1>
    %398 = vector.broadcast %397 : vector<8x1xi1> to vector<8x32xi1>
    %399 = vector.broadcast %cst_95 : f32 to vector<8x32xf32>
    %400 = arith.select %398, %390, %399 : vector<8x32xi1>, vector<8x32xf32>
    %c8_96 = arith.constant 8 : index
    %c0_97 = arith.constant 0 : index
    %c0_98 = arith.constant 0 : index
    %401 = vector.load %arg6[%c8_96, %c0_97, %c0_98] : memref<16x8x32xf32, #tpu.memory_space<vmem>>, vector<1x8x32xf32>
    %402 = vector.shape_cast %401 : vector<1x8x32xf32> to vector<8x32xf32>
    %403 = vector.shape_cast %400 : vector<8x32xf32> to vector<1x8x32xf32>
    tpu.vector_store %arg6[%c8_96, %c0_97, %c0_98], %403 {strides = array<i32>} : memref<16x8x32xf32, #tpu.memory_space<vmem>>, vector<1x8x32xf32>,
    %c9 = arith.constant 9 : index
    %c0_99 = arith.constant 0 : index
    %c0_100 = arith.constant 0 : index
    %404 = vector.load %arg2[%c9, %c0_99, %c0_100] : memref<16x8x96xf32, #tpu.memory_space<vmem>>, vector<1x8x96xf32>
    %405 = vector.shape_cast %404 : vector<1x8x96xf32> to vector<8x96xf32>
    %cst_101 = arith.constant dense<0.000000e+00> : vector<8x96xf32>
    %406 = tpu.matmul %396, %3, %cst_101 {dimension_numbers = #tpu.dot_dimension_numbers<[1], [0], [0], [1], [0, 0, 1, 1], [], []>, precision = #tpu.contract_precision<fp32>} : vector<8x32xf32>, vector<32x96xf32>, vector<8x96xf32> -> vector<8x96xf32>
    %407 = vector.extract_strided_slice %405 {offsets = [0, 0], sizes = [8, 32], strides = [1, 1]} : vector<8x96xf32> to vector<8x32xf32>
    %408 = vector.extract_strided_slice %406 {offsets = [0, 0], sizes = [8, 32], strides = [1, 1]} : vector<8x96xf32> to vector<8x32xf32>
    %409 = arith.addf %407, %408 : vector<8x32xf32>
    %410 = arith.negf %409 : vector<8x32xf32>
    %411 = math.exp %410 : vector<8x32xf32>
    %cst_102 = arith.constant 1.000000e+00 : f32
    %412 = vector.broadcast %cst_102 : f32 to vector<8x32xf32>
    %413 = arith.addf %412, %411 : vector<8x32xf32>
    %414 = arith.divf %412, %413 : vector<8x32xf32>
    %415 = vector.extract_strided_slice %405 {offsets = [0, 32], sizes = [8, 32], strides = [1, 1]} : vector<8x96xf32> to vector<8x32xf32>
    %416 = vector.extract_strided_slice %406 {offsets = [0, 32], sizes = [8, 32], strides = [1, 1]} : vector<8x96xf32> to vector<8x32xf32>
    %417 = arith.addf %415, %416 : vector<8x32xf32>
    %418 = arith.negf %417 : vector<8x32xf32>
    %419 = math.exp %418 : vector<8x32xf32>
    %cst_103 = arith.constant 1.000000e+00 : f32
    %420 = vector.broadcast %cst_103 : f32 to vector<8x32xf32>
    %421 = arith.addf %420, %419 : vector<8x32xf32>
    %422 = arith.divf %420, %421 : vector<8x32xf32>
    %423 = vector.extract_strided_slice %405 {offsets = [0, 64], sizes = [8, 32], strides = [1, 1]} : vector<8x96xf32> to vector<8x32xf32>
    %424 = vector.extract_strided_slice %406 {offsets = [0, 64], sizes = [8, 32], strides = [1, 1]} : vector<8x96xf32> to vector<8x32xf32>
    %425 = vector.broadcast %4 : vector<1x32xf32> to vector<8x32xf32>
    %426 = arith.addf %424, %425 : vector<8x32xf32>
    %427 = arith.mulf %414, %426 : vector<8x32xf32>
    %428 = arith.addf %423, %427 : vector<8x32xf32>
    %429 = math.tanh %428 : vector<8x32xf32>
    %cst_104 = arith.constant 1.000000e+00 : f32
    %430 = vector.broadcast %cst_104 : f32 to vector<8x32xf32>
    %431 = arith.subf %430, %422 : vector<8x32xf32>
    %432 = arith.mulf %431, %429 : vector<8x32xf32>
    %433 = arith.mulf %422, %396 : vector<8x32xf32>
    %434 = arith.addf %432, %433 : vector<8x32xf32>
    %c9_i32 = arith.constant 9 : i32
    %435 = arith.addi %6, %c9_i32 : i32
    %436 = vector.broadcast %435 : i32 to vector<8x1xi32>
    %437 = arith.cmpi slt, %436, %5 : vector<8x1xi32>
    %438 = vector.shape_cast %437 : vector<8x1xi1> to vector<8x1xi1>
    %439 = vector.broadcast %438 : vector<8x1xi1> to vector<8x32xi1>
    %440 = arith.select %439, %434, %396 : vector<8x32xi1>, vector<8x32xf32>
    %cst_105 = arith.constant 0.000000e+00 : f32
    %441 = vector.shape_cast %437 : vector<8x1xi1> to vector<8x1xi1>
    %442 = vector.broadcast %441 : vector<8x1xi1> to vector<8x32xi1>
    %443 = vector.broadcast %cst_105 : f32 to vector<8x32xf32>
    %444 = arith.select %442, %434, %443 : vector<8x32xi1>, vector<8x32xf32>
    %c9_106 = arith.constant 9 : index
    %c0_107 = arith.constant 0 : index
    %c0_108 = arith.constant 0 : index
    %445 = vector.load %arg6[%c9_106, %c0_107, %c0_108] : memref<16x8x32xf32, #tpu.memory_space<vmem>>, vector<1x8x32xf32>
    %446 = vector.shape_cast %445 : vector<1x8x32xf32> to vector<8x32xf32>
    %447 = vector.shape_cast %444 : vector<8x32xf32> to vector<1x8x32xf32>
    tpu.vector_store %arg6[%c9_106, %c0_107, %c0_108], %447 {strides = array<i32>} : memref<16x8x32xf32, #tpu.memory_space<vmem>>, vector<1x8x32xf32>,
    %c10 = arith.constant 10 : index
    %c0_109 = arith.constant 0 : index
    %c0_110 = arith.constant 0 : index
    %448 = vector.load %arg2[%c10, %c0_109, %c0_110] : memref<16x8x96xf32, #tpu.memory_space<vmem>>, vector<1x8x96xf32>
    %449 = vector.shape_cast %448 : vector<1x8x96xf32> to vector<8x96xf32>
    %cst_111 = arith.constant dense<0.000000e+00> : vector<8x96xf32>
    %450 = tpu.matmul %440, %3, %cst_111 {dimension_numbers = #tpu.dot_dimension_numbers<[1], [0], [0], [1], [0, 0, 1, 1], [], []>, precision = #tpu.contract_precision<fp32>} : vector<8x32xf32>, vector<32x96xf32>, vector<8x96xf32> -> vector<8x96xf32>
    %451 = vector.extract_strided_slice %449 {offsets = [0, 0], sizes = [8, 32], strides = [1, 1]} : vector<8x96xf32> to vector<8x32xf32>
    %452 = vector.extract_strided_slice %450 {offsets = [0, 0], sizes = [8, 32], strides = [1, 1]} : vector<8x96xf32> to vector<8x32xf32>
    %453 = arith.addf %451, %452 : vector<8x32xf32>
    %454 = arith.negf %453 : vector<8x32xf32>
    %455 = math.exp %454 : vector<8x32xf32>
    %cst_112 = arith.constant 1.000000e+00 : f32
    %456 = vector.broadcast %cst_112 : f32 to vector<8x32xf32>
    %457 = arith.addf %456, %455 : vector<8x32xf32>
    %458 = arith.divf %456, %457 : vector<8x32xf32>
    %459 = vector.extract_strided_slice %449 {offsets = [0, 32], sizes = [8, 32], strides = [1, 1]} : vector<8x96xf32> to vector<8x32xf32>
    %460 = vector.extract_strided_slice %450 {offsets = [0, 32], sizes = [8, 32], strides = [1, 1]} : vector<8x96xf32> to vector<8x32xf32>
    %461 = arith.addf %459, %460 : vector<8x32xf32>
    %462 = arith.negf %461 : vector<8x32xf32>
    %463 = math.exp %462 : vector<8x32xf32>
    %cst_113 = arith.constant 1.000000e+00 : f32
    %464 = vector.broadcast %cst_113 : f32 to vector<8x32xf32>
    %465 = arith.addf %464, %463 : vector<8x32xf32>
    %466 = arith.divf %464, %465 : vector<8x32xf32>
    %467 = vector.extract_strided_slice %449 {offsets = [0, 64], sizes = [8, 32], strides = [1, 1]} : vector<8x96xf32> to vector<8x32xf32>
    %468 = vector.extract_strided_slice %450 {offsets = [0, 64], sizes = [8, 32], strides = [1, 1]} : vector<8x96xf32> to vector<8x32xf32>
    %469 = vector.broadcast %4 : vector<1x32xf32> to vector<8x32xf32>
    %470 = arith.addf %468, %469 : vector<8x32xf32>
    %471 = arith.mulf %458, %470 : vector<8x32xf32>
    %472 = arith.addf %467, %471 : vector<8x32xf32>
    %473 = math.tanh %472 : vector<8x32xf32>
    %cst_114 = arith.constant 1.000000e+00 : f32
    %474 = vector.broadcast %cst_114 : f32 to vector<8x32xf32>
    %475 = arith.subf %474, %466 : vector<8x32xf32>
    %476 = arith.mulf %475, %473 : vector<8x32xf32>
    %477 = arith.mulf %466, %440 : vector<8x32xf32>
    %478 = arith.addf %476, %477 : vector<8x32xf32>
    %c10_i32 = arith.constant 10 : i32
    %479 = arith.addi %6, %c10_i32 : i32
    %480 = vector.broadcast %479 : i32 to vector<8x1xi32>
    %481 = arith.cmpi slt, %480, %5 : vector<8x1xi32>
    %482 = vector.shape_cast %481 : vector<8x1xi1> to vector<8x1xi1>
    %483 = vector.broadcast %482 : vector<8x1xi1> to vector<8x32xi1>
    %484 = arith.select %483, %478, %440 : vector<8x32xi1>, vector<8x32xf32>
    %cst_115 = arith.constant 0.000000e+00 : f32
    %485 = vector.shape_cast %481 : vector<8x1xi1> to vector<8x1xi1>
    %486 = vector.broadcast %485 : vector<8x1xi1> to vector<8x32xi1>
    %487 = vector.broadcast %cst_115 : f32 to vector<8x32xf32>
    %488 = arith.select %486, %478, %487 : vector<8x32xi1>, vector<8x32xf32>
    %c10_116 = arith.constant 10 : index
    %c0_117 = arith.constant 0 : index
    %c0_118 = arith.constant 0 : index
    %489 = vector.load %arg6[%c10_116, %c0_117, %c0_118] : memref<16x8x32xf32, #tpu.memory_space<vmem>>, vector<1x8x32xf32>
    %490 = vector.shape_cast %489 : vector<1x8x32xf32> to vector<8x32xf32>
    %491 = vector.shape_cast %488 : vector<8x32xf32> to vector<1x8x32xf32>
    tpu.vector_store %arg6[%c10_116, %c0_117, %c0_118], %491 {strides = array<i32>} : memref<16x8x32xf32, #tpu.memory_space<vmem>>, vector<1x8x32xf32>,
    %c11 = arith.constant 11 : index
    %c0_119 = arith.constant 0 : index
    %c0_120 = arith.constant 0 : index
    %492 = vector.load %arg2[%c11, %c0_119, %c0_120] : memref<16x8x96xf32, #tpu.memory_space<vmem>>, vector<1x8x96xf32>
    %493 = vector.shape_cast %492 : vector<1x8x96xf32> to vector<8x96xf32>
    %cst_121 = arith.constant dense<0.000000e+00> : vector<8x96xf32>
    %494 = tpu.matmul %484, %3, %cst_121 {dimension_numbers = #tpu.dot_dimension_numbers<[1], [0], [0], [1], [0, 0, 1, 1], [], []>, precision = #tpu.contract_precision<fp32>} : vector<8x32xf32>, vector<32x96xf32>, vector<8x96xf32> -> vector<8x96xf32>
    %495 = vector.extract_strided_slice %493 {offsets = [0, 0], sizes = [8, 32], strides = [1, 1]} : vector<8x96xf32> to vector<8x32xf32>
    %496 = vector.extract_strided_slice %494 {offsets = [0, 0], sizes = [8, 32], strides = [1, 1]} : vector<8x96xf32> to vector<8x32xf32>
    %497 = arith.addf %495, %496 : vector<8x32xf32>
    %498 = arith.negf %497 : vector<8x32xf32>
    %499 = math.exp %498 : vector<8x32xf32>
    %cst_122 = arith.constant 1.000000e+00 : f32
    %500 = vector.broadcast %cst_122 : f32 to vector<8x32xf32>
    %501 = arith.addf %500, %499 : vector<8x32xf32>
    %502 = arith.divf %500, %501 : vector<8x32xf32>
    %503 = vector.extract_strided_slice %493 {offsets = [0, 32], sizes = [8, 32], strides = [1, 1]} : vector<8x96xf32> to vector<8x32xf32>
    %504 = vector.extract_strided_slice %494 {offsets = [0, 32], sizes = [8, 32], strides = [1, 1]} : vector<8x96xf32> to vector<8x32xf32>
    %505 = arith.addf %503, %504 : vector<8x32xf32>
    %506 = arith.negf %505 : vector<8x32xf32>
    %507 = math.exp %506 : vector<8x32xf32>
    %cst_123 = arith.constant 1.000000e+00 : f32
    %508 = vector.broadcast %cst_123 : f32 to vector<8x32xf32>
    %509 = arith.addf %508, %507 : vector<8x32xf32>
    %510 = arith.divf %508, %509 : vector<8x32xf32>
    %511 = vector.extract_strided_slice %493 {offsets = [0, 64], sizes = [8, 32], strides = [1, 1]} : vector<8x96xf32> to vector<8x32xf32>
    %512 = vector.extract_strided_slice %494 {offsets = [0, 64], sizes = [8, 32], strides = [1, 1]} : vector<8x96xf32> to vector<8x32xf32>
    %513 = vector.broadcast %4 : vector<1x32xf32> to vector<8x32xf32>
    %514 = arith.addf %512, %513 : vector<8x32xf32>
    %515 = arith.mulf %502, %514 : vector<8x32xf32>
    %516 = arith.addf %511, %515 : vector<8x32xf32>
    %517 = math.tanh %516 : vector<8x32xf32>
    %cst_124 = arith.constant 1.000000e+00 : f32
    %518 = vector.broadcast %cst_124 : f32 to vector<8x32xf32>
    %519 = arith.subf %518, %510 : vector<8x32xf32>
    %520 = arith.mulf %519, %517 : vector<8x32xf32>
    %521 = arith.mulf %510, %484 : vector<8x32xf32>
    %522 = arith.addf %520, %521 : vector<8x32xf32>
    %c11_i32 = arith.constant 11 : i32
    %523 = arith.addi %6, %c11_i32 : i32
    %524 = vector.broadcast %523 : i32 to vector<8x1xi32>
    %525 = arith.cmpi slt, %524, %5 : vector<8x1xi32>
    %526 = vector.shape_cast %525 : vector<8x1xi1> to vector<8x1xi1>
    %527 = vector.broadcast %526 : vector<8x1xi1> to vector<8x32xi1>
    %528 = arith.select %527, %522, %484 : vector<8x32xi1>, vector<8x32xf32>
    %cst_125 = arith.constant 0.000000e+00 : f32
    %529 = vector.shape_cast %525 : vector<8x1xi1> to vector<8x1xi1>
    %530 = vector.broadcast %529 : vector<8x1xi1> to vector<8x32xi1>
    %531 = vector.broadcast %cst_125 : f32 to vector<8x32xf32>
    %532 = arith.select %530, %522, %531 : vector<8x32xi1>, vector<8x32xf32>
    %c11_126 = arith.constant 11 : index
    %c0_127 = arith.constant 0 : index
    %c0_128 = arith.constant 0 : index
    %533 = vector.load %arg6[%c11_126, %c0_127, %c0_128] : memref<16x8x32xf32, #tpu.memory_space<vmem>>, vector<1x8x32xf32>
    %534 = vector.shape_cast %533 : vector<1x8x32xf32> to vector<8x32xf32>
    %535 = vector.shape_cast %532 : vector<8x32xf32> to vector<1x8x32xf32>
    tpu.vector_store %arg6[%c11_126, %c0_127, %c0_128], %535 {strides = array<i32>} : memref<16x8x32xf32, #tpu.memory_space<vmem>>, vector<1x8x32xf32>,
    %c12 = arith.constant 12 : index
    %c0_129 = arith.constant 0 : index
    %c0_130 = arith.constant 0 : index
    %536 = vector.load %arg2[%c12, %c0_129, %c0_130] : memref<16x8x96xf32, #tpu.memory_space<vmem>>, vector<1x8x96xf32>
    %537 = vector.shape_cast %536 : vector<1x8x96xf32> to vector<8x96xf32>
    %cst_131 = arith.constant dense<0.000000e+00> : vector<8x96xf32>
    %538 = tpu.matmul %528, %3, %cst_131 {dimension_numbers = #tpu.dot_dimension_numbers<[1], [0], [0], [1], [0, 0, 1, 1], [], []>, precision = #tpu.contract_precision<fp32>} : vector<8x32xf32>, vector<32x96xf32>, vector<8x96xf32> -> vector<8x96xf32>
    %539 = vector.extract_strided_slice %537 {offsets = [0, 0], sizes = [8, 32], strides = [1, 1]} : vector<8x96xf32> to vector<8x32xf32>
    %540 = vector.extract_strided_slice %538 {offsets = [0, 0], sizes = [8, 32], strides = [1, 1]} : vector<8x96xf32> to vector<8x32xf32>
    %541 = arith.addf %539, %540 : vector<8x32xf32>
    %542 = arith.negf %541 : vector<8x32xf32>
    %543 = math.exp %542 : vector<8x32xf32>
    %cst_132 = arith.constant 1.000000e+00 : f32
    %544 = vector.broadcast %cst_132 : f32 to vector<8x32xf32>
    %545 = arith.addf %544, %543 : vector<8x32xf32>
    %546 = arith.divf %544, %545 : vector<8x32xf32>
    %547 = vector.extract_strided_slice %537 {offsets = [0, 32], sizes = [8, 32], strides = [1, 1]} : vector<8x96xf32> to vector<8x32xf32>
    %548 = vector.extract_strided_slice %538 {offsets = [0, 32], sizes = [8, 32], strides = [1, 1]} : vector<8x96xf32> to vector<8x32xf32>
    %549 = arith.addf %547, %548 : vector<8x32xf32>
    %550 = arith.negf %549 : vector<8x32xf32>
    %551 = math.exp %550 : vector<8x32xf32>
    %cst_133 = arith.constant 1.000000e+00 : f32
    %552 = vector.broadcast %cst_133 : f32 to vector<8x32xf32>
    %553 = arith.addf %552, %551 : vector<8x32xf32>
    %554 = arith.divf %552, %553 : vector<8x32xf32>
    %555 = vector.extract_strided_slice %537 {offsets = [0, 64], sizes = [8, 32], strides = [1, 1]} : vector<8x96xf32> to vector<8x32xf32>
    %556 = vector.extract_strided_slice %538 {offsets = [0, 64], sizes = [8, 32], strides = [1, 1]} : vector<8x96xf32> to vector<8x32xf32>
    %557 = vector.broadcast %4 : vector<1x32xf32> to vector<8x32xf32>
    %558 = arith.addf %556, %557 : vector<8x32xf32>
    %559 = arith.mulf %546, %558 : vector<8x32xf32>
    %560 = arith.addf %555, %559 : vector<8x32xf32>
    %561 = math.tanh %560 : vector<8x32xf32>
    %cst_134 = arith.constant 1.000000e+00 : f32
    %562 = vector.broadcast %cst_134 : f32 to vector<8x32xf32>
    %563 = arith.subf %562, %554 : vector<8x32xf32>
    %564 = arith.mulf %563, %561 : vector<8x32xf32>
    %565 = arith.mulf %554, %528 : vector<8x32xf32>
    %566 = arith.addf %564, %565 : vector<8x32xf32>
    %c12_i32 = arith.constant 12 : i32
    %567 = arith.addi %6, %c12_i32 : i32
    %568 = vector.broadcast %567 : i32 to vector<8x1xi32>
    %569 = arith.cmpi slt, %568, %5 : vector<8x1xi32>
    %570 = vector.shape_cast %569 : vector<8x1xi1> to vector<8x1xi1>
    %571 = vector.broadcast %570 : vector<8x1xi1> to vector<8x32xi1>
    %572 = arith.select %571, %566, %528 : vector<8x32xi1>, vector<8x32xf32>
    %cst_135 = arith.constant 0.000000e+00 : f32
    %573 = vector.shape_cast %569 : vector<8x1xi1> to vector<8x1xi1>
    %574 = vector.broadcast %573 : vector<8x1xi1> to vector<8x32xi1>
    %575 = vector.broadcast %cst_135 : f32 to vector<8x32xf32>
    %576 = arith.select %574, %566, %575 : vector<8x32xi1>, vector<8x32xf32>
    %c12_136 = arith.constant 12 : index
    %c0_137 = arith.constant 0 : index
    %c0_138 = arith.constant 0 : index
    %577 = vector.load %arg6[%c12_136, %c0_137, %c0_138] : memref<16x8x32xf32, #tpu.memory_space<vmem>>, vector<1x8x32xf32>
    %578 = vector.shape_cast %577 : vector<1x8x32xf32> to vector<8x32xf32>
    %579 = vector.shape_cast %576 : vector<8x32xf32> to vector<1x8x32xf32>
    tpu.vector_store %arg6[%c12_136, %c0_137, %c0_138], %579 {strides = array<i32>} : memref<16x8x32xf32, #tpu.memory_space<vmem>>, vector<1x8x32xf32>,
    %c13 = arith.constant 13 : index
    %c0_139 = arith.constant 0 : index
    %c0_140 = arith.constant 0 : index
    %580 = vector.load %arg2[%c13, %c0_139, %c0_140] : memref<16x8x96xf32, #tpu.memory_space<vmem>>, vector<1x8x96xf32>
    %581 = vector.shape_cast %580 : vector<1x8x96xf32> to vector<8x96xf32>
    %cst_141 = arith.constant dense<0.000000e+00> : vector<8x96xf32>
    %582 = tpu.matmul %572, %3, %cst_141 {dimension_numbers = #tpu.dot_dimension_numbers<[1], [0], [0], [1], [0, 0, 1, 1], [], []>, precision = #tpu.contract_precision<fp32>} : vector<8x32xf32>, vector<32x96xf32>, vector<8x96xf32> -> vector<8x96xf32>
    %583 = vector.extract_strided_slice %581 {offsets = [0, 0], sizes = [8, 32], strides = [1, 1]} : vector<8x96xf32> to vector<8x32xf32>
    %584 = vector.extract_strided_slice %582 {offsets = [0, 0], sizes = [8, 32], strides = [1, 1]} : vector<8x96xf32> to vector<8x32xf32>
    %585 = arith.addf %583, %584 : vector<8x32xf32>
    %586 = arith.negf %585 : vector<8x32xf32>
    %587 = math.exp %586 : vector<8x32xf32>
    %cst_142 = arith.constant 1.000000e+00 : f32
    %588 = vector.broadcast %cst_142 : f32 to vector<8x32xf32>
    %589 = arith.addf %588, %587 : vector<8x32xf32>
    %590 = arith.divf %588, %589 : vector<8x32xf32>
    %591 = vector.extract_strided_slice %581 {offsets = [0, 32], sizes = [8, 32], strides = [1, 1]} : vector<8x96xf32> to vector<8x32xf32>
    %592 = vector.extract_strided_slice %582 {offsets = [0, 32], sizes = [8, 32], strides = [1, 1]} : vector<8x96xf32> to vector<8x32xf32>
    %593 = arith.addf %591, %592 : vector<8x32xf32>
    %594 = arith.negf %593 : vector<8x32xf32>
    %595 = math.exp %594 : vector<8x32xf32>
    %cst_143 = arith.constant 1.000000e+00 : f32
    %596 = vector.broadcast %cst_143 : f32 to vector<8x32xf32>
    %597 = arith.addf %596, %595 : vector<8x32xf32>
    %598 = arith.divf %596, %597 : vector<8x32xf32>
    %599 = vector.extract_strided_slice %581 {offsets = [0, 64], sizes = [8, 32], strides = [1, 1]} : vector<8x96xf32> to vector<8x32xf32>
    %600 = vector.extract_strided_slice %582 {offsets = [0, 64], sizes = [8, 32], strides = [1, 1]} : vector<8x96xf32> to vector<8x32xf32>
    %601 = vector.broadcast %4 : vector<1x32xf32> to vector<8x32xf32>
    %602 = arith.addf %600, %601 : vector<8x32xf32>
    %603 = arith.mulf %590, %602 : vector<8x32xf32>
    %604 = arith.addf %599, %603 : vector<8x32xf32>
    %605 = math.tanh %604 : vector<8x32xf32>
    %cst_144 = arith.constant 1.000000e+00 : f32
    %606 = vector.broadcast %cst_144 : f32 to vector<8x32xf32>
    %607 = arith.subf %606, %598 : vector<8x32xf32>
    %608 = arith.mulf %607, %605 : vector<8x32xf32>
    %609 = arith.mulf %598, %572 : vector<8x32xf32>
    %610 = arith.addf %608, %609 : vector<8x32xf32>
    %c13_i32 = arith.constant 13 : i32
    %611 = arith.addi %6, %c13_i32 : i32
    %612 = vector.broadcast %611 : i32 to vector<8x1xi32>
    %613 = arith.cmpi slt, %612, %5 : vector<8x1xi32>
    %614 = vector.shape_cast %613 : vector<8x1xi1> to vector<8x1xi1>
    %615 = vector.broadcast %614 : vector<8x1xi1> to vector<8x32xi1>
    %616 = arith.select %615, %610, %572 : vector<8x32xi1>, vector<8x32xf32>
    %cst_145 = arith.constant 0.000000e+00 : f32
    %617 = vector.shape_cast %613 : vector<8x1xi1> to vector<8x1xi1>
    %618 = vector.broadcast %617 : vector<8x1xi1> to vector<8x32xi1>
    %619 = vector.broadcast %cst_145 : f32 to vector<8x32xf32>
    %620 = arith.select %618, %610, %619 : vector<8x32xi1>, vector<8x32xf32>
    %c13_146 = arith.constant 13 : index
    %c0_147 = arith.constant 0 : index
    %c0_148 = arith.constant 0 : index
    %621 = vector.load %arg6[%c13_146, %c0_147, %c0_148] : memref<16x8x32xf32, #tpu.memory_space<vmem>>, vector<1x8x32xf32>
    %622 = vector.shape_cast %621 : vector<1x8x32xf32> to vector<8x32xf32>
    %623 = vector.shape_cast %620 : vector<8x32xf32> to vector<1x8x32xf32>
    tpu.vector_store %arg6[%c13_146, %c0_147, %c0_148], %623 {strides = array<i32>} : memref<16x8x32xf32, #tpu.memory_space<vmem>>, vector<1x8x32xf32>,
    %c14 = arith.constant 14 : index
    %c0_149 = arith.constant 0 : index
    %c0_150 = arith.constant 0 : index
    %624 = vector.load %arg2[%c14, %c0_149, %c0_150] : memref<16x8x96xf32, #tpu.memory_space<vmem>>, vector<1x8x96xf32>
    %625 = vector.shape_cast %624 : vector<1x8x96xf32> to vector<8x96xf32>
    %cst_151 = arith.constant dense<0.000000e+00> : vector<8x96xf32>
    %626 = tpu.matmul %616, %3, %cst_151 {dimension_numbers = #tpu.dot_dimension_numbers<[1], [0], [0], [1], [0, 0, 1, 1], [], []>, precision = #tpu.contract_precision<fp32>} : vector<8x32xf32>, vector<32x96xf32>, vector<8x96xf32> -> vector<8x96xf32>
    %627 = vector.extract_strided_slice %625 {offsets = [0, 0], sizes = [8, 32], strides = [1, 1]} : vector<8x96xf32> to vector<8x32xf32>
    %628 = vector.extract_strided_slice %626 {offsets = [0, 0], sizes = [8, 32], strides = [1, 1]} : vector<8x96xf32> to vector<8x32xf32>
    %629 = arith.addf %627, %628 : vector<8x32xf32>
    %630 = arith.negf %629 : vector<8x32xf32>
    %631 = math.exp %630 : vector<8x32xf32>
    %cst_152 = arith.constant 1.000000e+00 : f32
    %632 = vector.broadcast %cst_152 : f32 to vector<8x32xf32>
    %633 = arith.addf %632, %631 : vector<8x32xf32>
    %634 = arith.divf %632, %633 : vector<8x32xf32>
    %635 = vector.extract_strided_slice %625 {offsets = [0, 32], sizes = [8, 32], strides = [1, 1]} : vector<8x96xf32> to vector<8x32xf32>
    %636 = vector.extract_strided_slice %626 {offsets = [0, 32], sizes = [8, 32], strides = [1, 1]} : vector<8x96xf32> to vector<8x32xf32>
    %637 = arith.addf %635, %636 : vector<8x32xf32>
    %638 = arith.negf %637 : vector<8x32xf32>
    %639 = math.exp %638 : vector<8x32xf32>
    %cst_153 = arith.constant 1.000000e+00 : f32
    %640 = vector.broadcast %cst_153 : f32 to vector<8x32xf32>
    %641 = arith.addf %640, %639 : vector<8x32xf32>
    %642 = arith.divf %640, %641 : vector<8x32xf32>
    %643 = vector.extract_strided_slice %625 {offsets = [0, 64], sizes = [8, 32], strides = [1, 1]} : vector<8x96xf32> to vector<8x32xf32>
    %644 = vector.extract_strided_slice %626 {offsets = [0, 64], sizes = [8, 32], strides = [1, 1]} : vector<8x96xf32> to vector<8x32xf32>
    %645 = vector.broadcast %4 : vector<1x32xf32> to vector<8x32xf32>
    %646 = arith.addf %644, %645 : vector<8x32xf32>
    %647 = arith.mulf %634, %646 : vector<8x32xf32>
    %648 = arith.addf %643, %647 : vector<8x32xf32>
    %649 = math.tanh %648 : vector<8x32xf32>
    %cst_154 = arith.constant 1.000000e+00 : f32
    %650 = vector.broadcast %cst_154 : f32 to vector<8x32xf32>
    %651 = arith.subf %650, %642 : vector<8x32xf32>
    %652 = arith.mulf %651, %649 : vector<8x32xf32>
    %653 = arith.mulf %642, %616 : vector<8x32xf32>
    %654 = arith.addf %652, %653 : vector<8x32xf32>
    %c14_i32 = arith.constant 14 : i32
    %655 = arith.addi %6, %c14_i32 : i32
    %656 = vector.broadcast %655 : i32 to vector<8x1xi32>
    %657 = arith.cmpi slt, %656, %5 : vector<8x1xi32>
    %658 = vector.shape_cast %657 : vector<8x1xi1> to vector<8x1xi1>
    %659 = vector.broadcast %658 : vector<8x1xi1> to vector<8x32xi1>
    %660 = arith.select %659, %654, %616 : vector<8x32xi1>, vector<8x32xf32>
    %cst_155 = arith.constant 0.000000e+00 : f32
    %661 = vector.shape_cast %657 : vector<8x1xi1> to vector<8x1xi1>
    %662 = vector.broadcast %661 : vector<8x1xi1> to vector<8x32xi1>
    %663 = vector.broadcast %cst_155 : f32 to vector<8x32xf32>
    %664 = arith.select %662, %654, %663 : vector<8x32xi1>, vector<8x32xf32>
    %c14_156 = arith.constant 14 : index
    %c0_157 = arith.constant 0 : index
    %c0_158 = arith.constant 0 : index
    %665 = vector.load %arg6[%c14_156, %c0_157, %c0_158] : memref<16x8x32xf32, #tpu.memory_space<vmem>>, vector<1x8x32xf32>
    %666 = vector.shape_cast %665 : vector<1x8x32xf32> to vector<8x32xf32>
    %667 = vector.shape_cast %664 : vector<8x32xf32> to vector<1x8x32xf32>
    tpu.vector_store %arg6[%c14_156, %c0_157, %c0_158], %667 {strides = array<i32>} : memref<16x8x32xf32, #tpu.memory_space<vmem>>, vector<1x8x32xf32>,
    %c15 = arith.constant 15 : index
    %c0_159 = arith.constant 0 : index
    %c0_160 = arith.constant 0 : index
    %668 = vector.load %arg2[%c15, %c0_159, %c0_160] : memref<16x8x96xf32, #tpu.memory_space<vmem>>, vector<1x8x96xf32>
    %669 = vector.shape_cast %668 : vector<1x8x96xf32> to vector<8x96xf32>
    %cst_161 = arith.constant dense<0.000000e+00> : vector<8x96xf32>
    %670 = tpu.matmul %660, %3, %cst_161 {dimension_numbers = #tpu.dot_dimension_numbers<[1], [0], [0], [1], [0, 0, 1, 1], [], []>, precision = #tpu.contract_precision<fp32>} : vector<8x32xf32>, vector<32x96xf32>, vector<8x96xf32> -> vector<8x96xf32>
    %671 = vector.extract_strided_slice %669 {offsets = [0, 0], sizes = [8, 32], strides = [1, 1]} : vector<8x96xf32> to vector<8x32xf32>
    %672 = vector.extract_strided_slice %670 {offsets = [0, 0], sizes = [8, 32], strides = [1, 1]} : vector<8x96xf32> to vector<8x32xf32>
    %673 = arith.addf %671, %672 : vector<8x32xf32>
    %674 = arith.negf %673 : vector<8x32xf32>
    %675 = math.exp %674 : vector<8x32xf32>
    %cst_162 = arith.constant 1.000000e+00 : f32
    %676 = vector.broadcast %cst_162 : f32 to vector<8x32xf32>
    %677 = arith.addf %676, %675 : vector<8x32xf32>
    %678 = arith.divf %676, %677 : vector<8x32xf32>
    %679 = vector.extract_strided_slice %669 {offsets = [0, 32], sizes = [8, 32], strides = [1, 1]} : vector<8x96xf32> to vector<8x32xf32>
    %680 = vector.extract_strided_slice %670 {offsets = [0, 32], sizes = [8, 32], strides = [1, 1]} : vector<8x96xf32> to vector<8x32xf32>
    %681 = arith.addf %679, %680 : vector<8x32xf32>
    %682 = arith.negf %681 : vector<8x32xf32>
    %683 = math.exp %682 : vector<8x32xf32>
    %cst_163 = arith.constant 1.000000e+00 : f32
    %684 = vector.broadcast %cst_163 : f32 to vector<8x32xf32>
    %685 = arith.addf %684, %683 : vector<8x32xf32>
    %686 = arith.divf %684, %685 : vector<8x32xf32>
    %687 = vector.extract_strided_slice %669 {offsets = [0, 64], sizes = [8, 32], strides = [1, 1]} : vector<8x96xf32> to vector<8x32xf32>
    %688 = vector.extract_strided_slice %670 {offsets = [0, 64], sizes = [8, 32], strides = [1, 1]} : vector<8x96xf32> to vector<8x32xf32>
    %689 = vector.broadcast %4 : vector<1x32xf32> to vector<8x32xf32>
    %690 = arith.addf %688, %689 : vector<8x32xf32>
    %691 = arith.mulf %678, %690 : vector<8x32xf32>
    %692 = arith.addf %687, %691 : vector<8x32xf32>
    %693 = math.tanh %692 : vector<8x32xf32>
    %cst_164 = arith.constant 1.000000e+00 : f32
    %694 = vector.broadcast %cst_164 : f32 to vector<8x32xf32>
    %695 = arith.subf %694, %686 : vector<8x32xf32>
    %696 = arith.mulf %695, %693 : vector<8x32xf32>
    %697 = arith.mulf %686, %660 : vector<8x32xf32>
    %698 = arith.addf %696, %697 : vector<8x32xf32>
    %c15_i32 = arith.constant 15 : i32
    %699 = arith.addi %6, %c15_i32 : i32
    %700 = vector.broadcast %699 : i32 to vector<8x1xi32>
    %701 = arith.cmpi slt, %700, %5 : vector<8x1xi32>
    %702 = vector.shape_cast %701 : vector<8x1xi1> to vector<8x1xi1>
    %703 = vector.broadcast %702 : vector<8x1xi1> to vector<8x32xi1>
    %704 = arith.select %703, %698, %660 : vector<8x32xi1>, vector<8x32xf32>
    %cst_165 = arith.constant 0.000000e+00 : f32
    %705 = vector.shape_cast %701 : vector<8x1xi1> to vector<8x1xi1>
    %706 = vector.broadcast %705 : vector<8x1xi1> to vector<8x32xi1>
    %707 = vector.broadcast %cst_165 : f32 to vector<8x32xf32>
    %708 = arith.select %706, %698, %707 : vector<8x32xi1>, vector<8x32xf32>
    %c15_166 = arith.constant 15 : index
    %c0_167 = arith.constant 0 : index
    %c0_168 = arith.constant 0 : index
    %709 = vector.load %arg6[%c15_166, %c0_167, %c0_168] : memref<16x8x32xf32, #tpu.memory_space<vmem>>, vector<1x8x32xf32>
    %710 = vector.shape_cast %709 : vector<1x8x32xf32> to vector<8x32xf32>
    %711 = vector.shape_cast %708 : vector<8x32xf32> to vector<1x8x32xf32>
    tpu.vector_store %arg6[%c15_166, %c0_167, %c0_168], %711 {strides = array<i32>} : memref<16x8x32xf32, #tpu.memory_space<vmem>>, vector<1x8x32xf32>,
    %c0_169 = arith.constant 0 : index
    %c0_170 = arith.constant 0 : index
    %712 = vector.load %arg7[%c0_169, %c0_170] : memref<8x32xf32, #tpu.memory_space<vmem>>, vector<8x32xf32>
    tpu.vector_store %arg7[%c0_169, %c0_170], %704 {strides = array<i32>} : memref<8x32xf32, #tpu.memory_space<vmem>>, vector<8x32xf32>,
    return
  }
  func.func @transform_0(%arg0: i32, %arg1: i32) -> (i32, i32, i32) {
    %c0_i32 = arith.constant 0 : i32
    %c0_i32_0 = arith.constant 0 : i32
    return %arg1, %arg0, %c0_i32 : i32, i32, i32
  }
  func.func @transform_1(%arg0: i32, %arg1: i32) -> (i32, i32) {
    %c0_i32 = arith.constant 0 : i32
    %c0_i32_0 = arith.constant 0 : i32
    %c0_i32_1 = arith.constant 0 : i32
    return %c0_i32, %c0_i32_0 : i32, i32
  }
  func.func @transform_2(%arg0: i32, %arg1: i32) -> (i32, i32) {
    %c0_i32 = arith.constant 0 : i32
    %c0_i32_0 = arith.constant 0 : i32
    %c0_i32_1 = arith.constant 0 : i32
    return %c0_i32, %c0_i32_0 : i32, i32
  }
  func.func @transform_3(%arg0: i32, %arg1: i32) -> (i32, i32) {
    %c0_i32 = arith.constant 0 : i32
    %c0_i32_0 = arith.constant 0 : i32
    return %arg0, %c0_i32 : i32, i32
  }
  func.func @transform_4(%arg0: i32, %arg1: i32) -> (i32, i32, i32) {
    %c0_i32 = arith.constant 0 : i32
    %c0_i32_0 = arith.constant 0 : i32
    return %arg1, %arg0, %c0_i32 : i32, i32, i32
  }
  func.func @transform_5(%arg0: i32, %arg1: i32) -> (i32, i32) {
    %c0_i32 = arith.constant 0 : i32
    %c0_i32_0 = arith.constant 0 : i32
    return %arg0, %c0_i32 : i32, i32
  }
}

</mosaic_0001>

<bundles_post_ra>
// kernel: encoder_forward.1
= control target key start
LH: loop header
LB: loop body
LE: loop exit
PB: predicated region body
PF: predicated region fallthrough
CT: control target
= control target key end

     0   :  { %vm23_vm0 = vcmask 261120   ;;  %v11055_v0 = vmov 0.0|0.0   ;;  %vm11056_vm1 = vmmov 0   ;;  %v11057_v4 = vmov 0.0   ;;  %s11058_s30 = smov 64   ;;  %s11060_s10 = smov 32   ;;  %s12108_s1 = inlined_call_operand.vmem [shape: f32[32,96], index: 1, kind: input, shape index: {}]   ;;  %s12109_s5 = inlined_call_operand.vmem [shape: f32[8,32], index: 5, kind: output, shape index: {1}]   ;;  %s12110_s2 = inlined_call_operand.vmem [shape: f32[1,32], index: 2, kind: input, shape index: {}]   ;;  %s12111_s0 = inlined_call_operand.vmem [shape: f32[16,8,96], index: 0, kind: input, shape index: {}]   ;;  %s12112_s3 = inlined_call_operand.vmem [shape: s32[8,1], index: 3, kind: input, shape index: {}]   ;;  %s12113_s4 = inlined_call_operand.vmem [shape: f32[16,8,32], index: 4, kind: output, shape index: {0}]  }
   0x1   :  { %10212 = vmatprep.subr.bf16.mxu0 %v11055_v0  ;;  %v25_v1 = vld [vmem:[%s12108_s1] sm:$0xff]  ;;  %v26_v2 = vld [vmem:[%s12108_s1 + $0x8] sm:$0xff]  ;;  %v27_v3 = vld [vmem:[%s12108_s1 + $0x10] sm:$0xff]  ;;  %9164 = vmatprep.mubr.msk.f32.mxu0 %vm11056_vm1, %v11057_v4  ;;  %24 = vst.msk [vmem:[%s12109_s5] sm:$0xff] %vm23_vm0, %v11057_v4  ;;  %v11059_v42 = vmov 0   ;;  %s11061_s11 = smov 96  }
   0x2   :  { %v39_v5 = vand.u32 4294901760, %v25_v1  ;;  %v42_v6 = vand.u32 4294901760, %v26_v2  ;;  %v28_v7 = vld [vmem:[%s12108_s1 + $0x18] sm:$0xff]  ;;  %v45_v8 = vand.u32 4294901760, %v27_v3  ;;  %v8614_v9 = vld [vmem:[%s12110_s2] ss:$0 sm:$0xff]  ;;  %10248 = vmatprep.subr.bf16.mxu1 %v11055_v0  ;;  %9230 = vmatprep.mubr.msk.f32.mxu1 %vm11056_vm1, %v11057_v4 }
   0x3   :  { %v48_v10 = vand.u32 4294901760, %v28_v7  ;;  %535 = vrot.lane.b32.xlu0 %v8614_v9, %s11058_s30  ;;  %10955 = vset.pattern.permute.xlu1 %v11059_v42  ;;  %v33_v47 = vld [vmem:[%s12111_s0] sm:$0xff] }
   0x4   :  { %v11119_v11 = vpack.c.bf16 %v42_v6, %v39_v5  ;;  %v119_v12 = vsub.f32 %v25_v1, %v39_v5  ;;  %v126_v13 = vsub.f32 %v26_v2, %v42_v6  ;;  %v133_v14 = vsub.f32 %v27_v3, %v45_v8  ;;  %10956 = vset.pattern.permute.xlu0 %v11059_v42  ;;  %v11198_v52 = vld [vmem:[%s12112_s3] sm:$0xff] }
   0x5   :  { %v140_v15 = vsub.f32 %v28_v7, %v48_v10  ;;  %v11122_v16 = vpack.c.bf16 %v48_v10, %v45_v8  ;;  %vm8615_vm2 = vcmp.gt.s32.totalorder %v11198_v52, 0  ;;  %vm8618_vm4 = vcmp.gt.s32.totalorder %v11198_v52, 1 }
   0x6   :  { %10214 = vmatpush3.bf16.msra.mxu0 %v11119_v11  ;;  %v120_v17 = vand.u32 4294901760, %v119_v12  ;;  %v127_v18 = vand.u32 4294901760, %v126_v13  ;;  %10250 = vmatpush3.bf16.msra.mxu1 %v11119_v11  ;;  %v134_v20 = vand.u32 4294901760, %v133_v14  ;;  %v11147_v38 = vpack.c.bf16 %v126_v13, %v119_v12 }
   0x7   :  { %10215 = vmatprep.subr.bf16.mxu0 %v11055_v0  ;;  %10251 = vmatprep.subr.bf16.mxu1 %v11055_v0  ;;  %v141_v24 = vand.u32 4294901760, %v140_v15  ;;  %v11151_v39 = vpack.c.bf16 %v140_v15, %v133_v14  ;;  %v563_v56 = vsel %vm8615_vm2, 1, %v11059_v42  ;;  %vm8622_vm6 = vcmp.gt.s32.totalorder %v11198_v52, 2 }
   0x8   :  { %v11130_v19 = vld [vmem:[%s12109_s5] sm:$0xff]  ;;  %v121_v22 = vsub.f32 %v119_v12, %v120_v17  ;;  %v128_v23 = vsub.f32 %v126_v13, %v127_v18  ;;  %v135_v29 = vsub.f32 %v133_v14, %v134_v20  ;;  %v11163_v40 = vpack.c.bf16 %v127_v18, %v120_v17 }
   0x9   :  { %v36_v21 = vsel %vm23_vm0, %v11130_v19, 0  ;;  %v142_v30 = vsub.f32 %v140_v15, %v141_v24  ;;  %v11167_v41 = vpack.c.bf16 %v141_v24, %v134_v20  ;;  %v8616_v20 = vld [vmem:[%s12111_s0 + $0x8] sm:$0xff]  ;;  %vm8626_vm8 = vcmp.gt.s32.totalorder %v11198_v52, 3 }
   0xa   :  { %10217 = vmatpush3.bf16.msra.mxu0 %v11122_v16  ;;  %v107_v25 = vand.u32 4294901760, %v36_v21  ;;  %10253 = vmatpush3.bf16.msra.mxu1 %v11122_v16  ;;  %v122_v27 = vand.u32 4294901760, %v121_v22  ;;  %v129_v28 = vand.u32 4294901760, %v128_v23  ;;  %v136_v34 = vand.u32 4294901760, %v135_v29 }
   0xb   :  { %10218 = vmatprep.subr.bf16.mxu0 %v11055_v0  ;;  %10254 = vmatprep.subr.bf16.mxu1 %v11055_v0  ;;  %v143_v35 = vand.u32 4294901760, %v142_v30  ;;  %vm8630_vm10 = vcmp.gt.s32.totalorder %v11198_v52, 4  ;;  %vm8634_vm12 = vcmp.gt.s32.totalorder %v11198_v52, 5  ;;  %vm8638_vm14 = vcmp.gt.s32.totalorder %v11198_v52, 6 }
   0xc   :  { %v108_v26 = vsub.f32 %v36_v21, %v107_v25  ;;  %v11138_v33 = vpack.c.bf16 %v129_v28, %v122_v27 }
   0xd   :  { %v11141_v37 = vpack.c.bf16 %v143_v35, %v136_v34 }
   0xe   :  { %v109_v31 = vand.u32 4294901760, %v108_v26 }
  0x10   :  { %v110_v32 = vsub.f32 %v108_v26, %v109_v31 }
  0x12   :  { %v111_v36 = vand.u32 4294901760, %v110_v32 }
  0x14   :  { %9165 = vmatmul.mubr.f32.vlgmr.msra.gmra.mrb[0].mxu0 %v111_v36 }
  0x15   :  { %10220 = vmatpush3.bf16.msra.mxu0 %v11138_v33  ;;  %9175 = vmatprep.mubr.msk.f32.mxu0 %vm11056_vm1, %v11057_v4 }
  0x16   :  { %10221 = vmatprep.subr.bf16.mxu0 %v11055_v0 }
  0x19   :  { %10223 = vmatpush3.bf16.msra.mxu0 %v11141_v37 }
  0x1a   :  { %10224 = vmatprep.subr.bf16.mxu0 %v11055_v0 }
  0x1c   :  { %9176 = vmatmul.mubr.f32.vlgmr.msra.gmra.mrb[0].mxu0 %v107_v25 }
  0x1d   :  { %10226 = vmatpush3.bf16.msra.mxu0 %v11147_v38  ;;  %9186 = vmatprep.mubr.msk.f32.mxu0 %vm11056_vm1, %v11057_v4 }
  0x1e   :  { %10227 = vmatprep.subr.bf16.mxu0 %v11055_v0 }
  0x21   :  { %10229 = vmatpush3.bf16.msra.mxu0 %v11151_v39 }
  0x22   :  { %10230 = vmatprep.subr.bf16.mxu0 %v11055_v0 }
  0x24   :  { %9187 = vmatmul.mubr.f32.vlgmr.msra.gmra.mrb[0].mxu0 %v108_v26 }
  0x25   :  { %10232 = vmatpush3.bf16.msra.mxu0 %v11119_v11  ;;  %9197 = vmatprep.mubr.msk.f32.mxu0 %vm11056_vm1, %v11057_v4 }
  0x26   :  { %10233 = vmatprep.subr.bf16.mxu0 %v11055_v0 }
  0x29   :  { %10235 = vmatpush3.bf16.msra.mxu0 %v11122_v16 }
  0x2a   :  { %10236 = vmatprep.subr.bf16.mxu0 %v11055_v0 }
  0x2c   :  { %9198 = vmatmul.mubr.f32.vlgmr.msra.gmra.mrb[0].mxu0 %v109_v31 }
  0x2d   :  { %10238 = vmatpush3.bf16.msra.mxu0 %v11163_v40  ;;  %9208 = vmatprep.mubr.msk.f32.mxu0 %vm11056_vm1, %v11057_v4 }
  0x2e   :  { %10239 = vmatprep.subr.bf16.mxu0 %v11055_v0 }
  0x31   :  { %10241 = vmatpush3.bf16.msra.mxu0 %v11167_v41 }
  0x32   :  { %10242 = vmatprep.subr.bf16.mxu0 %v11055_v0 }
  0x34   :  { %9209 = vmatmul.mubr.f32.vlgmr.msra.gmra.mrb[0].mxu0 %v107_v25 }
  0x35   :  { %10244 = vmatpush3.bf16.msra.mxu0 %v11119_v11  ;;  %9219 = vmatprep.mubr.msk.f32.mxu0 %vm11056_vm1, %v11057_v4 }
  0x36   :  { %10245 = vmatprep.subr.bf16.mxu0 %v11055_v0 }
  0x39   :  { %10247 = vmatpush3.bf16.msra.mxu0 %v11122_v16 }
  0x3a   :  { %10284 = vmatprep.subr.bf16.mxu0 %v11055_v0 }
  0x3c   :  { %9220 = vmatmul.mubr.f32.vlgmr.msra.gmra.mrb[0].mxu0 %v107_v25 }
  0x3d   :  { %10286 = vmatpush3.bf16.msra.mxu0 %v11119_v11  ;;  %9296 = vmatprep.mubr.msk.f32.mxu0 %vm11056_vm1, %v11057_v4 }
  0x3e   :  { %10287 = vmatprep.subr.bf16.mxu0 %v11055_v0 }
  0x41   :  { %10289 = vmatpush3.bf16.msra.mxu0 %v11122_v16 }
  0x42   :  { %10290 = vmatprep.subr.bf16.mxu0 %v11055_v0 }
  0x75   :  { %v11188_v43 = vpop.permute.xlu0 %535 }
 0x10f   :  { %v519_v44 = vpop.f32.mrb[0].mxu0 }
 0x110   :  { %v538_v45 = vadd.f32 %v11188_v43, %v519_v44  ;;  %v9221_v46 = vpop.f32.mrb[1].mxu0  ;;  %v523_v48 = vadd.f32 %v519_v44, %v33_v47 }
 0x112   :  { %540 = vrot.lane.b32.xlu0 %v538_v45, %s11058_s30  ;;  %v8613_v49 = vmul.f32 -1.442695, %v523_v48 }
 0x114   :  { %10957 = vpow2.f32 %v8613_v49 }
 0x11e   :  { %v10958_v50 = vpop.eup %10957 }
 0x11f   :  { %v527_v51 = vadd.f32 1.0, %v10958_v50 }
 0x121   :  { %10959 = vrcp.f32 %v527_v51 }
 0x12b   :  { %v10960_v53 = vpop.eup %10959 }
 0x12c   :  { %v550_v62 = vsub.f32 1.0, %v10960_v53 }
 0x184   :  { %v541_v54 = vpop.permute.xlu0 %540 }
 0x185   :  { %v543_v55 = vmul.f32 %v10960_v53, %v541_v54 }
 0x187   :  { %545 = vrot.lane.b32.xlu1 %v543_v55, %s11058_s30 }
 0x18b   :  { %565 = vperm.xlu1 %10955, %v563_v56  }
 0x18f   :  { %556 = vrot.lane.b32.xlu1 %v11130_v19, %s11060_s10  ;;  %v1097_v19 = vsel %vm8618_vm4, 1, %v11059_v42 }
 0x1f9   :  { %v546_v57 = vpop.permute.xlu1 %545 }
 0x1fa   :  { %v548_v58 = vadd.f32 %v546_v57, %v33_v47 }
 0x1fc   :  { %10961 = vtanh.f32 %v548_v58  ;;  %v8620_v58 = vld [vmem:[%s12111_s0 + $0x10] sm:$0xff] }
 0x206   :  { %v10962_v59 = vpop.eup %10961 }
 0x207   :  { %552 = vrot.lane.b32.xlu0 %v10962_v59, %s11061_s11 }
 0x20a   :  { %v566_v60 = vpop.permute.xlu1 %565 }
 0x20b   :  { %vm567_vm3 = vcmp.eq.s32.totalorder %v566_v60, 1 }
 0x20e   :  { %v557_v61 = vpop.permute.xlu1 %556 }
 0x20f   :  { %v559_v1 = vmul.f32 %v10960_v53, %v557_v61 }
 0x279   :  { %v553_v63 = vpop.permute.xlu0 %552 }
 0x27a   :  { %v555_v2 = vmul.f32 %v553_v63, %v550_v62  ;;  %v1632_v63 = vsel %vm8622_vm6, 1, %v11059_v42 }
 0x27c   :  { %v560_v3 = vadd.f32 %v559_v1, %v555_v2 }
 0x27e   :  { %v11205_v5 = vsel %vm567_vm3, %v560_v3, %v557_v61  ;;  %v11207_v6 = vsel %vm567_vm3, %v560_v3, 0.0 }
 0x27f   :  { %578 = vrot.lane.b32.xlu0 %v11205_v5, %s11061_s11 }
 0x2f1   :  { %v579_v7 = vpop.permute.xlu0 %578 }
 0x2f2   :  { %v580_v8 = vsel %vm23_vm0, %v579_v7, 0 }
 0x2f3   :  { %v651_v9 = vand.u32 4294901760, %v580_v8 }
 0x2f5   :  { %v652_v10 = vsub.f32 %v580_v8, %v651_v9 }
 0x2f7   :  { %v653_v12 = vand.u32 4294901760, %v652_v10 }
 0x2f9   :  { %v654_v13 = vsub.f32 %v652_v10, %v653_v12 }
 0x2fb   :  { %v655_v14 = vand.u32 4294901760, %v654_v13 }
 0x2fd   :  { %9231 = vmatmul.mubr.f32.vlgmr.msra.gmra.mrb[0].mxu1 %v655_v14 }
 0x2fe   :  { %10256 = vmatpush3.bf16.msra.mxu1 %v11138_v33  ;;  %9241 = vmatprep.mubr.msk.f32.mxu1 %vm11056_vm1, %v11057_v4 }
 0x2ff   :  { %10257 = vmatprep.subr.bf16.mxu1 %v11055_v0 }
 0x302   :  { %10259 = vmatpush3.bf16.msra.mxu1 %v11141_v37 }
 0x303   :  { %10260 = vmatprep.subr.bf16.mxu1 %v11055_v0 }
 0x305   :  { %9242 = vmatmul.mubr.f32.vlgmr.msra.gmra.mrb[0].mxu1 %v651_v9 }
 0x306   :  { %10262 = vmatpush3.bf16.msra.mxu1 %v11147_v38  ;;  %9252 = vmatprep.mubr.msk.f32.mxu1 %vm11056_vm1, %v11057_v4 }
 0x307   :  { %10263 = vmatprep.subr.bf16.mxu1 %v11055_v0 }
 0x30a   :  { %10265 = vmatpush3.bf16.msra.mxu1 %v11151_v39 }
 0x30b   :  { %10266 = vmatprep.subr.bf16.mxu1 %v11055_v0 }
 0x30d   :  { %9253 = vmatmul.mubr.f32.vlgmr.msra.gmra.mrb[0].mxu1 %v652_v10 }
 0x30e   :  { %10268 = vmatpush3.bf16.msra.mxu1 %v11119_v11  ;;  %9263 = vmatprep.mubr.msk.f32.mxu1 %vm11056_vm1, %v11057_v4 }
 0x30f   :  { %10269 = vmatprep.subr.bf16.mxu1 %v11055_v0 }
 0x312   :  { %10271 = vmatpush3.bf16.msra.mxu1 %v11122_v16 }
 0x313   :  { %10272 = vmatprep.subr.bf16.mxu1 %v11055_v0 }
 0x315   :  { %9264 = vmatmul.mubr.f32.vlgmr.msra.gmra.mrb[0].mxu1 %v653_v12 }
 0x316   :  { %10274 = vmatpush3.bf16.msra.mxu1 %v11163_v40  ;;  %9274 = vmatprep.mubr.msk.f32.mxu1 %vm11056_vm1, %v11057_v4 }
 0x317   :  { %10275 = vmatprep.subr.bf16.mxu1 %v11055_v0 }
 0x31a   :  { %10277 = vmatpush3.bf16.msra.mxu1 %v11167_v41 }
 0x31b   :  { %10278 = vmatprep.subr.bf16.mxu1 %v11055_v0 }
 0x31d   :  { %9275 = vmatmul.mubr.f32.vlgmr.msra.gmra.mrb[0].mxu1 %v651_v9 }
 0x31e   :  { %10280 = vmatpush3.bf16.msra.mxu1 %v11119_v11  ;;  %9285 = vmatprep.mubr.msk.f32.mxu1 %vm11056_vm1, %v11057_v4 }
 0x31f   :  { %10281 = vmatprep.subr.bf16.mxu1 %v11055_v0 }
 0x322   :  { %10283 = vmatpush3.bf16.msra.mxu1 %v11122_v16 }
 0x323   :  { %10320 = vmatprep.subr.bf16.mxu1 %v11055_v0 }
 0x325   :  { %9286 = vmatmul.mubr.f32.vlgmr.msra.gmra.mrb[0].mxu1 %v651_v9 }
 0x326   :  { %10322 = vmatpush3.bf16.msra.mxu1 %v11119_v11  ;;  %9362 = vmatprep.mubr.msk.f32.mxu1 %vm11056_vm1, %v11057_v4 }
 0x327   :  { %10323 = vmatprep.subr.bf16.mxu1 %v11055_v0 }
 0x32a   :  { %10325 = vmatpush3.bf16.msra.mxu1 %v11122_v16 }
 0x32b   :  { %10326 = vmatprep.subr.bf16.mxu1 %v11055_v0 }
 0x3f8   :  { %v1063_v15 = vpop.f32.mrb[0].mxu1 }
 0x3f9   :  { %v1074_v17 = vadd.f32 %v1063_v15, %v11188_v43  ;;  %v9287_v18 = vpop.f32.mrb[1].mxu1  ;;  %v1067_v21 = vadd.f32 %v8616_v20, %v1063_v15 }
 0x3fb   :  { %1076 = vrot.lane.b32.xlu1 %v1074_v17, %s11058_s30  ;;  %v8617_v22 = vmul.f32 -1.442695, %v1067_v21 }
 0x3fd   :  { %10963 = vpow2.f32 %v8617_v22 }
 0x3ff   :  { %1099 = vperm.xlu1 %10955, %v1097_v19  }
 0x407   :  { %v10964_v23 = vpop.eup %10963 }
 0x408   :  { %v1071_v24 = vadd.f32 1.0, %v10964_v23 }
 0x40a   :  { %10965 = vrcp.f32 %v1071_v24 }
 0x414   :  { %v10966_v25 = vpop.eup %10965 }
 0x415   :  { %v1086_v31 = vsub.f32 1.0, %v10966_v25  ;;  %v1092_v35 = vmul.f32 %v10966_v25, %v11205_v5 }
 0x46d   :  { %v1077_v26 = vpop.permute.xlu1 %1076 }
 0x46e   :  { %v1079_v27 = vmul.f32 %v10966_v25, %v1077_v26 }
 0x470   :  { %1081 = vrot.lane.b32.xlu0 %v1079_v27, %s11058_s30 }
 0x47e   :  { %v1100_v34 = vpop.permute.xlu1 %1099 }
 0x47f   :  { %vm1101_vm5 = vcmp.eq.s32.totalorder %v1100_v34, 1 }
 0x4e2   :  { %v1082_v28 = vpop.permute.xlu0 %1081 }
 0x4e3   :  { %v1084_v29 = vadd.f32 %v8616_v20, %v1082_v28 }
 0x4e5   :  { %10967 = vtanh.f32 %v1084_v29  ;;  %v2167_v29 = vsel %vm8626_vm8, 1, %v11059_v42 }
 0x4ef   :  { %v10968_v30 = vpop.eup %10967 }
 0x4f0   :  { %1088 = vrot.lane.b32.xlu0 %v10968_v30, %s11061_s11  ;;  %v8624_v30 = vld [vmem:[%s12111_s0 + $0x18] sm:$0xff] }
 0x562   :  { %v1089_v32 = vpop.permute.xlu0 %1088 }
 0x563   :  { %v1091_v36 = vmul.f32 %v1089_v32, %v1086_v31 }
 0x565   :  { %v1093_v44 = vadd.f32 %v1092_v35, %v1091_v36 }
 0x567   :  { %v11259_v45 = vsel %vm1101_vm5, %v1093_v44, %v11205_v5  ;;  %v11261_v46 = vsel %vm1101_vm5, %v1093_v44, 0.0 }
 0x568   :  { %1113 = vrot.lane.b32.xlu1 %v11259_v45, %s11061_s11 }
 0x5da   :  { %v1114_v47 = vpop.permute.xlu1 %1113 }
 0x5db   :  { %v1115_v48 = vsel %vm23_vm0, %v1114_v47, 0 }
 0x5dc   :  { %v1186_v49 = vand.u32 4294901760, %v1115_v48 }
 0x5de   :  { %v1187_v50 = vsub.f32 %v1115_v48, %v1186_v49 }
 0x5e0   :  { %v1188_v51 = vand.u32 4294901760, %v1187_v50 }
 0x5e2   :  { %v1189_v53 = vsub.f32 %v1187_v50, %v1188_v51 }
 0x5e4   :  { %v1190_v54 = vand.u32 4294901760, %v1189_v53 }
 0x5e6   :  { %9297 = vmatmul.mubr.f32.vlgmr.msra.gmra.mrb[2].mxu0 %v1190_v54 }
 0x5e7   :  { %10292 = vmatpush3.bf16.msra.mxu0 %v11138_v33  ;;  %9307 = vmatprep.mubr.msk.f32.mxu0 %vm11056_vm1, %v11057_v4 }
 0x5e8   :  { %10293 = vmatprep.subr.bf16.mxu0 %v11055_v0 }
 0x5eb   :  { %10295 = vmatpush3.bf16.msra.mxu0 %v11141_v37 }
 0x5ec   :  { %10296 = vmatprep.subr.bf16.mxu0 %v11055_v0 }
 0x5ee   :  { %9308 = vmatmul.mubr.f32.vlgmr.msra.gmra.mrb[2].mxu0 %v1186_v49 }
 0x5ef   :  { %10298 = vmatpush3.bf16.msra.mxu0 %v11147_v38  ;;  %9318 = vmatprep.mubr.msk.f32.mxu0 %vm11056_vm1, %v11057_v4 }
 0x5f0   :  { %10299 = vmatprep.subr.bf16.mxu0 %v11055_v0 }
 0x5f3   :  { %10301 = vmatpush3.bf16.msra.mxu0 %v11151_v39 }
 0x5f4   :  { %10302 = vmatprep.subr.bf16.mxu0 %v11055_v0 }
 0x5f6   :  { %9319 = vmatmul.mubr.f32.vlgmr.msra.gmra.mrb[2].mxu0 %v1187_v50 }
 0x5f7   :  { %10304 = vmatpush3.bf16.msra.mxu0 %v11119_v11  ;;  %9329 = vmatprep.mubr.msk.f32.mxu0 %vm11056_vm1, %v11057_v4 }
 0x5f8   :  { %10305 = vmatprep.subr.bf16.mxu0 %v11055_v0 }
 0x5fb   :  { %10307 = vmatpush3.bf16.msra.mxu0 %v11122_v16 }
 0x5fc   :  { %10308 = vmatprep.subr.bf16.mxu0 %v11055_v0 }
 0x5fe   :  { %9330 = vmatmul.mubr.f32.vlgmr.msra.gmra.mrb[2].mxu0 %v1188_v51 }
 0x5ff   :  { %10310 = vmatpush3.bf16.msra.mxu0 %v11163_v40  ;;  %9340 = vmatprep.mubr.msk.f32.mxu0 %vm11056_vm1, %v11057_v4 }
 0x600   :  { %10311 = vmatprep.subr.bf16.mxu0 %v11055_v0 }
 0x603   :  { %10313 = vmatpush3.bf16.msra.mxu0 %v11167_v41 }
 0x604   :  { %10314 = vmatprep.subr.bf16.mxu0 %v11055_v0 }
 0x606   :  { %9341 = vmatmul.mubr.f32.vlgmr.msra.gmra.mrb[2].mxu0 %v1186_v49 }
 0x607   :  { %10316 = vmatpush3.bf16.msra.mxu0 %v11119_v11  ;;  %9351 = vmatprep.mubr.msk.f32.mxu0 %vm11056_vm1, %v11057_v4 }
 0x608   :  { %10317 = vmatprep.subr.bf16.mxu0 %v11055_v0 }
 0x60b   :  { %10319 = vmatpush3.bf16.msra.mxu0 %v11122_v16 }
 0x60c   :  { %10356 = vmatprep.subr.bf16.mxu0 %v11055_v0 }
 0x60e   :  { %9352 = vmatmul.mubr.f32.vlgmr.msra.gmra.mrb[2].mxu0 %v1186_v49 }
 0x60f   :  { %10358 = vmatpush3.bf16.msra.mxu0 %v11119_v11  ;;  %9428 = vmatprep.mubr.msk.f32.mxu0 %vm11056_vm1, %v11057_v4 }
 0x610   :  { %10359 = vmatprep.subr.bf16.mxu0 %v11055_v0 }
 0x613   :  { %10361 = vmatpush3.bf16.msra.mxu0 %v11122_v16 }
 0x614   :  { %10362 = vmatprep.subr.bf16.mxu0 %v11055_v0 }
 0x6e1   :  { %v1598_v55 = vpop.f32.mrb[2].mxu0 }
 0x6e2   :  { %v1609_v56 = vadd.f32 %v1598_v55, %v11188_v43  ;;  %v9353_v57 = vpop.f32.mrb[3].mxu0  ;;  %v1602_v59 = vadd.f32 %v8620_v58, %v1598_v55 }
 0x6e4   :  { %1611 = vrot.lane.b32.xlu0 %v1609_v56, %s11058_s30  ;;  %v8621_v60 = vmul.f32 -1.442695, %v1602_v59 }
 0x6e6   :  { %10969 = vpow2.f32 %v8621_v60 }
 0x6e8   :  { %1634 = vperm.xlu0 %10956, %v1632_v63  }
 0x6f0   :  { %v10970_v61 = vpop.eup %10969 }
 0x6f1   :  { %v1606_v62 = vadd.f32 1.0, %v10970_v61 }
 0x6f3   :  { %10971 = vrcp.f32 %v1606_v62 }
 0x6fd   :  { %v10972_v1 = vpop.eup %10971 }
 0x6fe   :  { %v1621_v9 = vsub.f32 1.0, %v10972_v1  ;;  %v1627_v13 = vmul.f32 %v10972_v1, %v11259_v45 }
 0x756   :  { %v1612_v2 = vpop.permute.xlu0 %1611 }
 0x757   :  { %v1614_v3 = vmul.f32 %v10972_v1, %v1612_v2 }
 0x759   :  { %1616 = vrot.lane.b32.xlu1 %v1614_v3, %s11058_s30 }
 0x767   :  { %v1635_v10 = vpop.permute.xlu0 %1634 }
 0x768   :  { %vm1636_vm7 = vcmp.eq.s32.totalorder %v1635_v10, 1 }
 0x7cb   :  { %v1617_v5 = vpop.permute.xlu1 %1616 }
 0x7cc   :  { %v1619_v7 = vadd.f32 %v8620_v58, %v1617_v5 }
 0x7ce   :  { %10973 = vtanh.f32 %v1619_v7 }
 0x7d8   :  { %v10974_v8 = vpop.eup %10973 }
 0x7d9   :  { %1623 = vrot.lane.b32.xlu1 %v10974_v8, %s11061_s11  ;;  %v2702_v8 = vsel %vm8630_vm10, 1, %v11059_v42 }
 0x84b   :  { %v1624_v12 = vpop.permute.xlu1 %1623 }
 0x84c   :  { %v1626_v14 = vmul.f32 %v1624_v12, %v1621_v9  ;;  %v8628_v9 = vld [vmem:[%s12111_s0 + $0x20] sm:$0xff] }
 0x84e   :  { %v1628_v15 = vadd.f32 %v1627_v13, %v1626_v14 }
 0x850   :  { %v11312_v17 = vsel %vm1636_vm7, %v1628_v15, 0.0  ;;  %v11315_v18 = vsel %vm1636_vm7, %v1628_v15, %v11259_v45 }
 0x851   :  { %1648 = vrot.lane.b32.xlu1 %v11315_v18, %s11061_s11 }
 0x8c3   :  { %v1649_v19 = vpop.permute.xlu1 %1648 }
 0x8c4   :  { %v1650_v20 = vsel %vm23_vm0, %v1649_v19, 0 }
 0x8c5   :  { %v1721_v21 = vand.u32 4294901760, %v1650_v20 }
 0x8c7   :  { %v1722_v22 = vsub.f32 %v1650_v20, %v1721_v21 }
 0x8c9   :  { %v1723_v23 = vand.u32 4294901760, %v1722_v22 }
 0x8cb   :  { %v1724_v24 = vsub.f32 %v1722_v22, %v1723_v23 }
 0x8cd   :  { %v1725_v25 = vand.u32 4294901760, %v1724_v24 }
 0x8cf   :  { %9363 = vmatmul.mubr.f32.vlgmr.msra.gmra.mrb[2].mxu1 %v1725_v25 }
 0x8d0   :  { %10328 = vmatpush3.bf16.msra.mxu1 %v11138_v33  ;;  %9373 = vmatprep.mubr.msk.f32.mxu1 %vm11056_vm1, %v11057_v4 }
 0x8d1   :  { %10329 = vmatprep.subr.bf16.mxu1 %v11055_v0 }
 0x8d4   :  { %10331 = vmatpush3.bf16.msra.mxu1 %v11141_v37 }
 0x8d5   :  { %10332 = vmatprep.subr.bf16.mxu1 %v11055_v0 }
 0x8d7   :  { %9374 = vmatmul.mubr.f32.vlgmr.msra.gmra.mrb[2].mxu1 %v1721_v21 }
 0x8d8   :  { %10334 = vmatpush3.bf16.msra.mxu1 %v11147_v38  ;;  %9384 = vmatprep.mubr.msk.f32.mxu1 %vm11056_vm1, %v11057_v4 }
 0x8d9   :  { %10335 = vmatprep.subr.bf16.mxu1 %v11055_v0 }
 0x8dc   :  { %10337 = vmatpush3.bf16.msra.mxu1 %v11151_v39 }
 0x8dd   :  { %10338 = vmatprep.subr.bf16.mxu1 %v11055_v0 }
 0x8df   :  { %9385 = vmatmul.mubr.f32.vlgmr.msra.gmra.mrb[2].mxu1 %v1722_v22 }
 0x8e0   :  { %10340 = vmatpush3.bf16.msra.mxu1 %v11119_v11  ;;  %9395 = vmatprep.mubr.msk.f32.mxu1 %vm11056_vm1, %v11057_v4 }
 0x8e1   :  { %10341 = vmatprep.subr.bf16.mxu1 %v11055_v0 }
 0x8e4   :  { %10343 = vmatpush3.bf16.msra.mxu1 %v11122_v16 }
 0x8e5   :  { %10344 = vmatprep.subr.bf16.mxu1 %v11055_v0 }
 0x8e7   :  { %9396 = vmatmul.mubr.f32.vlgmr.msra.gmra.mrb[2].mxu1 %v1723_v23 }
 0x8e8   :  { %10346 = vmatpush3.bf16.msra.mxu1 %v11163_v40  ;;  %9406 = vmatprep.mubr.msk.f32.mxu1 %vm11056_vm1, %v11057_v4 }
 0x8e9   :  { %10347 = vmatprep.subr.bf16.mxu1 %v11055_v0 }
 0x8ec   :  { %10349 = vmatpush3.bf16.msra.mxu1 %v11167_v41 }
 0x8ed   :  { %10350 = vmatprep.subr.bf16.mxu1 %v11055_v0 }
 0x8ef   :  { %9407 = vmatmul.mubr.f32.vlgmr.msra.gmra.mrb[2].mxu1 %v1721_v21 }
 0x8f0   :  { %10352 = vmatpush3.bf16.msra.mxu1 %v11119_v11  ;;  %9417 = vmatprep.mubr.msk.f32.mxu1 %vm11056_vm1, %v11057_v4 }
 0x8f1   :  { %10353 = vmatprep.subr.bf16.mxu1 %v11055_v0 }
 0x8f4   :  { %10355 = vmatpush3.bf16.msra.mxu1 %v11122_v16 }
 0x8f5   :  { %10392 = vmatprep.subr.bf16.mxu1 %v11055_v0 }
 0x8f7   :  { %9418 = vmatmul.mubr.f32.vlgmr.msra.gmra.mrb[2].mxu1 %v1721_v21 }
 0x8f8   :  { %10394 = vmatpush3.bf16.msra.mxu1 %v11119_v11  ;;  %9494 = vmatprep.mubr.msk.f32.mxu1 %vm11056_vm1, %v11057_v4 }
 0x8f9   :  { %10395 = vmatprep.subr.bf16.mxu1 %v11055_v0 }
 0x8fc   :  { %10397 = vmatpush3.bf16.msra.mxu1 %v11122_v16 }
 0x8fd   :  { %10398 = vmatprep.subr.bf16.mxu1 %v11055_v0 }
 0x9ca   :  { %v2133_v26 = vpop.f32.mrb[2].mxu1 }
 0x9cb   :  { %v2144_v27 = vadd.f32 %v2133_v26, %v11188_v43  ;;  %v9419_v28 = vpop.f32.mrb[3].mxu1  ;;  %v2137_v31 = vadd.f32 %v8624_v30, %v2133_v26 }
 0x9cd   :  { %2146 = vrot.lane.b32.xlu0 %v2144_v27, %s11058_s30  ;;  %v8625_v32 = vmul.f32 -1.442695, %v2137_v31 }
 0x9cf   :  { %10975 = vpow2.f32 %v8625_v32 }
 0x9d1   :  { %2169 = vperm.xlu0 %10956, %v2167_v29  }
 0x9d9   :  { %v10976_v34 = vpop.eup %10975 }
 0x9da   :  { %v2141_v35 = vadd.f32 1.0, %v10976_v34 }
 0x9dc   :  { %10977 = vrcp.f32 %v2141_v35 }
 0x9e6   :  { %v10978_v36 = vpop.eup %10977 }
 0x9e7   :  { %v2156_v50 = vsub.f32 1.0, %v10978_v36  ;;  %v2162_v54 = vmul.f32 %v10978_v36, %v11315_v18 }
 0xa3f   :  { %v2147_v44 = vpop.permute.xlu0 %2146 }
 0xa40   :  { %v2149_v45 = vmul.f32 %v10978_v36, %v2147_v44 }
 0xa42   :  { %2151 = vrot.lane.b32.xlu1 %v2149_v45, %s11058_s30 }
 0xa50   :  { %v2170_v53 = vpop.permute.xlu0 %2169 }
 0xa51   :  { %vm2171_vm9 = vcmp.eq.s32.totalorder %v2170_v53, 1 }
 0xab4   :  { %v2152_v47 = vpop.permute.xlu1 %2151 }
 0xab5   :  { %v2154_v48 = vadd.f32 %v8624_v30, %v2152_v47 }
 0xab7   :  { %10979 = vtanh.f32 %v2154_v48 }
 0xac1   :  { %v10980_v49 = vpop.eup %10979 }
 0xac2   :  { %2158 = vrot.lane.b32.xlu1 %v10980_v49, %s11061_s11 }
 0xb34   :  { %v2159_v51 = vpop.permute.xlu1 %2158 }
 0xb35   :  { %v2161_v55 = vmul.f32 %v2159_v51, %v2156_v50  ;;  %v3237_v50 = vsel %vm8634_vm12, 1, %v11059_v42  ;;  %v8632_v51 = vld [vmem:[%s12111_s0 + $0x28] sm:$0xff] }
 0xb37   :  { %v2163_v56 = vadd.f32 %v2162_v54, %v2161_v55 }
 0xb39   :  { %v11367_v57 = vsel %vm2171_vm9, %v2163_v56, %v11315_v18  ;;  %v11369_v58 = vsel %vm2171_vm9, %v2163_v56, 0.0 }
 0xb3a   :  { %2183 = vrot.lane.b32.xlu0 %v11367_v57, %s11061_s11 }
 0xbac   :  { %v2184_v59 = vpop.permute.xlu0 %2183 }
 0xbad   :  { %v2185_v60 = vsel %vm23_vm0, %v2184_v59, 0 }
 0xbae   :  { %v2256_v61 = vand.u32 4294901760, %v2185_v60 }
 0xbb0   :  { %v2257_v62 = vsub.f32 %v2185_v60, %v2256_v61 }
 0xbb2   :  { %v2258_v63 = vand.u32 4294901760, %v2257_v62 }
 0xbb4   :  { %v2259_v1 = vsub.f32 %v2257_v62, %v2258_v63 }
 0xbb6   :  { %v2260_v2 = vand.u32 4294901760, %v2259_v1 }
 0xbb8   :  { %9429 = vmatmul.mubr.f32.vlgmr.msra.gmra.mrb[4].mxu0 %v2260_v2 }
 0xbb9   :  { %10364 = vmatpush3.bf16.msra.mxu0 %v11138_v33  ;;  %9439 = vmatprep.mubr.msk.f32.mxu0 %vm11056_vm1, %v11057_v4 }
 0xbba   :  { %10365 = vmatprep.subr.bf16.mxu0 %v11055_v0 }
 0xbbd   :  { %10367 = vmatpush3.bf16.msra.mxu0 %v11141_v37 }
 0xbbe   :  { %10368 = vmatprep.subr.bf16.mxu0 %v11055_v0 }
 0xbc0   :  { %9440 = vmatmul.mubr.f32.vlgmr.msra.gmra.mrb[4].mxu0 %v2256_v61 }
 0xbc1   :  { %10370 = vmatpush3.bf16.msra.mxu0 %v11147_v38  ;;  %9450 = vmatprep.mubr.msk.f32.mxu0 %vm11056_vm1, %v11057_v4 }
 0xbc2   :  { %10371 = vmatprep.subr.bf16.mxu0 %v11055_v0 }
 0xbc5   :  { %10373 = vmatpush3.bf16.msra.mxu0 %v11151_v39 }
 0xbc6   :  { %10374 = vmatprep.subr.bf16.mxu0 %v11055_v0 }
 0xbc8   :  { %9451 = vmatmul.mubr.f32.vlgmr.msra.gmra.mrb[4].mxu0 %v2257_v62 }
 0xbc9   :  { %10376 = vmatpush3.bf16.msra.mxu0 %v11119_v11  ;;  %9461 = vmatprep.mubr.msk.f32.mxu0 %vm11056_vm1, %v11057_v4 }
 0xbca   :  { %10377 = vmatprep.subr.bf16.mxu0 %v11055_v0 }
 0xbcd   :  { %10379 = vmatpush3.bf16.msra.mxu0 %v11122_v16 }
 0xbce   :  { %10380 = vmatprep.subr.bf16.mxu0 %v11055_v0 }
 0xbd0   :  { %9462 = vmatmul.mubr.f32.vlgmr.msra.gmra.mrb[4].mxu0 %v2258_v63 }
 0xbd1   :  { %10382 = vmatpush3.bf16.msra.mxu0 %v11163_v40  ;;  %9472 = vmatprep.mubr.msk.f32.mxu0 %vm11056_vm1, %v11057_v4 }
 0xbd2   :  { %10383 = vmatprep.subr.bf16.mxu0 %v11055_v0 }
 0xbd5   :  { %10385 = vmatpush3.bf16.msra.mxu0 %v11167_v41 }
 0xbd6   :  { %10386 = vmatprep.subr.bf16.mxu0 %v11055_v0 }
 0xbd8   :  { %9473 = vmatmul.mubr.f32.vlgmr.msra.gmra.mrb[4].mxu0 %v2256_v61 }
 0xbd9   :  { %10388 = vmatpush3.bf16.msra.mxu0 %v11119_v11  ;;  %9483 = vmatprep.mubr.msk.f32.mxu0 %vm11056_vm1, %v11057_v4 }
 0xbda   :  { %10389 = vmatprep.subr.bf16.mxu0 %v11055_v0 }
 0xbdd   :  { %10391 = vmatpush3.bf16.msra.mxu0 %v11122_v16 }
 0xbde   :  { %10428 = vmatprep.subr.bf16.mxu0 %v11055_v0 }
 0xbe0   :  { %9484 = vmatmul.mubr.f32.vlgmr.msra.gmra.mrb[4].mxu0 %v2256_v61 }
 0xbe1   :  { %10430 = vmatpush3.bf16.msra.mxu0 %v11119_v11  ;;  %9560 = vmatprep.mubr.msk.f32.mxu0 %vm11056_vm1, %v11057_v4 }
 0xbe2   :  { %10431 = vmatprep.subr.bf16.mxu0 %v11055_v0 }
 0xbe5   :  { %10433 = vmatpush3.bf16.msra.mxu0 %v11122_v16 }
 0xbe6   :  { %10434 = vmatprep.subr.bf16.mxu0 %v11055_v0 }
 0xcb3   :  { %v2668_v3 = vpop.f32.mrb[4].mxu0 }
 0xcb4   :  { %v2679_v5 = vadd.f32 %v2668_v3, %v11188_v43  ;;  %v9485_v7 = vpop.f32.mrb[5].mxu0  ;;  %v2672_v10 = vadd.f32 %v8628_v9, %v2668_v3 }
 0xcb6   :  { %2681 = vrot.lane.b32.xlu1 %v2679_v5, %s11058_s30  ;;  %v8629_v12 = vmul.f32 -1.442695, %v2672_v10 }
 0xcb8   :  { %10981 = vpow2.f32 %v8629_v12 }
 0xcba   :  { %2704 = vperm.xlu1 %10955, %v2702_v8  }
 0xcc2   :  { %v10982_v13 = vpop.eup %10981 }
 0xcc3   :  { %v2676_v14 = vadd.f32 1.0, %v10982_v13 }
 0xcc5   :  { %10983 = vrcp.f32 %v2676_v14 }
 0xccf   :  { %v10984_v15 = vpop.eup %10983 }
 0xcd0   :  { %v2691_v23 = vsub.f32 1.0, %v10984_v15  ;;  %v2697_v26 = vmul.f32 %v10984_v15, %v11367_v57 }
 0xd28   :  { %v2682_v18 = vpop.permute.xlu1 %2681 }
 0xd29   :  { %v2684_v19 = vmul.f32 %v10984_v15, %v2682_v18 }
 0xd2b   :  { %2686 = vrot.lane.b32.xlu0 %v2684_v19, %s11058_s30 }
 0xd39   :  { %v2705_v25 = vpop.permute.xlu1 %2704 }
 0xd3a   :  { %vm2706_vm11 = vcmp.eq.s32.totalorder %v2705_v25, 1  ;;  %v8636_v25 = vld [vmem:[%s12111_s0 + $0x30] sm:$0xff] }
 0xd9d   :  { %v2687_v20 = vpop.permute.xlu0 %2686 }
 0xd9e   :  { %v2689_v21 = vadd.f32 %v8628_v9, %v2687_v20 }
 0xda0   :  { %10985 = vtanh.f32 %v2689_v21 }
 0xdaa   :  { %v10986_v22 = vpop.eup %10985 }
 0xdab   :  { %2693 = vrot.lane.b32.xlu0 %v10986_v22, %s11061_s11 }
 0xe1d   :  { %v2694_v24 = vpop.permute.xlu0 %2693 }
 0xe1e   :  { %v2696_v27 = vmul.f32 %v2694_v24, %v2691_v23  ;;  %v3772_v24 = vsel %vm8638_vm14, 1, %v11059_v42 }
 0xe20   :  { %v2698_v28 = vadd.f32 %v2697_v26, %v2696_v27 }
 0xe22   :  { %v11421_v29 = vsel %vm2706_vm11, %v2698_v28, %v11367_v57  ;;  %v11423_v30 = vsel %vm2706_vm11, %v2698_v28, 0.0 }
 0xe23   :  { %2718 = vrot.lane.b32.xlu1 %v11421_v29, %s11061_s11 }
 0xe95   :  { %v2719_v31 = vpop.permute.xlu1 %2718 }
 0xe96   :  { %v2720_v32 = vsel %vm23_vm0, %v2719_v31, 0 }
 0xe97   :  { %v2791_v34 = vand.u32 4294901760, %v2720_v32 }
 0xe99   :  { %v2792_v35 = vsub.f32 %v2720_v32, %v2791_v34 }
 0xe9b   :  { %v2793_v36 = vand.u32 4294901760, %v2792_v35 }
 0xe9d   :  { %v2794_v44 = vsub.f32 %v2792_v35, %v2793_v36 }
 0xe9f   :  { %v2795_v45 = vand.u32 4294901760, %v2794_v44 }
 0xea1   :  { %9495 = vmatmul.mubr.f32.vlgmr.msra.gmra.mrb[4].mxu1 %v2795_v45 }
 0xea2   :  { %10400 = vmatpush3.bf16.msra.mxu1 %v11138_v33  ;;  %9505 = vmatprep.mubr.msk.f32.mxu1 %vm11056_vm1, %v11057_v4 }
 0xea3   :  { %10401 = vmatprep.subr.bf16.mxu1 %v11055_v0 }
 0xea6   :  { %10403 = vmatpush3.bf16.msra.mxu1 %v11141_v37 }
 0xea7   :  { %10404 = vmatprep.subr.bf16.mxu1 %v11055_v0 }
 0xea9   :  { %9506 = vmatmul.mubr.f32.vlgmr.msra.gmra.mrb[4].mxu1 %v2791_v34 }
 0xeaa   :  { %10406 = vmatpush3.bf16.msra.mxu1 %v11147_v38  ;;  %9516 = vmatprep.mubr.msk.f32.mxu1 %vm11056_vm1, %v11057_v4 }
 0xeab   :  { %10407 = vmatprep.subr.bf16.mxu1 %v11055_v0 }
 0xeae   :  { %10409 = vmatpush3.bf16.msra.mxu1 %v11151_v39 }
 0xeaf   :  { %10410 = vmatprep.subr.bf16.mxu1 %v11055_v0 }
 0xeb1   :  { %9517 = vmatmul.mubr.f32.vlgmr.msra.gmra.mrb[4].mxu1 %v2792_v35 }
 0xeb2   :  { %10412 = vmatpush3.bf16.msra.mxu1 %v11119_v11  ;;  %9527 = vmatprep.mubr.msk.f32.mxu1 %vm11056_vm1, %v11057_v4 }
 0xeb3   :  { %10413 = vmatprep.subr.bf16.mxu1 %v11055_v0 }
 0xeb6   :  { %10415 = vmatpush3.bf16.msra.mxu1 %v11122_v16 }
 0xeb7   :  { %10416 = vmatprep.subr.bf16.mxu1 %v11055_v0 }
 0xeb9   :  { %9528 = vmatmul.mubr.f32.vlgmr.msra.gmra.mrb[4].mxu1 %v2793_v36 }
 0xeba   :  { %10418 = vmatpush3.bf16.msra.mxu1 %v11163_v40  ;;  %9538 = vmatprep.mubr.msk.f32.mxu1 %vm11056_vm1, %v11057_v4 }
 0xebb   :  { %10419 = vmatprep.subr.bf16.mxu1 %v11055_v0 }
 0xebe   :  { %10421 = vmatpush3.bf16.msra.mxu1 %v11167_v41 }
 0xebf   :  { %10422 = vmatprep.subr.bf16.mxu1 %v11055_v0 }
 0xec1   :  { %9539 = vmatmul.mubr.f32.vlgmr.msra.gmra.mrb[4].mxu1 %v2791_v34 }
 0xec2   :  { %10424 = vmatpush3.bf16.msra.mxu1 %v11119_v11  ;;  %9549 = vmatprep.mubr.msk.f32.mxu1 %vm11056_vm1, %v11057_v4 }
 0xec3   :  { %10425 = vmatprep.subr.bf16.mxu1 %v11055_v0 }
 0xec6   :  { %10427 = vmatpush3.bf16.msra.mxu1 %v11122_v16 }
 0xec7   :  { %10464 = vmatprep.subr.bf16.mxu1 %v11055_v0 }
 0xec9   :  { %9550 = vmatmul.mubr.f32.vlgmr.msra.gmra.mrb[4].mxu1 %v2791_v34 }
 0xeca   :  { %10466 = vmatpush3.bf16.msra.mxu1 %v11119_v11  ;;  %9626 = vmatprep.mubr.msk.f32.mxu1 %vm11056_vm1, %v11057_v4 }
 0xecb   :  { %10467 = vmatprep.subr.bf16.mxu1 %v11055_v0 }
 0xece   :  { %10469 = vmatpush3.bf16.msra.mxu1 %v11122_v16 }
 0xecf   :  { %10470 = vmatprep.subr.bf16.mxu1 %v11055_v0 }
 0xf9c   :  { %v3203_v47 = vpop.f32.mrb[4].mxu1 }
 0xf9d   :  { %v3214_v48 = vadd.f32 %v3203_v47, %v11188_v43  ;;  %v9551_v49 = vpop.f32.mrb[5].mxu1  ;;  %v3207_v53 = vadd.f32 %v8632_v51, %v3203_v47 }
 0xf9f   :  { %3216 = vrot.lane.b32.xlu0 %v3214_v48, %s11058_s30  ;;  %v8633_v54 = vmul.f32 -1.442695, %v3207_v53 }
 0xfa1   :  { %10987 = vpow2.f32 %v8633_v54 }
 0xfa3   :  { %3239 = vperm.xlu0 %10956, %v3237_v50  }
 0xfab   :  { %v10988_v55 = vpop.eup %10987 }
 0xfac   :  { %v3211_v56 = vadd.f32 1.0, %v10988_v55 }
 0xfae   :  { %10989 = vrcp.f32 %v3211_v56 }
 0xfb8   :  { %v10990_v57 = vpop.eup %10989 }
 0xfb9   :  { %v3226_v1 = vsub.f32 1.0, %v10990_v57  ;;  %v3232_v5 = vmul.f32 %v10990_v57, %v11421_v29 }
0x1011   :  { %v3217_v59 = vpop.permute.xlu0 %3216 }
0x1012   :  { %v3219_v60 = vmul.f32 %v10990_v57, %v3217_v59 }
0x1014   :  { %3221 = vrot.lane.b32.xlu1 %v3219_v60, %s11058_s30 }
0x1022   :  { %v3240_v3 = vpop.permute.xlu0 %3239 }
0x1023   :  { %vm3241_vm13 = vcmp.eq.s32.totalorder %v3240_v3, 1 }
0x1086   :  { %v3222_v61 = vpop.permute.xlu1 %3221 }
0x1087   :  { %v3224_v62 = vadd.f32 %v8632_v51, %v3222_v61 }
0x1089   :  { %10991 = vtanh.f32 %v3224_v62 }
0x1093   :  { %v10992_v63 = vpop.eup %10991 }
0x1094   :  { %3228 = vrot.lane.b32.xlu1 %v10992_v63, %s11061_s11 }
0x1106   :  { %v3229_v2 = vpop.permute.xlu1 %3228 }
0x1107   :  { %v3231_v7 = vmul.f32 %v3229_v2, %v3226_v1  ;;  %v11576_v2 = vld [vmem:[%s12112_s3] sm:$0xff] }
0x1108   :  { %vm8642_vm2 = vcmp.gt.s32.totalorder %v11576_v2, 7  ;;  %vm8646_vm4 = vcmp.gt.s32.totalorder %v11576_v2, 8  ;;  %vm8650_vm6 = vcmp.gt.s32.totalorder %v11576_v2, 9  ;;  %vm8654_vm8 = vcmp.gt.s32.totalorder %v11576_v2, 10 }
0x1109   :  { %v3233_v8 = vadd.f32 %v3232_v5, %v3231_v7  ;;  %v4307_v3 = vsel %vm8642_vm2, 1, %v11059_v42  ;;  %v8640_v5 = vld [vmem:[%s12111_s0 + $0x38] sm:$0xff]  ;;  %vm8658_vm10 = vcmp.gt.s32.totalorder %v11576_v2, 11  ;;  %vm8662_vm12 = vcmp.gt.s32.totalorder %v11576_v2, 12 }
0x110a   :  { %vm8666_vm14 = vcmp.gt.s32.totalorder %v11576_v2, 13 }
0x110b   :  { %v11475_v9 = vsel %vm3241_vm13, %v3233_v8, %v11421_v29  ;;  %v11477_v10 = vsel %vm3241_vm13, %v3233_v8, 0.0 }
0x110c   :  { %3253 = vrot.lane.b32.xlu0 %v11475_v9, %s11061_s11 }
0x117e   :  { %v3254_v12 = vpop.permute.xlu0 %3253 }
0x117f   :  { %v3255_v13 = vsel %vm23_vm0, %v3254_v12, 0 }
0x1180   :  { %v3326_v14 = vand.u32 4294901760, %v3255_v13 }
0x1182   :  { %v3327_v15 = vsub.f32 %v3255_v13, %v3326_v14 }
0x1184   :  { %v3328_v18 = vand.u32 4294901760, %v3327_v15 }
0x1186   :  { %v3329_v19 = vsub.f32 %v3327_v15, %v3328_v18 }
0x1188   :  { %v3330_v20 = vand.u32 4294901760, %v3329_v19 }
0x118a   :  { %9561 = vmatmul.mubr.f32.vlgmr.msra.gmra.mrb[6].mxu0 %v3330_v20 }
0x118b   :  { %10436 = vmatpush3.bf16.msra.mxu0 %v11138_v33  ;;  %9571 = vmatprep.mubr.msk.f32.mxu0 %vm11056_vm1, %v11057_v4 }
0x118c   :  { %10437 = vmatprep.subr.bf16.mxu0 %v11055_v0 }
0x118f   :  { %10439 = vmatpush3.bf16.msra.mxu0 %v11141_v37 }
0x1190   :  { %10440 = vmatprep.subr.bf16.mxu0 %v11055_v0 }
0x1192   :  { %9572 = vmatmul.mubr.f32.vlgmr.msra.gmra.mrb[6].mxu0 %v3326_v14 }
0x1193   :  { %10442 = vmatpush3.bf16.msra.mxu0 %v11147_v38  ;;  %9582 = vmatprep.mubr.msk.f32.mxu0 %vm11056_vm1, %v11057_v4 }
0x1194   :  { %10443 = vmatprep.subr.bf16.mxu0 %v11055_v0 }
0x1197   :  { %10445 = vmatpush3.bf16.msra.mxu0 %v11151_v39 }
0x1198   :  { %10446 = vmatprep.subr.bf16.mxu0 %v11055_v0 }
0x119a   :  { %9583 = vmatmul.mubr.f32.vlgmr.msra.gmra.mrb[6].mxu0 %v3327_v15 }
0x119b   :  { %10448 = vmatpush3.bf16.msra.mxu0 %v11119_v11  ;;  %9593 = vmatprep.mubr.msk.f32.mxu0 %vm11056_vm1, %v11057_v4 }
0x119c   :  { %10449 = vmatprep.subr.bf16.mxu0 %v11055_v0 }
0x119f   :  { %10451 = vmatpush3.bf16.msra.mxu0 %v11122_v16 }
0x11a0   :  { %10452 = vmatprep.subr.bf16.mxu0 %v11055_v0 }
0x11a2   :  { %9594 = vmatmul.mubr.f32.vlgmr.msra.gmra.mrb[6].mxu0 %v3328_v18 }
0x11a3   :  { %10454 = vmatpush3.bf16.msra.mxu0 %v11163_v40  ;;  %9604 = vmatprep.mubr.msk.f32.mxu0 %vm11056_vm1, %v11057_v4 }
0x11a4   :  { %10455 = vmatprep.subr.bf16.mxu0 %v11055_v0 }
0x11a7   :  { %10457 = vmatpush3.bf16.msra.mxu0 %v11167_v41 }
0x11a8   :  { %10458 = vmatprep.subr.bf16.mxu0 %v11055_v0 }
0x11aa   :  { %9605 = vmatmul.mubr.f32.vlgmr.msra.gmra.mrb[6].mxu0 %v3326_v14 }
0x11ab   :  { %10460 = vmatpush3.bf16.msra.mxu0 %v11119_v11  ;;  %9615 = vmatprep.mubr.msk.f32.mxu0 %vm11056_vm1, %v11057_v4 }
0x11ac   :  { %10461 = vmatprep.subr.bf16.mxu0 %v11055_v0 }
0x11af   :  { %10463 = vmatpush3.bf16.msra.mxu0 %v11122_v16 }
0x11b0   :  { %10500 = vmatprep.subr.bf16.mxu0 %v11055_v0 }
0x11b2   :  { %9616 = vmatmul.mubr.f32.vlgmr.msra.gmra.mrb[6].mxu0 %v3326_v14 }
0x11b3   :  { %10502 = vmatpush3.bf16.msra.mxu0 %v11119_v11  ;;  %9692 = vmatprep.mubr.msk.f32.mxu0 %vm11056_vm1, %v11057_v4 }
0x11b4   :  { %10503 = vmatprep.subr.bf16.mxu0 %v11055_v0 }
0x11b7   :  { %10505 = vmatpush3.bf16.msra.mxu0 %v11122_v16 }
0x11b8   :  { %10506 = vmatprep.subr.bf16.mxu0 %v11055_v0 }
0x1285   :  { %v3738_v21 = vpop.f32.mrb[6].mxu0 }
0x1286   :  { %v3749_v22 = vadd.f32 %v3738_v21, %v11188_v43  ;;  %v9617_v23 = vpop.f32.mrb[7].mxu0  ;;  %v3742_v26 = vadd.f32 %v8636_v25, %v3738_v21 }
0x1288   :  { %3751 = vrot.lane.b32.xlu1 %v3749_v22, %s11058_s30  ;;  %v8637_v27 = vmul.f32 -1.442695, %v3742_v26 }
0x128a   :  { %10993 = vpow2.f32 %v8637_v27 }
0x128c   :  { %3774 = vperm.xlu1 %10955, %v3772_v24  }
0x1294   :  { %v10994_v28 = vpop.eup %10993 }
0x1295   :  { %v3746_v29 = vadd.f32 1.0, %v10994_v28 }
0x1297   :  { %10995 = vrcp.f32 %v3746_v29 }
0x12a1   :  { %v10996_v31 = vpop.eup %10995 }
0x12a2   :  { %v3761_v44 = vsub.f32 1.0, %v10996_v31  ;;  %v3767_v48 = vmul.f32 %v10996_v31, %v11475_v9 }
0x12fa   :  { %v3752_v32 = vpop.permute.xlu1 %3751 }
0x12fb   :  { %v3754_v34 = vmul.f32 %v10996_v31, %v3752_v32 }
0x12fd   :  { %3756 = vrot.lane.b32.xlu0 %v3754_v34, %s11058_s30 }
0x130b   :  { %v3775_v47 = vpop.permute.xlu1 %3774 }
0x130c   :  { %vm3776_vm15 = vcmp.eq.s32.totalorder %v3775_v47, 1 }
0x136f   :  { %v3757_v52 = vpop.permute.xlu0 %3756 }
0x1370   :  { %v3759_v35 = vadd.f32 %v8636_v25, %v3757_v52 }
0x1372   :  { %10997 = vtanh.f32 %v3759_v35 }
0x137c   :  { %v10998_v36 = vpop.eup %10997 }
0x137d   :  { %3763 = vrot.lane.b32.xlu0 %v10998_v36, %s11061_s11 }
0x13ef   :  { %v3764_v45 = vpop.permute.xlu0 %3763 }
0x13f0   :  { %v3766_v49 = vmul.f32 %v3764_v45, %v3761_v44 }
0x13f2   :  { %v3768_v50 = vadd.f32 %v3767_v48, %v3766_v49  ;;  %v4842_v48 = vsel %vm8646_vm4, 1, %v11059_v42  ;;  %v8644_v49 = vld [vmem:[%s12111_s0 + $0x40] sm:$0xff] }
0x13f4   :  { %v11529_v51 = vsel %vm3776_vm15, %v3768_v50, %v11475_v9  ;;  %v11531_v53 = vsel %vm3776_vm15, %v3768_v50, 0.0 }
0x13f5   :  { %3788 = vrot.lane.b32.xlu1 %v11529_v51, %s11061_s11 }
0x1467   :  { %v3789_v54 = vpop.permute.xlu1 %3788 }
0x1468   :  { %v3790_v55 = vsel %vm23_vm0, %v3789_v54, 0 }
0x1469   :  { %v3861_v56 = vand.u32 4294901760, %v3790_v55 }
0x146b   :  { %v3862_v57 = vsub.f32 %v3790_v55, %v3861_v56 }
0x146d   :  { %v3863_v59 = vand.u32 4294901760, %v3862_v57 }
0x146f   :  { %v3864_v60 = vsub.f32 %v3862_v57, %v3863_v59 }
0x1471   :  { %v3865_v61 = vand.u32 4294901760, %v3864_v60 }
0x1473   :  { %9627 = vmatmul.mubr.f32.vlgmr.msra.gmra.mrb[6].mxu1 %v3865_v61 }
0x1474   :  { %10472 = vmatpush3.bf16.msra.mxu1 %v11138_v33  ;;  %9637 = vmatprep.mubr.msk.f32.mxu1 %vm11056_vm1, %v11057_v4 }
0x1475   :  { %10473 = vmatprep.subr.bf16.mxu1 %v11055_v0 }
0x1478   :  { %10475 = vmatpush3.bf16.msra.mxu1 %v11141_v37 }
0x1479   :  { %10476 = vmatprep.subr.bf16.mxu1 %v11055_v0 }
0x147b   :  { %9638 = vmatmul.mubr.f32.vlgmr.msra.gmra.mrb[6].mxu1 %v3861_v56 }
0x147c   :  { %10478 = vmatpush3.bf16.msra.mxu1 %v11147_v38  ;;  %9648 = vmatprep.mubr.msk.f32.mxu1 %vm11056_vm1, %v11057_v4 }
0x147d   :  { %10479 = vmatprep.subr.bf16.mxu1 %v11055_v0 }
0x1480   :  { %10481 = vmatpush3.bf16.msra.mxu1 %v11151_v39 }
0x1481   :  { %10482 = vmatprep.subr.bf16.mxu1 %v11055_v0 }
0x1483   :  { %9649 = vmatmul.mubr.f32.vlgmr.msra.gmra.mrb[6].mxu1 %v3862_v57 }
0x1484   :  { %10484 = vmatpush3.bf16.msra.mxu1 %v11119_v11  ;;  %9659 = vmatprep.mubr.msk.f32.mxu1 %vm11056_vm1, %v11057_v4 }
0x1485   :  { %10485 = vmatprep.subr.bf16.mxu1 %v11055_v0 }
0x1488   :  { %10487 = vmatpush3.bf16.msra.mxu1 %v11122_v16 }
0x1489   :  { %10488 = vmatprep.subr.bf16.mxu1 %v11055_v0 }
0x148b   :  { %9660 = vmatmul.mubr.f32.vlgmr.msra.gmra.mrb[6].mxu1 %v3863_v59 }
0x148c   :  { %10490 = vmatpush3.bf16.msra.mxu1 %v11163_v40  ;;  %9670 = vmatprep.mubr.msk.f32.mxu1 %vm11056_vm1, %v11057_v4 }
0x148d   :  { %10491 = vmatprep.subr.bf16.mxu1 %v11055_v0 }
0x1490   :  { %10493 = vmatpush3.bf16.msra.mxu1 %v11167_v41 }
0x1491   :  { %10494 = vmatprep.subr.bf16.mxu1 %v11055_v0 }
0x1493   :  { %9671 = vmatmul.mubr.f32.vlgmr.msra.gmra.mrb[6].mxu1 %v3861_v56 }
0x1494   :  { %10496 = vmatpush3.bf16.msra.mxu1 %v11119_v11  ;;  %9681 = vmatprep.mubr.msk.f32.mxu1 %vm11056_vm1, %v11057_v4 }
0x1495   :  { %10497 = vmatprep.subr.bf16.mxu1 %v11055_v0 }
0x1498   :  { %10499 = vmatpush3.bf16.msra.mxu1 %v11122_v16 }
0x1499   :  { %10536 = vmatprep.subr.bf16.mxu1 %v11055_v0 }
0x149b   :  { %9682 = vmatmul.mubr.f32.vlgmr.msra.gmra.mrb[6].mxu1 %v3861_v56 }
0x149c   :  { %10538 = vmatpush3.bf16.msra.mxu1 %v11119_v11  ;;  %9758 = vmatprep.mubr.msk.f32.mxu1 %vm11056_vm1, %v11057_v4 }
0x149d   :  { %10539 = vmatprep.subr.bf16.mxu1 %v11055_v0 }
0x14a0   :  { %10541 = vmatpush3.bf16.msra.mxu1 %v11122_v16 }
0x14a1   :  { %10542 = vmatprep.subr.bf16.mxu1 %v11055_v0 }
0x156e   :  { %v4273_v62 = vpop.f32.mrb[6].mxu1 }
0x156f   :  { %v4284_v63 = vadd.f32 %v4273_v62, %v11188_v43  ;;  %v9683_v1 = vpop.f32.mrb[7].mxu1  ;;  %v4277_v7 = vadd.f32 %v8640_v5, %v4273_v62 }
0x1571   :  { %4286 = vrot.lane.b32.xlu0 %v4284_v63, %s11058_s30  ;;  %v8641_v8 = vmul.f32 -1.442695, %v4277_v7 }
0x1573   :  { %10999 = vpow2.f32 %v8641_v8 }
0x1575   :  { %4309 = vperm.xlu0 %10956, %v4307_v3  }
0x157d   :  { %v11000_v9 = vpop.eup %10999 }
0x157e   :  { %v4281_v12 = vadd.f32 1.0, %v11000_v9 }
0x1580   :  { %11001 = vrcp.f32 %v4281_v12 }
0x158a   :  { %v11002_v13 = vpop.eup %11001 }
0x158b   :  { %v4296_v21 = vsub.f32 1.0, %v11002_v13  ;;  %v4302_v24 = vmul.f32 %v11002_v13, %v11529_v51 }
0x15e3   :  { %v4287_v14 = vpop.permute.xlu0 %4286 }
0x15e4   :  { %v4289_v15 = vmul.f32 %v11002_v13, %v4287_v14 }
0x15e6   :  { %4291 = vrot.lane.b32.xlu1 %v4289_v15, %s11058_s30 }
0x15f4   :  { %v4310_v23 = vpop.permute.xlu0 %4309 }
0x15f5   :  { %vm4311_vm3 = vcmp.eq.s32.totalorder %v4310_v23, 1 }
0x1658   :  { %v4292_v18 = vpop.permute.xlu1 %4291 }
0x1659   :  { %v4294_v19 = vadd.f32 %v8640_v5, %v4292_v18 }
0x165b   :  { %11003 = vtanh.f32 %v4294_v19 }
0x1665   :  { %v11004_v20 = vpop.eup %11003 }
0x1666   :  { %4298 = vrot.lane.b32.xlu1 %v11004_v20, %s11061_s11 }
0x16d8   :  { %v4299_v22 = vpop.permute.xlu1 %4298 }
0x16d9   :  { %v4301_v25 = vmul.f32 %v4299_v22, %v4296_v21 }
0x16db   :  { %v4303_v26 = vadd.f32 %v4302_v24, %v4301_v25  ;;  %v5377_v25 = vsel %vm8650_vm6, 1, %v11059_v42 }
0x16dd   :  { %v11588_v27 = vsel %vm4311_vm3, %v4303_v26, %v11529_v51  ;;  %v11590_v28 = vsel %vm4311_vm3, %v4303_v26, 0.0  ;;  %v8648_v26 = vld [vmem:[%s12111_s0 + $0x48] sm:$0xff] }
0x16de   :  { %4323 = vrot.lane.b32.xlu0 %v11588_v27, %s11061_s11 }
0x1750   :  { %v4324_v29 = vpop.permute.xlu0 %4323 }
0x1751   :  { %v4325_v31 = vsel %vm23_vm0, %v4324_v29, 0 }
0x1752   :  { %v4396_v32 = vand.u32 4294901760, %v4325_v31 }
0x1754   :  { %v4397_v34 = vsub.f32 %v4325_v31, %v4396_v32 }
0x1756   :  { %v4398_v52 = vand.u32 4294901760, %v4397_v34 }
0x1758   :  { %v4399_v35 = vsub.f32 %v4397_v34, %v4398_v52 }
0x175a   :  { %v4400_v36 = vand.u32 4294901760, %v4399_v35 }
0x175c   :  { %9693 = vmatmul.mubr.f32.vlgmr.msra.gmra.mrb[8].mxu0 %v4400_v36 }
0x175d   :  { %10508 = vmatpush3.bf16.msra.mxu0 %v11138_v33  ;;  %9703 = vmatprep.mubr.msk.f32.mxu0 %vm11056_vm1, %v11057_v4 }
0x175e   :  { %10509 = vmatprep.subr.bf16.mxu0 %v11055_v0 }
0x1761   :  { %10511 = vmatpush3.bf16.msra.mxu0 %v11141_v37 }
0x1762   :  { %10512 = vmatprep.subr.bf16.mxu0 %v11055_v0 }
0x1764   :  { %9704 = vmatmul.mubr.f32.vlgmr.msra.gmra.mrb[8].mxu0 %v4396_v32 }
0x1765   :  { %10514 = vmatpush3.bf16.msra.mxu0 %v11147_v38  ;;  %9714 = vmatprep.mubr.msk.f32.mxu0 %vm11056_vm1, %v11057_v4 }
0x1766   :  { %10515 = vmatprep.subr.bf16.mxu0 %v11055_v0 }
0x1769   :  { %10517 = vmatpush3.bf16.msra.mxu0 %v11151_v39 }
0x176a   :  { %10518 = vmatprep.subr.bf16.mxu0 %v11055_v0 }
0x176c   :  { %9715 = vmatmul.mubr.f32.vlgmr.msra.gmra.mrb[8].mxu0 %v4397_v34 }
0x176d   :  { %10520 = vmatpush3.bf16.msra.mxu0 %v11119_v11  ;;  %9725 = vmatprep.mubr.msk.f32.mxu0 %vm11056_vm1, %v11057_v4 }
0x176e   :  { %10521 = vmatprep.subr.bf16.mxu0 %v11055_v0 }
0x1771   :  { %10523 = vmatpush3.bf16.msra.mxu0 %v11122_v16 }
0x1772   :  { %10524 = vmatprep.subr.bf16.mxu0 %v11055_v0 }
0x1774   :  { %9726 = vmatmul.mubr.f32.vlgmr.msra.gmra.mrb[8].mxu0 %v4398_v52 }
0x1775   :  { %10526 = vmatpush3.bf16.msra.mxu0 %v11163_v40  ;;  %9736 = vmatprep.mubr.msk.f32.mxu0 %vm11056_vm1, %v11057_v4 }
0x1776   :  { %10527 = vmatprep.subr.bf16.mxu0 %v11055_v0 }
0x1779   :  { %10529 = vmatpush3.bf16.msra.mxu0 %v11167_v41 }
0x177a   :  { %10530 = vmatprep.subr.bf16.mxu0 %v11055_v0 }
0x177c   :  { %9737 = vmatmul.mubr.f32.vlgmr.msra.gmra.mrb[8].mxu0 %v4396_v32 }
0x177d   :  { %10532 = vmatpush3.bf16.msra.mxu0 %v11119_v11  ;;  %9747 = vmatprep.mubr.msk.f32.mxu0 %vm11056_vm1, %v11057_v4 }
0x177e   :  { %10533 = vmatprep.subr.bf16.mxu0 %v11055_v0 }
0x1781   :  { %10535 = vmatpush3.bf16.msra.mxu0 %v11122_v16 }
0x1782   :  { %10572 = vmatprep.subr.bf16.mxu0 %v11055_v0 }
0x1784   :  { %9748 = vmatmul.mubr.f32.vlgmr.msra.gmra.mrb[8].mxu0 %v4396_v32 }
0x1785   :  { %10574 = vmatpush3.bf16.msra.mxu0 %v11119_v11  ;;  %9824 = vmatprep.mubr.msk.f32.mxu0 %vm11056_vm1, %v11057_v4 }
0x1786   :  { %10575 = vmatprep.subr.bf16.mxu0 %v11055_v0 }
0x1789   :  { %10577 = vmatpush3.bf16.msra.mxu0 %v11122_v16 }
0x178a   :  { %10578 = vmatprep.subr.bf16.mxu0 %v11055_v0 }
0x1857   :  { %v4808_v44 = vpop.f32.mrb[8].mxu0 }
0x1858   :  { %v4819_v45 = vadd.f32 %v4808_v44, %v11188_v43  ;;  %v9749_v47 = vpop.f32.mrb[9].mxu0  ;;  %v4812_v50 = vadd.f32 %v8644_v49, %v4808_v44 }
0x185a   :  { %4821 = vrot.lane.b32.xlu1 %v4819_v45, %s11058_s30  ;;  %v8645_v51 = vmul.f32 -1.442695, %v4812_v50 }
0x185c   :  { %11005 = vpow2.f32 %v8645_v51 }
0x185e   :  { %4844 = vperm.xlu1 %10955, %v4842_v48  }
0x1866   :  { %v11006_v54 = vpop.eup %11005 }
0x1867   :  { %v4816_v55 = vadd.f32 1.0, %v11006_v54 }
0x1869   :  { %11007 = vrcp.f32 %v4816_v55 }
0x1873   :  { %v11008_v56 = vpop.eup %11007 }
0x1874   :  { %v4831_v63 = vsub.f32 1.0, %v11008_v56  ;;  %v4837_v5 = vmul.f32 %v11008_v56, %v11588_v27 }
0x18cc   :  { %v4822_v57 = vpop.permute.xlu1 %4821 }
0x18cd   :  { %v4824_v59 = vmul.f32 %v11008_v56, %v4822_v57 }
0x18cf   :  { %4826 = vrot.lane.b32.xlu0 %v4824_v59, %s11058_s30 }
0x18dd   :  { %v4845_v3 = vpop.permute.xlu1 %4844 }
0x18de   :  { %vm4846_vm5 = vcmp.eq.s32.totalorder %v4845_v3, 1 }
0x1941   :  { %v4827_v60 = vpop.permute.xlu0 %4826 }
0x1942   :  { %v4829_v61 = vadd.f32 %v8644_v49, %v4827_v60 }
0x1944   :  { %11009 = vtanh.f32 %v4829_v61 }
0x194e   :  { %v11010_v62 = vpop.eup %11009 }
0x194f   :  { %4833 = vrot.lane.b32.xlu0 %v11010_v62, %s11061_s11 }
0x19c1   :  { %v4834_v1 = vpop.permute.xlu0 %4833 }
0x19c2   :  { %v4836_v7 = vmul.f32 %v4834_v1, %v4831_v63 }
0x19c4   :  { %v4838_v8 = vadd.f32 %v4837_v5, %v4836_v7 }
0x19c6   :  { %v11642_v9 = vsel %vm4846_vm5, %v4838_v8, %v11588_v27  ;;  %v11644_v12 = vsel %vm4846_vm5, %v4838_v8, 0.0  ;;  %v5912_v8 = vsel %vm8654_vm8, 1, %v11059_v42 }
0x19c7   :  { %4858 = vrot.lane.b32.xlu1 %v11642_v9, %s11061_s11 }
0x1a39   :  { %v4859_v13 = vpop.permute.xlu1 %4858 }
0x1a3a   :  { %v4860_v14 = vsel %vm23_vm0, %v4859_v13, 0 }
0x1a3b   :  { %v4931_v15 = vand.u32 4294901760, %v4860_v14 }
0x1a3d   :  { %v4932_v18 = vsub.f32 %v4860_v14, %v4931_v15 }
0x1a3f   :  { %v4933_v19 = vand.u32 4294901760, %v4932_v18 }
0x1a41   :  { %v4934_v20 = vsub.f32 %v4932_v18, %v4933_v19 }
0x1a43   :  { %v4935_v21 = vand.u32 4294901760, %v4934_v20 }
0x1a45   :  { %9759 = vmatmul.mubr.f32.vlgmr.msra.gmra.mrb[8].mxu1 %v4935_v21 }
0x1a46   :  { %10544 = vmatpush3.bf16.msra.mxu1 %v11138_v33  ;;  %9769 = vmatprep.mubr.msk.f32.mxu1 %vm11056_vm1, %v11057_v4 }
0x1a47   :  { %10545 = vmatprep.subr.bf16.mxu1 %v11055_v0 }
0x1a4a   :  { %10547 = vmatpush3.bf16.msra.mxu1 %v11141_v37 }
0x1a4b   :  { %10548 = vmatprep.subr.bf16.mxu1 %v11055_v0 }
0x1a4d   :  { %9770 = vmatmul.mubr.f32.vlgmr.msra.gmra.mrb[8].mxu1 %v4931_v15 }
0x1a4e   :  { %10550 = vmatpush3.bf16.msra.mxu1 %v11147_v38  ;;  %9780 = vmatprep.mubr.msk.f32.mxu1 %vm11056_vm1, %v11057_v4 }
0x1a4f   :  { %10551 = vmatprep.subr.bf16.mxu1 %v11055_v0 }
0x1a52   :  { %10553 = vmatpush3.bf16.msra.mxu1 %v11151_v39 }
0x1a53   :  { %10554 = vmatprep.subr.bf16.mxu1 %v11055_v0 }
0x1a55   :  { %9781 = vmatmul.mubr.f32.vlgmr.msra.gmra.mrb[8].mxu1 %v4932_v18 }
0x1a56   :  { %10556 = vmatpush3.bf16.msra.mxu1 %v11119_v11  ;;  %9791 = vmatprep.mubr.msk.f32.mxu1 %vm11056_vm1, %v11057_v4 }
0x1a57   :  { %10557 = vmatprep.subr.bf16.mxu1 %v11055_v0 }
0x1a5a   :  { %10559 = vmatpush3.bf16.msra.mxu1 %v11122_v16 }
0x1a5b   :  { %10560 = vmatprep.subr.bf16.mxu1 %v11055_v0 }
0x1a5d   :  { %9792 = vmatmul.mubr.f32.vlgmr.msra.gmra.mrb[8].mxu1 %v4933_v19 }
0x1a5e   :  { %10562 = vmatpush3.bf16.msra.mxu1 %v11163_v40  ;;  %9802 = vmatprep.mubr.msk.f32.mxu1 %vm11056_vm1, %v11057_v4 }
0x1a5f   :  { %10563 = vmatprep.subr.bf16.mxu1 %v11055_v0 }
0x1a62   :  { %10565 = vmatpush3.bf16.msra.mxu1 %v11167_v41 }
0x1a63   :  { %10566 = vmatprep.subr.bf16.mxu1 %v11055_v0 }
0x1a65   :  { %9803 = vmatmul.mubr.f32.vlgmr.msra.gmra.mrb[8].mxu1 %v4931_v15 }
0x1a66   :  { %10568 = vmatpush3.bf16.msra.mxu1 %v11119_v11  ;;  %9813 = vmatprep.mubr.msk.f32.mxu1 %vm11056_vm1, %v11057_v4 }
0x1a67   :  { %10569 = vmatprep.subr.bf16.mxu1 %v11055_v0 }
0x1a6a   :  { %10571 = vmatpush3.bf16.msra.mxu1 %v11122_v16 }
0x1a6b   :  { %10608 = vmatprep.subr.bf16.mxu1 %v11055_v0 }
0x1a6d   :  { %9814 = vmatmul.mubr.f32.vlgmr.msra.gmra.mrb[8].mxu1 %v4931_v15 }
0x1a6e   :  { %10610 = vmatpush3.bf16.msra.mxu1 %v11119_v11  ;;  %9890 = vmatprep.mubr.msk.f32.mxu1 %vm11056_vm1, %v11057_v4 }
0x1a6f   :  { %10611 = vmatprep.subr.bf16.mxu1 %v11055_v0 }
0x1a72   :  { %10613 = vmatpush3.bf16.msra.mxu1 %v11122_v16 }
0x1a73   :  { %10614 = vmatprep.subr.bf16.mxu1 %v11055_v0 }
0x1b40   :  { %v5343_v22 = vpop.f32.mrb[8].mxu1 }
0x1b41   :  { %v5354_v23 = vadd.f32 %v5343_v22, %v11188_v43  ;;  %v9815_v24 = vpop.f32.mrb[9].mxu1  ;;  %v5347_v27 = vadd.f32 %v8648_v26, %v5343_v22 }
0x1b43   :  { %5356 = vrot.lane.b32.xlu0 %v5354_v23, %s11058_s30  ;;  %v8649_v29 = vmul.f32 -1.442695, %v5347_v27 }
0x1b45   :  { %11011 = vpow2.f32 %v8649_v29 }
0x1b47   :  { %5379 = vperm.xlu0 %10956, %v5377_v25  }
0x1b4f   :  { %v11012_v31 = vpop.eup %11011 }
0x1b50   :  { %v5351_v32 = vadd.f32 1.0, %v11012_v31 }
0x1b52   :  { %11013 = vrcp.f32 %v5351_v32 }
0x1b5c   :  { %v11014_v34 = vpop.eup %11013 }
0x1b5d   :  { %v5366_v47 = vsub.f32 1.0, %v11014_v34  ;;  %v5372_v50 = vmul.f32 %v11014_v34, %v11642_v9 }
0x1bb5   :  { %v5357_v52 = vpop.permute.xlu0 %5356 }
0x1bb6   :  { %v5359_v35 = vmul.f32 %v11014_v34, %v5357_v52 }
0x1bb8   :  { %5361 = vrot.lane.b32.xlu1 %v5359_v35, %s11058_s30 }
0x1bc6   :  { %v5380_v49 = vpop.permute.xlu0 %5379 }
0x1bc7   :  { %vm5381_vm7 = vcmp.eq.s32.totalorder %v5380_v49, 1 }
0x1c2a   :  { %v5362_v36 = vpop.permute.xlu1 %5361 }
0x1c2b   :  { %v5364_v44 = vadd.f32 %v8648_v26, %v5362_v36 }
0x1c2d   :  { %11015 = vtanh.f32 %v5364_v44 }
0x1c37   :  { %v11016_v45 = vpop.eup %11015 }
0x1c38   :  { %5368 = vrot.lane.b32.xlu1 %v11016_v45, %s11061_s11 }
0x1caa   :  { %v5369_v48 = vpop.permute.xlu1 %5368 }
0x1cab   :  { %v5371_v51 = vmul.f32 %v5369_v48, %v5366_v47 }
0x1cad   :  { %v5373_v54 = vadd.f32 %v5372_v50, %v5371_v51 }
0x1caf   :  { %v11696_v55 = vsel %vm5381_vm7, %v5373_v54, %v11642_v9  ;;  %v11698_v56 = vsel %vm5381_vm7, %v5373_v54, 0.0  ;;  %v8652_v9 = vld [vmem:[%s12111_s0 + $0x50] sm:$0xff] }
0x1cb0   :  { %5393 = vrot.lane.b32.xlu0 %v11696_v55, %s11061_s11 }
0x1d22   :  { %v5394_v57 = vpop.permute.xlu0 %5393 }
0x1d23   :  { %v5395_v59 = vsel %vm23_vm0, %v5394_v57, 0  ;;  %v8656_v57 = vld [vmem:[%s12111_s0 + $0x58] sm:$0xff] }
0x1d24   :  { %v5466_v60 = vand.u32 4294901760, %v5395_v59 }
0x1d26   :  { %v5467_v61 = vsub.f32 %v5395_v59, %v5466_v60 }
0x1d28   :  { %v5468_v62 = vand.u32 4294901760, %v5467_v61 }
0x1d2a   :  { %v5469_v63 = vsub.f32 %v5467_v61, %v5468_v62 }
0x1d2c   :  { %v5470_v1 = vand.u32 4294901760, %v5469_v63 }
0x1d2e   :  { %9825 = vmatmul.mubr.f32.vlgmr.msra.gmra.mrb[10].mxu0 %v5470_v1 }
0x1d2f   :  { %10580 = vmatpush3.bf16.msra.mxu0 %v11138_v33  ;;  %9835 = vmatprep.mubr.msk.f32.mxu0 %vm11056_vm1, %v11057_v4 }
0x1d30   :  { %10581 = vmatprep.subr.bf16.mxu0 %v11055_v0 }
0x1d33   :  { %10583 = vmatpush3.bf16.msra.mxu0 %v11141_v37 }
0x1d34   :  { %10584 = vmatprep.subr.bf16.mxu0 %v11055_v0 }
0x1d36   :  { %9836 = vmatmul.mubr.f32.vlgmr.msra.gmra.mrb[10].mxu0 %v5466_v60 }
0x1d37   :  { %10586 = vmatpush3.bf16.msra.mxu0 %v11147_v38  ;;  %9846 = vmatprep.mubr.msk.f32.mxu0 %vm11056_vm1, %v11057_v4 }
0x1d38   :  { %10587 = vmatprep.subr.bf16.mxu0 %v11055_v0 }
0x1d3b   :  { %10589 = vmatpush3.bf16.msra.mxu0 %v11151_v39 }
0x1d3c   :  { %10590 = vmatprep.subr.bf16.mxu0 %v11055_v0 }
0x1d3e   :  { %9847 = vmatmul.mubr.f32.vlgmr.msra.gmra.mrb[10].mxu0 %v5467_v61 }
0x1d3f   :  { %10592 = vmatpush3.bf16.msra.mxu0 %v11119_v11  ;;  %9857 = vmatprep.mubr.msk.f32.mxu0 %vm11056_vm1, %v11057_v4 }
0x1d40   :  { %10593 = vmatprep.subr.bf16.mxu0 %v11055_v0 }
0x1d43   :  { %10595 = vmatpush3.bf16.msra.mxu0 %v11122_v16 }
0x1d44   :  { %10596 = vmatprep.subr.bf16.mxu0 %v11055_v0 }
0x1d46   :  { %9858 = vmatmul.mubr.f32.vlgmr.msra.gmra.mrb[10].mxu0 %v5468_v62 }
0x1d47   :  { %10598 = vmatpush3.bf16.msra.mxu0 %v11163_v40  ;;  %9868 = vmatprep.mubr.msk.f32.mxu0 %vm11056_vm1, %v11057_v4 }
0x1d48   :  { %10599 = vmatprep.subr.bf16.mxu0 %v11055_v0 }
0x1d4b   :  { %10601 = vmatpush3.bf16.msra.mxu0 %v11167_v41 }
0x1d4c   :  { %10602 = vmatprep.subr.bf16.mxu0 %v11055_v0 }
0x1d4e   :  { %9869 = vmatmul.mubr.f32.vlgmr.msra.gmra.mrb[10].mxu0 %v5466_v60 }
0x1d4f   :  { %10604 = vmatpush3.bf16.msra.mxu0 %v11119_v11  ;;  %9879 = vmatprep.mubr.msk.f32.mxu0 %vm11056_vm1, %v11057_v4 }
0x1d50   :  { %10605 = vmatprep.subr.bf16.mxu0 %v11055_v0 }
0x1d53   :  { %10607 = vmatpush3.bf16.msra.mxu0 %v11122_v16 }
0x1d54   :  { %10644 = vmatprep.subr.bf16.mxu0 %v11055_v0 }
0x1d56   :  { %9880 = vmatmul.mubr.f32.vlgmr.msra.gmra.mrb[10].mxu0 %v5466_v60 }
0x1d57   :  { %10646 = vmatpush3.bf16.msra.mxu0 %v11119_v11  ;;  %9956 = vmatprep.mubr.msk.f32.mxu0 %vm11056_vm1, %v11057_v4 }
0x1d58   :  { %10647 = vmatprep.subr.bf16.mxu0 %v11055_v0 }
0x1d5b   :  { %10649 = vmatpush3.bf16.msra.mxu0 %v11122_v16 }
0x1d5c   :  { %10650 = vmatprep.subr.bf16.mxu0 %v11055_v0 }
0x1e29   :  { %v5878_v3 = vpop.f32.mrb[10].mxu0 }
0x1e2a   :  { %v5889_v5 = vadd.f32 %v5878_v3, %v11188_v43  ;;  %v9881_v7 = vpop.f32.mrb[11].mxu0  ;;  %v5882_v13 = vadd.f32 %v8652_v9, %v5878_v3 }
0x1e2c   :  { %5891 = vrot.lane.b32.xlu1 %v5889_v5, %s11058_s30  ;;  %v8653_v14 = vmul.f32 -1.442695, %v5882_v13 }
0x1e2e   :  { %11017 = vpow2.f32 %v8653_v14 }
0x1e30   :  { %5914 = vperm.xlu1 %10955, %v5912_v8  }
0x1e38   :  { %v11018_v15 = vpop.eup %11017 }
0x1e39   :  { %v5886_v18 = vadd.f32 1.0, %v11018_v15 }
0x1e3b   :  { %11019 = vrcp.f32 %v5886_v18 }
0x1e45   :  { %v11020_v19 = vpop.eup %11019 }
0x1e46   :  { %v5901_v25 = vsub.f32 1.0, %v11020_v19  ;;  %v5907_v29 = vmul.f32 %v11020_v19, %v11696_v55 }
0x1e9e   :  { %v5892_v20 = vpop.permute.xlu1 %5891 }
0x1e9f   :  { %v5894_v21 = vmul.f32 %v11020_v19, %v5892_v20 }
0x1ea1   :  { %5896 = vrot.lane.b32.xlu0 %v5894_v21, %s11058_s30 }
0x1eaf   :  { %v5915_v27 = vpop.permute.xlu1 %5914 }
0x1eb0   :  { %vm5916_vm9 = vcmp.eq.s32.totalorder %v5915_v27, 1 }
0x1f13   :  { %v5897_v22 = vpop.permute.xlu0 %5896 }
0x1f14   :  { %v5899_v23 = vadd.f32 %v8652_v9, %v5897_v22 }
0x1f16   :  { %11021 = vtanh.f32 %v5899_v23 }
0x1f20   :  { %v11022_v24 = vpop.eup %11021 }
0x1f21   :  { %5903 = vrot.lane.b32.xlu0 %v11022_v24, %s11061_s11 }
0x1f93   :  { %v5904_v26 = vpop.permute.xlu0 %5903 }
0x1f94   :  { %v5906_v31 = vmul.f32 %v5904_v26, %v5901_v25 }
0x1f96   :  { %v5908_v32 = vadd.f32 %v5907_v29, %v5906_v31 }
0x1f98   :  { %v11750_v34 = vsel %vm5916_vm9, %v5908_v32, %v11696_v55  ;;  %v11752_v52 = vsel %vm5916_vm9, %v5908_v32, 0.0  ;;  %v6447_v55 = vsel %vm8658_vm10, 1, %v11059_v42 }
0x1f99   :  { %5928 = vrot.lane.b32.xlu1 %v11750_v34, %s11061_s11 }
0x200b   :  { %v5929_v35 = vpop.permute.xlu1 %5928 }
0x200c   :  { %v5930_v36 = vsel %vm23_vm0, %v5929_v35, 0  ;;  %v6982_v35 = vsel %vm8662_vm12, 1, %v11059_v42 }
0x200d   :  { %v6001_v44 = vand.u32 4294901760, %v5930_v36 }
0x200f   :  { %v6002_v45 = vsub.f32 %v5930_v36, %v6001_v44  ;;  %v8660_v36 = vld [vmem:[%s12111_s0 + $0x60] sm:$0xff] }
0x2011   :  { %v6003_v47 = vand.u32 4294901760, %v6002_v45 }
0x2013   :  { %v6004_v48 = vsub.f32 %v6002_v45, %v6003_v47 }
0x2015   :  { %v6005_v49 = vand.u32 4294901760, %v6004_v48 }
0x2017   :  { %9891 = vmatmul.mubr.f32.vlgmr.msra.gmra.mrb[10].mxu1 %v6005_v49 }
0x2018   :  { %10616 = vmatpush3.bf16.msra.mxu1 %v11138_v33  ;;  %9901 = vmatprep.mubr.msk.f32.mxu1 %vm11056_vm1, %v11057_v4 }
0x2019   :  { %10617 = vmatprep.subr.bf16.mxu1 %v11055_v0 }
0x201c   :  { %10619 = vmatpush3.bf16.msra.mxu1 %v11141_v37 }
0x201d   :  { %10620 = vmatprep.subr.bf16.mxu1 %v11055_v0 }
0x201f   :  { %9902 = vmatmul.mubr.f32.vlgmr.msra.gmra.mrb[10].mxu1 %v6001_v44 }
0x2020   :  { %10622 = vmatpush3.bf16.msra.mxu1 %v11147_v38  ;;  %9912 = vmatprep.mubr.msk.f32.mxu1 %vm11056_vm1, %v11057_v4 }
0x2021   :  { %10623 = vmatprep.subr.bf16.mxu1 %v11055_v0 }
0x2024   :  { %10625 = vmatpush3.bf16.msra.mxu1 %v11151_v39 }
0x2025   :  { %10626 = vmatprep.subr.bf16.mxu1 %v11055_v0 }
0x2027   :  { %9913 = vmatmul.mubr.f32.vlgmr.msra.gmra.mrb[10].mxu1 %v6002_v45 }
0x2028   :  { %10628 = vmatpush3.bf16.msra.mxu1 %v11119_v11  ;;  %9923 = vmatprep.mubr.msk.f32.mxu1 %vm11056_vm1, %v11057_v4 }
0x2029   :  { %10629 = vmatprep.subr.bf16.mxu1 %v11055_v0 }
0x202c   :  { %10631 = vmatpush3.bf16.msra.mxu1 %v11122_v16 }
0x202d   :  { %10632 = vmatprep.subr.bf16.mxu1 %v11055_v0 }
0x202f   :  { %9924 = vmatmul.mubr.f32.vlgmr.msra.gmra.mrb[10].mxu1 %v6003_v47 }
0x2030   :  { %10634 = vmatpush3.bf16.msra.mxu1 %v11163_v40  ;;  %9934 = vmatprep.mubr.msk.f32.mxu1 %vm11056_vm1, %v11057_v4 }
0x2031   :  { %10635 = vmatprep.subr.bf16.mxu1 %v11055_v0 }
0x2034   :  { %10637 = vmatpush3.bf16.msra.mxu1 %v11167_v41 }
0x2035   :  { %10638 = vmatprep.subr.bf16.mxu1 %v11055_v0 }
0x2037   :  { %9935 = vmatmul.mubr.f32.vlgmr.msra.gmra.mrb[10].mxu1 %v6001_v44 }
0x2038   :  { %10640 = vmatpush3.bf16.msra.mxu1 %v11119_v11  ;;  %9945 = vmatprep.mubr.msk.f32.mxu1 %vm11056_vm1, %v11057_v4 }
0x2039   :  { %10641 = vmatprep.subr.bf16.mxu1 %v11055_v0 }
0x203c   :  { %10643 = vmatpush3.bf16.msra.mxu1 %v11122_v16 }
0x203d   :  { %10680 = vmatprep.subr.bf16.mxu1 %v11055_v0 }
0x203f   :  { %9946 = vmatmul.mubr.f32.vlgmr.msra.gmra.mrb[10].mxu1 %v6001_v44 }
0x2040   :  { %10682 = vmatpush3.bf16.msra.mxu1 %v11119_v11  ;;  %10022 = vmatprep.mubr.msk.f32.mxu1 %vm11056_vm1, %v11057_v4 }
0x2041   :  { %10683 = vmatprep.subr.bf16.mxu1 %v11055_v0 }
0x2044   :  { %10685 = vmatpush3.bf16.msra.mxu1 %v11122_v16 }
0x2045   :  { %10686 = vmatprep.subr.bf16.mxu1 %v11055_v0 }
0x2112   :  { %v6413_v50 = vpop.f32.mrb[10].mxu1 }
0x2113   :  { %v6424_v51 = vadd.f32 %v6413_v50, %v11188_v43  ;;  %v9947_v54 = vpop.f32.mrb[11].mxu1  ;;  %v6417_v59 = vadd.f32 %v8656_v57, %v6413_v50 }
0x2115   :  { %6426 = vrot.lane.b32.xlu0 %v6424_v51, %s11058_s30  ;;  %v8657_v60 = vmul.f32 -1.442695, %v6417_v59 }
0x2117   :  { %11023 = vpow2.f32 %v8657_v60 }
0x2119   :  { %6449 = vperm.xlu0 %10956, %v6447_v55  }
0x2121   :  { %v11024_v61 = vpop.eup %11023 }
0x2122   :  { %v6421_v62 = vadd.f32 1.0, %v11024_v61 }
0x2124   :  { %11025 = vrcp.f32 %v6421_v62 }
0x212e   :  { %v11026_v63 = vpop.eup %11025 }
0x212f   :  { %v6436_v9 = vsub.f32 1.0, %v11026_v63  ;;  %v6442_v15 = vmul.f32 %v11026_v63, %v11750_v34 }
0x2187   :  { %v6427_v1 = vpop.permute.xlu0 %6426 }
0x2188   :  { %v6429_v3 = vmul.f32 %v11026_v63, %v6427_v1 }
0x218a   :  { %6431 = vrot.lane.b32.xlu1 %v6429_v3, %s11058_s30 }
0x2198   :  { %v6450_v14 = vpop.permute.xlu0 %6449 }
0x2199   :  { %vm6451_vm11 = vcmp.eq.s32.totalorder %v6450_v14, 1 }
0x21fc   :  { %v6432_v5 = vpop.permute.xlu1 %6431 }
0x21fd   :  { %v6434_v7 = vadd.f32 %v8656_v57, %v6432_v5 }
0x21ff   :  { %11027 = vtanh.f32 %v6434_v7 }
0x2209   :  { %v11028_v8 = vpop.eup %11027 }
0x220a   :  { %6438 = vrot.lane.b32.xlu1 %v11028_v8, %s11061_s11 }
0x227c   :  { %v6439_v13 = vpop.permute.xlu1 %6438 }
0x227d   :  { %v6441_v18 = vmul.f32 %v6439_v13, %v6436_v9 }
0x227f   :  { %v6443_v19 = vadd.f32 %v6442_v15, %v6441_v18 }
0x2281   :  { %v11804_v20 = vsel %vm6451_vm11, %v6443_v19, %v11750_v34  ;;  %v11806_v21 = vsel %vm6451_vm11, %v6443_v19, 0.0 }
0x2282   :  { %6463 = vrot.lane.b32.xlu0 %v11804_v20, %s11061_s11 }
0x22f4   :  { %v6464_v22 = vpop.permute.xlu0 %6463 }
0x22f5   :  { %v6465_v23 = vsel %vm23_vm0, %v6464_v22, 0 }
0x22f6   :  { %v6536_v24 = vand.u32 4294901760, %v6465_v23 }
0x22f8   :  { %v6537_v25 = vsub.f32 %v6465_v23, %v6536_v24  ;;  %v7517_v23 = vsel %vm8666_vm14, 1, %v11059_v42 }
0x22fa   :  { %v6538_v26 = vand.u32 4294901760, %v6537_v25 }
0x22fc   :  { %v6539_v27 = vsub.f32 %v6537_v25, %v6538_v26 }
0x22fe   :  { %v6540_v29 = vand.u32 4294901760, %v6539_v27 }
0x2300   :  { %9957 = vmatmul.mubr.f32.vlgmr.msra.gmra.mrb[12].mxu0 %v6540_v29 }
0x2301   :  { %10652 = vmatpush3.bf16.msra.mxu0 %v11138_v33  ;;  %9967 = vmatprep.mubr.msk.f32.mxu0 %vm11056_vm1, %v11057_v4 }
0x2302   :  { %10653 = vmatprep.subr.bf16.mxu0 %v11055_v0 }
0x2305   :  { %10655 = vmatpush3.bf16.msra.mxu0 %v11141_v37 }
0x2306   :  { %10656 = vmatprep.subr.bf16.mxu0 %v11055_v0 }
0x2308   :  { %9968 = vmatmul.mubr.f32.vlgmr.msra.gmra.mrb[12].mxu0 %v6536_v24 }
0x2309   :  { %10658 = vmatpush3.bf16.msra.mxu0 %v11147_v38  ;;  %9978 = vmatprep.mubr.msk.f32.mxu0 %vm11056_vm1, %v11057_v4 }
0x230a   :  { %10659 = vmatprep.subr.bf16.mxu0 %v11055_v0 }
0x230d   :  { %10661 = vmatpush3.bf16.msra.mxu0 %v11151_v39 }
0x230e   :  { %10662 = vmatprep.subr.bf16.mxu0 %v11055_v0 }
0x2310   :  { %9979 = vmatmul.mubr.f32.vlgmr.msra.gmra.mrb[12].mxu0 %v6537_v25 }
0x2311   :  { %10664 = vmatpush3.bf16.msra.mxu0 %v11119_v11  ;;  %9989 = vmatprep.mubr.msk.f32.mxu0 %vm11056_vm1, %v11057_v4 }
0x2312   :  { %10665 = vmatprep.subr.bf16.mxu0 %v11055_v0 }
0x2315   :  { %10667 = vmatpush3.bf16.msra.mxu0 %v11122_v16 }
0x2316   :  { %10668 = vmatprep.subr.bf16.mxu0 %v11055_v0 }
0x2318   :  { %9990 = vmatmul.mubr.f32.vlgmr.msra.gmra.mrb[12].mxu0 %v6538_v26 }
0x2319   :  { %10670 = vmatpush3.bf16.msra.mxu0 %v11163_v40  ;;  %10000 = vmatprep.mubr.msk.f32.mxu0 %vm11056_vm1, %v11057_v4 }
0x231a   :  { %10671 = vmatprep.subr.bf16.mxu0 %v11055_v0 }
0x231d   :  { %10673 = vmatpush3.bf16.msra.mxu0 %v11167_v41 }
0x231e   :  { %10674 = vmatprep.subr.bf16.mxu0 %v11055_v0 }
0x2320   :  { %10001 = vmatmul.mubr.f32.vlgmr.msra.gmra.mrb[12].mxu0 %v6536_v24 }
0x2321   :  { %10676 = vmatpush3.bf16.msra.mxu0 %v11119_v11  ;;  %10011 = vmatprep.mubr.msk.f32.mxu0 %vm11056_vm1, %v11057_v4 }
0x2322   :  { %10677 = vmatprep.subr.bf16.mxu0 %v11055_v0 }
0x2325   :  { %10679 = vmatpush3.bf16.msra.mxu0 %v11122_v16 }
0x2326   :  { %10716 = vmatprep.subr.bf16.mxu0 %v11055_v0 }
0x2328   :  { %10012 = vmatmul.mubr.f32.vlgmr.msra.gmra.mrb[12].mxu0 %v6536_v24  ;;  %v8664_v24 = vld [vmem:[%s12111_s0 + $0x68] sm:$0xff] }
0x2329   :  { %10718 = vmatpush3.bf16.msra.mxu0 %v11119_v11  ;;  %10088 = vmatprep.mubr.msk.f32.mxu0 %vm11056_vm1, %v11057_v4 }
0x232a   :  { %10719 = vmatprep.subr.bf16.mxu0 %v11055_v0 }
0x232d   :  { %10721 = vmatpush3.bf16.msra.mxu0 %v11122_v16 }
0x232e   :  { %10722 = vmatprep.subr.bf16.mxu0 %v11055_v0 }
0x23fb   :  { %v6948_v31 = vpop.f32.mrb[12].mxu0 }
0x23fc   :  { %v6959_v32 = vadd.f32 %v6948_v31, %v11188_v43  ;;  %v10013_v34 = vpop.f32.mrb[13].mxu0  ;;  %v6952_v44 = vadd.f32 %v8660_v36, %v6948_v31 }
0x23fe   :  { %6961 = vrot.lane.b32.xlu1 %v6959_v32, %s11058_s30  ;;  %v8661_v45 = vmul.f32 -1.442695, %v6952_v44 }
0x2400   :  { %11029 = vpow2.f32 %v8661_v45 }
0x2402   :  { %6984 = vperm.xlu1 %10955, %v6982_v35  }
0x240a   :  { %v11030_v47 = vpop.eup %11029 }
0x240b   :  { %v6956_v48 = vadd.f32 1.0, %v11030_v47 }
0x240d   :  { %11031 = vrcp.f32 %v6956_v48 }
0x2417   :  { %v11032_v49 = vpop.eup %11031 }
0x2418   :  { %v6971_v59 = vsub.f32 1.0, %v11032_v49  ;;  %v6977_v62 = vmul.f32 %v11032_v49, %v11804_v20 }
0x2470   :  { %v6962_v50 = vpop.permute.xlu1 %6961 }
0x2471   :  { %v6964_v51 = vmul.f32 %v11032_v49, %v6962_v50 }
0x2473   :  { %6966 = vrot.lane.b32.xlu0 %v6964_v51, %s11058_s30 }
0x2481   :  { %v6985_v61 = vpop.permute.xlu1 %6984 }
0x2482   :  { %vm6986_vm13 = vcmp.eq.s32.totalorder %v6985_v61, 1 }
0x24e5   :  { %v6967_v54 = vpop.permute.xlu0 %6966 }
0x24e6   :  { %v6969_v55 = vadd.f32 %v8660_v36, %v6967_v54 }
0x24e8   :  { %11033 = vtanh.f32 %v6969_v55 }
0x24f2   :  { %v11034_v57 = vpop.eup %11033 }
0x24f3   :  { %6973 = vrot.lane.b32.xlu0 %v11034_v57, %s11061_s11 }
0x2565   :  { %v6974_v60 = vpop.permute.xlu0 %6973 }
0x2566   :  { %v6976_v63 = vmul.f32 %v6974_v60, %v6971_v59 }
0x2568   :  { %v6978_v1 = vadd.f32 %v6977_v62, %v6976_v63 }
0x256a   :  { %v11858_v3 = vsel %vm6986_vm13, %v6978_v1, %v11804_v20  ;;  %v11860_v5 = vsel %vm6986_vm13, %v6978_v1, 0.0 }
0x256b   :  { %6998 = vrot.lane.b32.xlu1 %v11858_v3, %s11061_s11 }
0x25dd   :  { %v6999_v7 = vpop.permute.xlu1 %6998 }
0x25de   :  { %v7000_v8 = vsel %vm23_vm0, %v6999_v7, 0 }
0x25df   :  { %v7071_v9 = vand.u32 4294901760, %v7000_v8 }
0x25e1   :  { %v7072_v13 = vsub.f32 %v7000_v8, %v7071_v9  ;;  %v11952_v8 = vld [vmem:[%s12112_s3] sm:$0xff] }
0x25e2   :  { %vm8670_vm2 = vcmp.gt.s32.totalorder %v11952_v8, 14  ;;  %vm8674_vm4 = vcmp.gt.s32.totalorder %v11952_v8, 15 }
0x25e3   :  { %v7073_v14 = vand.u32 4294901760, %v7072_v13 }
0x25e5   :  { %v7074_v15 = vsub.f32 %v7072_v13, %v7073_v14 }
0x25e7   :  { %v7075_v18 = vand.u32 4294901760, %v7074_v15 }
0x25e9   :  { %10023 = vmatmul.mubr.f32.vlgmr.msra.gmra.mrb[12].mxu1 %v7075_v18 }
0x25ea   :  { %10688 = vmatpush3.bf16.msra.mxu1 %v11138_v33  ;;  %10033 = vmatprep.mubr.msk.f32.mxu1 %vm11056_vm1, %v11057_v4 }
0x25eb   :  { %10689 = vmatprep.subr.bf16.mxu1 %v11055_v0 }
0x25ee   :  { %10691 = vmatpush3.bf16.msra.mxu1 %v11141_v37 }
0x25ef   :  { %10692 = vmatprep.subr.bf16.mxu1 %v11055_v0 }
0x25f1   :  { %10034 = vmatmul.mubr.f32.vlgmr.msra.gmra.mrb[12].mxu1 %v7071_v9 }
0x25f2   :  { %10694 = vmatpush3.bf16.msra.mxu1 %v11147_v38  ;;  %10044 = vmatprep.mubr.msk.f32.mxu1 %vm11056_vm1, %v11057_v4 }
0x25f3   :  { %10695 = vmatprep.subr.bf16.mxu1 %v11055_v0 }
0x25f6   :  { %10697 = vmatpush3.bf16.msra.mxu1 %v11151_v39 }
0x25f7   :  { %10698 = vmatprep.subr.bf16.mxu1 %v11055_v0 }
0x25f9   :  { %10045 = vmatmul.mubr.f32.vlgmr.msra.gmra.mrb[12].mxu1 %v7072_v13  ;;  %v8668_v13 = vld [vmem:[%s12111_s0 + $0x70] sm:$0xff] }
0x25fa   :  { %10700 = vmatpush3.bf16.msra.mxu1 %v11119_v11  ;;  %10055 = vmatprep.mubr.msk.f32.mxu1 %vm11056_vm1, %v11057_v4 }
0x25fb   :  { %10701 = vmatprep.subr.bf16.mxu1 %v11055_v0 }
0x25fe   :  { %10703 = vmatpush3.bf16.msra.mxu1 %v11122_v16 }
0x25ff   :  { %10704 = vmatprep.subr.bf16.mxu1 %v11055_v0 }
0x2601   :  { %10056 = vmatmul.mubr.f32.vlgmr.msra.gmra.mrb[12].mxu1 %v7073_v14 }
0x2602   :  { %10706 = vmatpush3.bf16.msra.mxu1 %v11163_v40  ;;  %10066 = vmatprep.mubr.msk.f32.mxu1 %vm11056_vm1, %v11057_v4 }
0x2603   :  { %10707 = vmatprep.subr.bf16.mxu1 %v11055_v0 }
0x2606   :  { %10709 = vmatpush3.bf16.msra.mxu1 %v11167_v41 }
0x2607   :  { %10710 = vmatprep.subr.bf16.mxu1 %v11055_v0 }
0x2609   :  { %10067 = vmatmul.mubr.f32.vlgmr.msra.gmra.mrb[12].mxu1 %v7071_v9 }
0x260a   :  { %10712 = vmatpush3.bf16.msra.mxu1 %v11119_v11  ;;  %10077 = vmatprep.mubr.msk.f32.mxu1 %vm11056_vm1, %v11057_v4 }
0x260b   :  { %10713 = vmatprep.subr.bf16.mxu1 %v11055_v0 }
0x260e   :  { %10715 = vmatpush3.bf16.msra.mxu1 %v11122_v16 }
0x260f   :  { %10752 = vmatprep.subr.bf16.mxu1 %v11055_v0 }
0x2611   :  { %10078 = vmatmul.mubr.f32.vlgmr.msra.gmra.mrb[12].mxu1 %v7071_v9  ;;  %v8052_v9 = vsel %vm8670_vm2, 1, %v11059_v42 }
0x2612   :  { %10754 = vmatpush3.bf16.msra.mxu1 %v11119_v11  ;;  %10154 = vmatprep.mubr.msk.f32.mxu1 %vm11056_vm1, %v11057_v4 }
0x2613   :  { %10755 = vmatprep.subr.bf16.mxu1 %v11055_v0 }
0x2616   :  { %10757 = vmatpush3.bf16.msra.mxu1 %v11122_v16 }
0x2617   :  { %10758 = vmatprep.subr.bf16.mxu1 %v11055_v0 }
0x26e4   :  { %v7483_v19 = vpop.f32.mrb[12].mxu1 }
0x26e5   :  { %v7494_v20 = vadd.f32 %v7483_v19, %v11188_v43  ;;  %v10079_v22 = vpop.f32.mrb[13].mxu1  ;;  %v7487_v25 = vadd.f32 %v8664_v24, %v7483_v19 }
0x26e7   :  { %7496 = vrot.lane.b32.xlu0 %v7494_v20, %s11058_s30  ;;  %v8665_v26 = vmul.f32 -1.442695, %v7487_v25 }
0x26e9   :  { %11035 = vpow2.f32 %v8665_v26 }
0x26eb   :  { %7519 = vperm.xlu0 %10956, %v7517_v23  }
0x26f3   :  { %v11036_v27 = vpop.eup %11035 }
0x26f4   :  { %v7491_v29 = vadd.f32 1.0, %v11036_v27 }
0x26f6   :  { %11037 = vrcp.f32 %v7491_v29 }
0x2700   :  { %v11038_v31 = vpop.eup %11037 }
0x2701   :  { %v7506_v44 = vsub.f32 1.0, %v11038_v31  ;;  %v7512_v48 = vmul.f32 %v11038_v31, %v11858_v3 }
0x2759   :  { %v7497_v32 = vpop.permute.xlu0 %7496 }
0x275a   :  { %v7499_v34 = vmul.f32 %v11038_v31, %v7497_v32 }
0x275c   :  { %7501 = vrot.lane.b32.xlu1 %v7499_v34, %s11058_s30 }
0x276a   :  { %v7520_v47 = vpop.permute.xlu0 %7519 }
0x276b   :  { %vm7521_vm15 = vcmp.eq.s32.totalorder %v7520_v47, 1 }
0x27ce   :  { %v7502_v2 = vpop.permute.xlu1 %7501 }
0x27cf   :  { %v7504_v35 = vadd.f32 %v8664_v24, %v7502_v2 }
0x27d1   :  { %11039 = vtanh.f32 %v7504_v35 }
0x27db   :  { %v11040_v36 = vpop.eup %11039 }
0x27dc   :  { %7508 = vrot.lane.b32.xlu1 %v11040_v36, %s11061_s11 }
0x284e   :  { %v7509_v45 = vpop.permute.xlu1 %7508 }
0x284f   :  { %v7511_v49 = vmul.f32 %v7509_v45, %v7506_v44 }
0x2851   :  { %v7513_v50 = vadd.f32 %v7512_v48, %v7511_v49 }
0x2853   :  { %v11912_v51 = vsel %vm7521_vm15, %v7513_v50, %v11858_v3  ;;  %v11914_v54 = vsel %vm7521_vm15, %v7513_v50, 0.0 }
0x2854   :  { %7533 = vrot.lane.b32.xlu0 %v11912_v51, %s11061_s11 }
0x28c6   :  { %v7534_v55 = vpop.permute.xlu0 %7533 }
0x28c7   :  { %v7535_v57 = vsel %vm23_vm0, %v7534_v55, 0 }
0x28c8   :  { %v7606_v59 = vand.u32 4294901760, %v7535_v57 }
0x28ca   :  { %v7607_v60 = vsub.f32 %v7535_v57, %v7606_v59 }
0x28cc   :  { %v7608_v61 = vand.u32 4294901760, %v7607_v60 }
0x28ce   :  { %v7609_v62 = vsub.f32 %v7607_v60, %v7608_v61 }
0x28d0   :  { %v7610_v63 = vand.u32 4294901760, %v7609_v62 }
0x28d2   :  { %10089 = vmatmul.mubr.f32.vlgmr.msra.gmra.mrb[14].mxu0 %v7610_v63 }
0x28d3   :  { %10724 = vmatpush3.bf16.msra.mxu0 %v11138_v33  ;;  %10099 = vmatprep.mubr.msk.f32.mxu0 %vm11056_vm1, %v11057_v4 }
0x28d4   :  { %10725 = vmatprep.subr.bf16.mxu0 %v11055_v0 }
0x28d7   :  { %10727 = vmatpush3.bf16.msra.mxu0 %v11141_v37 }
0x28d8   :  { %10728 = vmatprep.subr.bf16.mxu0 %v11055_v0 }
0x28da   :  { %10100 = vmatmul.mubr.f32.vlgmr.msra.gmra.mrb[14].mxu0 %v7606_v59 }
0x28db   :  { %10730 = vmatpush3.bf16.msra.mxu0 %v11147_v38  ;;  %10110 = vmatprep.mubr.msk.f32.mxu0 %vm11056_vm1, %v11057_v4 }
0x28dc   :  { %10731 = vmatprep.subr.bf16.mxu0 %v11055_v0 }
0x28df   :  { %10733 = vmatpush3.bf16.msra.mxu0 %v11151_v39 }
0x28e0   :  { %10734 = vmatprep.subr.bf16.mxu0 %v11055_v0 }
0x28e2   :  { %10111 = vmatmul.mubr.f32.vlgmr.msra.gmra.mrb[14].mxu0 %v7607_v60 }
0x28e3   :  { %10736 = vmatpush3.bf16.msra.mxu0 %v11119_v11  ;;  %10121 = vmatprep.mubr.msk.f32.mxu0 %vm11056_vm1, %v11057_v4 }
0x28e4   :  { %10737 = vmatprep.subr.bf16.mxu0 %v11055_v0 }
0x28e7   :  { %10739 = vmatpush3.bf16.msra.mxu0 %v11122_v16 }
0x28e8   :  { %10740 = vmatprep.subr.bf16.mxu0 %v11055_v0 }
0x28ea   :  { %10122 = vmatmul.mubr.f32.vlgmr.msra.gmra.mrb[14].mxu0 %v7608_v61 }
0x28eb   :  { %10742 = vmatpush3.bf16.msra.mxu0 %v11163_v40  ;;  %10132 = vmatprep.mubr.msk.f32.mxu0 %vm11056_vm1, %v11057_v4 }
0x28ec   :  { %10743 = vmatprep.subr.bf16.mxu0 %v11055_v0 }
0x28ef   :  { %10745 = vmatpush3.bf16.msra.mxu0 %v11167_v41 }
0x28f0   :  { %10746 = vmatprep.subr.bf16.mxu0 %v11055_v0 }
0x28f2   :  { %10133 = vmatmul.mubr.f32.vlgmr.msra.gmra.mrb[14].mxu0 %v7606_v59 }
0x28f3   :  { %10748 = vmatpush3.bf16.msra.mxu0 %v11119_v11  ;;  %10143 = vmatprep.mubr.msk.f32.mxu0 %vm11056_vm1, %v11057_v4 }
0x28f4   :  { %10749 = vmatprep.subr.bf16.mxu0 %v11055_v0 }
0x28f7   :  { %10751 = vmatpush3.bf16.msra.mxu0 %v11122_v16 }
0x28fa   :  { %10144 = vmatmul.mubr.f32.vlgmr.msra.gmra.mrb[14].mxu0 %v7606_v59 }
0x29cd   :  { %v8018_v1 = vpop.f32.mrb[14].mxu0 }
0x29ce   :  { %v8029_v3 = vadd.f32 %v8018_v1, %v11188_v43  ;;  %v10145_v7 = vpop.f32.mrb[15].mxu0  ;;  %v8022_v14 = vadd.f32 %v8668_v13, %v8018_v1 }
0x29d0   :  { %8031 = vrot.lane.b32.xlu1 %v8029_v3, %s11058_s30  ;;  %v8669_v15 = vmul.f32 -1.442695, %v8022_v14 }
0x29d2   :  { %11041 = vpow2.f32 %v8669_v15 }
0x29d4   :  { %8054 = vperm.xlu1 %10955, %v8052_v9  }
0x29dc   :  { %v11042_v18 = vpop.eup %11041 }
0x29dd   :  { %v8026_v19 = vadd.f32 1.0, %v11042_v18 }
0x29df   :  { %11043 = vrcp.f32 %v8026_v19 }
0x29e9   :  { %v11044_v20 = vpop.eup %11043 }
0x29ea   :  { %v8041_v27 = vsub.f32 1.0, %v11044_v20  ;;  %v8047_v32 = vmul.f32 %v11044_v20, %v11912_v51 }
0x2a42   :  { %v8032_v22 = vpop.permute.xlu1 %8031 }
0x2a43   :  { %v8034_v23 = vmul.f32 %v11044_v20, %v8032_v22 }
0x2a45   :  { %8036 = vrot.lane.b32.xlu0 %v8034_v23, %s11058_s30 }
0x2a53   :  { %v8055_v31 = vpop.permute.xlu1 %8054 }
0x2a54   :  { %vm8056_vm3 = vcmp.eq.s32.totalorder %v8055_v31, 1 }
0x2ab7   :  { %v8037_v24 = vpop.permute.xlu0 %8036 }
0x2ab8   :  { %v8039_v25 = vadd.f32 %v8668_v13, %v8037_v24 }
0x2aba   :  { %11045 = vtanh.f32 %v8039_v25 }
0x2ac4   :  { %v11046_v26 = vpop.eup %11045 }
0x2ac5   :  { %8043 = vrot.lane.b32.xlu0 %v11046_v26, %s11061_s11 }
0x2b37   :  { %v8044_v29 = vpop.permute.xlu0 %8043 }
0x2b38   :  { %v8046_v34 = vmul.f32 %v8044_v29, %v8041_v27 }
0x2b3a   :  { %v8048_v2 = vadd.f32 %v8047_v32, %v8046_v34 }
0x2b3c   :  { %v11964_v35 = vsel %vm8056_vm3, %v8048_v2, %v11912_v51  ;;  %v8058_v36 = vsel %vm8056_vm3, %v8048_v2, 0.0 }
0x2b3d   :  { %8068 = vrot.lane.b32.xlu1 %v11964_v35, %s11061_s11 }
0x2baf   :  { %v8069_v44 = vpop.permute.xlu1 %8068 }
0x2bb0   :  { %v8070_v45 = vsel %vm23_vm0, %v8069_v44, 0 }
0x2bb1   :  { %v8141_v47 = vand.u32 4294901760, %v8070_v45 }
0x2bb3   :  { %v8142_v48 = vsub.f32 %v8070_v45, %v8141_v47 }
0x2bb5   :  { %v8143_v49 = vand.u32 4294901760, %v8142_v48 }
0x2bb7   :  { %v8144_v50 = vsub.f32 %v8142_v48, %v8143_v49 }
0x2bb9   :  { %v8145_v55 = vand.u32 4294901760, %v8144_v50 }
0x2bbb   :  { %10155 = vmatmul.mubr.f32.vlgmr.msra.gmra.mrb[14].mxu1 %v8145_v55 }
0x2bbc   :  { %10760 = vmatpush3.bf16.msra.mxu1 %v11138_v33  ;;  %10165 = vmatprep.mubr.msk.f32.mxu1 %vm11056_vm1, %v11057_v4 }
0x2bbd   :  { %10761 = vmatprep.subr.bf16.mxu1 %v11055_v0 }
0x2bc0   :  { %10763 = vmatpush3.bf16.msra.mxu1 %v11141_v37 }
0x2bc1   :  { %10764 = vmatprep.subr.bf16.mxu1 %v11055_v0 }
0x2bc3   :  { %10166 = vmatmul.mubr.f32.vlgmr.msra.gmra.mrb[14].mxu1 %v8141_v47 }
0x2bc4   :  { %10766 = vmatpush3.bf16.msra.mxu1 %v11147_v38  ;;  %10176 = vmatprep.mubr.msk.f32.mxu1 %vm11056_vm1, %v11057_v4 }
0x2bc5   :  { %10767 = vmatprep.subr.bf16.mxu1 %v11055_v0 }
0x2bc8   :  { %10769 = vmatpush3.bf16.msra.mxu1 %v11151_v39  ;;  %v8587_v39 = vsel %vm8674_vm4, 1, %v11059_v42 }
0x2bc9   :  { %10770 = vmatprep.subr.bf16.mxu1 %v11055_v0 }
0x2bcb   :  { %10177 = vmatmul.mubr.f32.vlgmr.msra.gmra.mrb[14].mxu1 %v8142_v48 }
0x2bcc   :  { %10772 = vmatpush3.bf16.msra.mxu1 %v11119_v11  ;;  %10187 = vmatprep.mubr.msk.f32.mxu1 %vm11056_vm1, %v11057_v4 }
0x2bcd   :  { %10773 = vmatprep.subr.bf16.mxu1 %v11055_v0 }
0x2bd0   :  { %10775 = vmatpush3.bf16.msra.mxu1 %v11122_v16 }
0x2bd1   :  { %10776 = vmatprep.subr.bf16.mxu1 %v11055_v0 }
0x2bd3   :  { %10188 = vmatmul.mubr.f32.vlgmr.msra.gmra.mrb[14].mxu1 %v8143_v49 }
0x2bd4   :  { %10778 = vmatpush3.bf16.msra.mxu1 %v11163_v40  ;;  %10198 = vmatprep.mubr.msk.f32.mxu1 %vm11056_vm1, %v11057_v4 }
0x2bd5   :  { %10779 = vmatprep.subr.bf16.mxu1 %v11055_v0 }
0x2bd8   :  { %10781 = vmatpush3.bf16.msra.mxu1 %v11167_v41 }
0x2bd9   :  { %10782 = vmatprep.subr.bf16.mxu1 %v11055_v0 }
0x2bdb   :  { %10199 = vmatmul.mubr.f32.vlgmr.msra.gmra.mrb[14].mxu1 %v8141_v47 }
0x2bdc   :  { %10784 = vmatpush3.bf16.msra.mxu1 %v11119_v11  ;;  %10209 = vmatprep.mubr.msk.f32.mxu1 %vm11056_vm1, %v11057_v4 }
0x2bdd   :  { %10785 = vmatprep.subr.bf16.mxu1 %v11055_v0  ;;  %v8672_v0 = vld [vmem:[%s12111_s0 + $0x78] sm:$0xff] }
0x2be0   :  { %10787 = vmatpush3.bf16.msra.mxu1 %v11122_v16 }
0x2be3   :  { %10210 = vmatmul.mubr.f32.vlgmr.msra.gmra.mrb[14].mxu1 %v8141_v47 }
0x2cb6   :  { %v8553_v33 = vpop.f32.mrb[14].mxu1 }
0x2cb7   :  { %v8564_v37 = vadd.f32 %v8553_v33, %v11188_v43  ;;  %v10211_v38 = vpop.f32.mrb[15].mxu1  ;;  %v8557_v4 = vadd.f32 %v8672_v0, %v8553_v33 }
0x2cb9   :  { %8566 = vrot.lane.b32.xlu0 %v8564_v37, %s11058_s30  ;;  %v8673_v11 = vmul.f32 -1.442695, %v8557_v4 }
0x2cbb   :  { %11047 = vpow2.f32 %v8673_v11 }
0x2cbd   :  { %8589 = vperm.xlu0 %10956, %v8587_v39  }
0x2cc1   :  { %571 = vrot.lane.b32.xlu0 %v11207_v6, %s11061_s11 }
0x2cc5   :  { %1640 = vrot.lane.b32.xlu0 %v11312_v17, %s11061_s11  ;;  %v11048_v16 = vpop.eup %11047 }
0x2cc6   :  { %v8561_v40 = vadd.f32 1.0, %v11048_v16 }
0x2cc8   :  { %11049 = vrcp.f32 %v8561_v40 }
0x2cc9   :  { %2710 = vrot.lane.b32.xlu0 %v11423_v30, %s11061_s11 }
0x2ccd   :  { %3780 = vrot.lane.b32.xlu0 %v11531_v53, %s11061_s11 }
0x2cd1   :  { %4850 = vrot.lane.b32.xlu0 %v11644_v12, %s11061_s11 }
0x2cd2   :  { %v11050_v41 = vpop.eup %11049 }
0x2cd3   :  { %v8576_v62 = vsub.f32 1.0, %v11050_v41  ;;  %v8582_v63 = vmul.f32 %v11050_v41, %v11964_v35 }
0x2cd5   :  { %5920 = vrot.lane.b32.xlu0 %v11752_v52, %s11061_s11 }
0x2cd9   :  { %6990 = vrot.lane.b32.xlu0 %v11860_v5, %s11061_s11 }
0x2cdd   :  { %8060 = vrot.lane.b32.xlu0 %v8058_v36, %s11061_s11 }
0x2d2b   :  { %v8567_v42 = vpop.permute.xlu0 %8566 }
0x2d2c   :  { %v8569_v43 = vmul.f32 %v11050_v41, %v8567_v42 }
0x2d2e   :  { %8571 = vrot.lane.b32.xlu1 %v8569_v43, %s11058_s30 }
0x2d3c   :  { %v8590_v6 = vpop.permute.xlu0 %8589 }
0x2d3d   :  { %vm8591_vm1 = vcmp.eq.s32.totalorder %v8590_v6, 1 }
0x2d40   :  { %v572_v17 = vpop.permute.xlu0 %571 }
0x2d41   :  { %574 = vst.msk [vmem:[%s12113_s4] sm:$0xff] %vm23_vm0, %v572_v17 }
0x2d44   :  { %v1641_v30 = vpop.permute.xlu0 %1640 }
0x2d45   :  { %8623 = vst.msk [vmem:[%s12113_s4 + $0x10] sm:$0xff] %vm23_vm0, %v1641_v30 }
0x2d48   :  { %v2711_v53 = vpop.permute.xlu0 %2710 }
0x2d49   :  { %8631 = vst.msk [vmem:[%s12113_s4 + $0x20] sm:$0xff] %vm23_vm0, %v2711_v53 }
0x2d4c   :  { %v3781_v12 = vpop.permute.xlu0 %3780 }
0x2d4d   :  { %8639 = vst.msk [vmem:[%s12113_s4 + $0x30] sm:$0xff] %vm23_vm0, %v3781_v12 }
0x2d50   :  { %v4851_v52 = vpop.permute.xlu0 %4850 }
0x2d51   :  { %8647 = vst.msk [vmem:[%s12113_s4 + $0x40] sm:$0xff] %vm23_vm0, %v4851_v52 }
0x2d54   :  { %v5921_v5 = vpop.permute.xlu0 %5920 }
0x2d55   :  { %8655 = vst.msk [vmem:[%s12113_s4 + $0x50] sm:$0xff] %vm23_vm0, %v5921_v5 }
0x2d58   :  { %v6991_v51 = vpop.permute.xlu0 %6990 }
0x2d59   :  { %8663 = vst.msk [vmem:[%s12113_s4 + $0x60] sm:$0xff] %vm23_vm0, %v6991_v51 }
0x2d5c   :  { %v8061_v57 = vpop.permute.xlu0 %8060 }
0x2d5d   :  { %8671 = vst.msk [vmem:[%s12113_s4 + $0x70] sm:$0xff] %vm23_vm0, %v8061_v57 }
0x2da0   :  { %v8572_v59 = vpop.permute.xlu1 %8571 }
0x2da1   :  { %v8574_v60 = vadd.f32 %v8672_v0, %v8572_v59 }
0x2da3   :  { %11051 = vtanh.f32 %v8574_v60 }
0x2dad   :  { %v11052_v61 = vpop.eup %11051 }
0x2dae   :  { %8578 = vrot.lane.b32.xlu1 %v11052_v61, %s11061_s11 }
0x2db2   :  { %1105 = vrot.lane.b32.xlu1 %v11261_v46, %s11061_s11 }
0x2db6   :  { %2175 = vrot.lane.b32.xlu1 %v11369_v58, %s11061_s11 }
0x2dba   :  { %3245 = vrot.lane.b32.xlu1 %v11477_v10, %s11061_s11 }
0x2dbe   :  { %4315 = vrot.lane.b32.xlu1 %v11590_v28, %s11061_s11 }
0x2dc2   :  { %5385 = vrot.lane.b32.xlu1 %v11698_v56, %s11061_s11 }
0x2dc6   :  { %6455 = vrot.lane.b32.xlu1 %v11806_v21, %s11061_s11 }
0x2dca   :  { %7525 = vrot.lane.b32.xlu1 %v11914_v54, %s11061_s11 }
0x2e20   :  { %v8579_v46 = vpop.permute.xlu1 %8578 }
0x2e21   :  { %v8581_v58 = vmul.f32 %v8579_v46, %v8576_v62 }
0x2e23   :  { %v8583_v1 = vadd.f32 %v8582_v63, %v8581_v58 }
0x2e24   :  { %v1106_v10 = vpop.permute.xlu1 %1105 }
0x2e25   :  { %8619 = vst.msk [vmem:[%s12113_s4 + $0x8] sm:$0xff] %vm23_vm0, %v1106_v10  ;;  %v8593_v28 = vsel %vm8591_vm1, %v8583_v1, 0.0  ;;  %v8592_v56 = vsel %vm8591_vm1, %v8583_v1, %v11964_v35 }
0x2e26   :  { %8595 = vrot.lane.b32.xlu1 %v8593_v28, %s11061_s11  ;;  %8601 = vrot.lane.b32.xlu0 %v8592_v56, %s11061_s11 }
0x2e28   :  { %v2176_v21 = vpop.permute.xlu1 %2175 }
0x2e29   :  { %8627 = vst.msk [vmem:[%s12113_s4 + $0x18] sm:$0xff] %vm23_vm0, %v2176_v21 }
0x2e2c   :  { %v3246_v54 = vpop.permute.xlu1 %3245 }
0x2e2d   :  { %8635 = vst.msk [vmem:[%s12113_s4 + $0x28] sm:$0xff] %vm23_vm0, %v3246_v54 }
0x2e30   :  { %v4316_v3 = vpop.permute.xlu1 %4315 }
0x2e31   :  { %8643 = vst.msk [vmem:[%s12113_s4 + $0x38] sm:$0xff] %vm23_vm0, %v4316_v3 }
0x2e34   :  { %v5386_v7 = vpop.permute.xlu1 %5385 }
0x2e35   :  { %8651 = vst.msk [vmem:[%s12113_s4 + $0x48] sm:$0xff] %vm23_vm0, %v5386_v7 }
0x2e38   :  { %v6456_v8 = vpop.permute.xlu1 %6455 }
0x2e39   :  { %8659 = vst.msk [vmem:[%s12113_s4 + $0x58] sm:$0xff] %vm23_vm0, %v6456_v8 }
0x2e3c   :  { %v7526_v9 = vpop.permute.xlu1 %7525 }
0x2e3d   :  { %8667 = vst.msk [vmem:[%s12113_s4 + $0x68] sm:$0xff] %vm23_vm0, %v7526_v9 }
0x2e98   :  { %v8602_v13 = vpop.permute.xlu0 %8601  ;;  %v8596_v14 = vpop.permute.xlu1 %8595 }
0x2e99   :  { %8604 = vst.msk [vmem:[%s12109_s5] sm:$0xff] %vm23_vm0, %v8602_v13  ;;  %8675 = vst.msk [vmem:[%s12113_s4 + $0x78] sm:$0xff] %vm23_vm0, %v8596_v14 }

</bundles_post_ra>
